<compile_context>
chip_gen: v7x
topology: tpu7x:2x2x1
jax: 0.10.0
libtpu: 0.0.40
codegen_flags: <defaults>
</compile_context>

<pallas_src>
import math
import numpy as np

import jax
import jax.numpy as jnp
from jax.experimental import pallas as pl
from jax.experimental.pallas import tpu as pltpu


# ------------------------------ Pallas kernel --------------------------------

def _cifarnet_kernel(p1_ref, w1_ref, s1_ref, c1_ref,
                     pm1_ref, t2_ref, w2_ref, s2_ref, c2_ref,
                     pm2_ref, t3_ref, w3_ref, s3_ref, c3_ref,
                     fw1_ref, fb1_ref, fw2_ref, fb2_ref, o_ref):
    f32 = jnp.float32
    bf16 = jnp.bfloat16

    # ---- conv1 (3->64) + BN + ReLU: one (HW, 32) @ (32, 64) MXU matmul ------
    a1 = jnp.dot(p1_ref[0], w1_ref[...], preferred_element_type=f32)
    y1 = jnp.maximum(a1 * s1_ref[...] + c1_ref[...], 0.0)            # (256, 64)
    y1 = y1.astype(bf16)

    # ---- MaxPool2d(2): 16x16 -> 8x8 via 4 exact 0/1 selection matmuls -------
    x2 = jnp.dot(pm1_ref[0], y1, preferred_element_type=f32)
    for b in range(1, 4):
        x2 = jnp.maximum(x2, jnp.dot(pm1_ref[b], y1, preferred_element_type=f32))
    x2 = x2.astype(bf16)                                             # (64, 64)

    # ---- conv2 (64->128) + BN + ReLU: sum over 9 taps of (T_t @ x) @ W_t ----
    acc2 = jnp.zeros((t2_ref.shape[1], w2_ref.shape[2]), f32)
    for t in range(9):
        shifted = jnp.dot(t2_ref[t], x2, preferred_element_type=f32).astype(bf16)
        acc2 = acc2 + jnp.dot(shifted, w2_ref[t], preferred_element_type=f32)
    y2 = jnp.maximum(acc2 * s2_ref[...] + c2_ref[...], 0.0)          # (64, 128)
    y2 = y2.astype(bf16)

    # ---- MaxPool2d(2): 8x8 -> 4x4 -------------------------------------------
    x3 = jnp.dot(pm2_ref[0], y2, preferred_element_type=f32)
    for b in range(1, 4):
        x3 = jnp.maximum(x3, jnp.dot(pm2_ref[b], y2, preferred_element_type=f32))
    x3 = x3.astype(bf16)                                             # (16, 128)

    # ---- conv3 (128->256) + BN + ReLU ---------------------------------------
    acc3 = jnp.zeros((t3_ref.shape[1], w3_ref.shape[2]), f32)
    for t in range(9):
        shifted = jnp.dot(t3_ref[t], x3, preferred_element_type=f32).astype(bf16)
        acc3 = acc3 + jnp.dot(shifted, w3_ref[t], preferred_element_type=f32)
    y3 = jnp.maximum(acc3 * s3_ref[...] + c3_ref[...], 0.0)          # (16, 256)

    # ---- AdaptiveAvgPool2d(1) + classifier -----------------------------------
    feat = jnp.mean(y3, axis=0, keepdims=True)                       # (1, 256)
    h = jnp.dot(feat.astype(bf16), fw1_ref[...], preferred_element_type=f32)
    h = jnp.maximum(h + fb1_ref[...], 0.0)                           # (1, 128)
    # Dropout(p=0.2) is identity in eval mode.
    logits = jnp.dot(h.astype(bf16), fw2_ref[...], preferred_element_type=f32)
    o_ref[0] = logits + fb2_ref[...]                                 # (1, 128) lane-dense


# ------------------- constant 0/1 spatial operator matrices -------------------

def _shift_mats(h, w):
    """9 (HW, HW) matrices: T_t @ x == 3x3-tap-shifted x (zero padded)."""
    hw = h * w
    m = np.zeros((9, hw, hw), np.float32)
    t = 0
    for ky in range(3):
        for kx in range(3):
            for i in range(h):
                for j in range(w):
                    ii, jj = i + ky - 1, j + kx - 1
                    if 0 <= ii < h and 0 <= jj < w:
                        m[t, i * w + j, ii * w + jj] = 1.0
            t += 1
    return jnp.asarray(m, jnp.bfloat16)


def _pool_mats(h, w):
    """4 (HW/4, HW) matrices: max_b(P_b @ x) == MaxPool2d(2) of x."""
    ho, wo = h // 2, w // 2
    m = np.zeros((4, ho * wo, h * w), np.float32)
    b = 0
    for dy in range(2):
        for dx in range(2):
            for p in range(ho):
                for q in range(wo):
                    m[b, p * wo + q, (2 * p + dy) * w + (2 * q + dx)] = 1.0
            b += 1
    return jnp.asarray(m, jnp.bfloat16)


# -------------------------------- Parameters ----------------------------------

def make_params(key, h=16, w=16):
    """Deterministic init matching CIFARNet._initialize_weights (eval mode)."""
    ks = jax.random.split(key, 10)
    eps = 1e-5
    bf16 = jnp.bfloat16

    def conv_block(kw, kb, cin, cout):
        fan_out = cout * 9
        wgt = jax.random.normal(kw, (cout, cin, 3, 3), jnp.float32) * math.sqrt(2.0 / fan_out)
        bound = 1.0 / math.sqrt(cin * 9)
        b = jax.random.uniform(kb, (cout,), jnp.float32, -bound, bound)
        # (Cout,Cin,3,3) -> (ky,kx,Cin,Cout) -> per-tap (9, Cin, Cout)
        w_taps = jnp.transpose(wgt, (2, 3, 1, 0)).reshape(9, cin, cout)
        # BN eval (gamma=1, beta=0, mean=0, var=1) folded with the conv bias.
        scale = jnp.full((1, cout), 1.0 / math.sqrt(1.0 + eps), jnp.float32)
        bias = scale * b.reshape(1, cout)
        return w_taps, scale, bias

    def linear(kw, kb, fin, fout):
        wgt = jax.random.normal(kw, (fout, fin), jnp.float32) * 0.01
        bound = 1.0 / math.sqrt(fin)
        b = jax.random.uniform(kb, (fout,), jnp.float32, -bound, bound)
        return wgt.T, b.reshape(1, fout)          # (fin, fout), (1, fout)

    w1t, s1, c1 = conv_block(ks[0], ks[1], 3, 64)
    w2t, s2, c2 = conv_block(ks[2], ks[3], 64, 128)
    w3t, s3, c3 = conv_block(ks[4], ks[5], 128, 256)
    fw1, fb1 = linear(ks[6], ks[7], 256, 128)
    fw2, fb2 = linear(ks[8], ks[9], 128, 10)

    # conv1: flatten taps to an im2col weight (27, 64), pad K 27 -> 32, bf16.
    w1 = jnp.pad(w1t.reshape(27, 64), ((0, 5), (0, 0))).astype(bf16)
    # conv2/conv3: per-tap (9, Cin, Cout) bf16 for in-kernel tap matmuls.
    w2 = w2t.astype(bf16)
    w3 = w3t.astype(bf16)
    # classifier: bf16 weights; pad fc2 output 10 -> 128 for a lane-dense store.
    fw1 = fw1.astype(bf16)
    fw2 = jnp.pad(fw2, ((0, 0), (0, 118))).astype(bf16)
    fb2 = jnp.pad(fb2, ((0, 0), (0, 118)))

    return dict(
        w1=w1, s1=s1, c1=c1,
        w2=w2, s2=s2, c2=c2,
        w3=w3, s3=s3, c3=c3,
        fw1=fw1, fb1=fb1, fw2=fw2, fb2=fb2,
        pm1=_pool_mats(h, w), t2=_shift_mats(h // 2, w // 2),
        pm2=_pool_mats(h // 2, w // 2), t3=_shift_mats(h // 4, w // 4),
    )


# --------------------------------- Forward ------------------------------------

def _full_block(a):
    return pl.BlockSpec(a.shape, lambda i: (0,) * a.ndim)


def cifarnet_forward(params, x_nchw):
    x = jnp.transpose(x_nchw, (0, 2, 3, 1)).astype(jnp.float32)      # NCHW -> NHWC
    n, h, w, cin = x.shape
    hw, hw2, hw3 = h * w, (h * w) // 4, (h * w) // 16

    # conv1 im2col in the wrapper (tiny input layer): (N, HW, 27) -> pad K to 32.
    xp = jnp.pad(x, ((0, 0), (1, 1), (1, 1), (0, 0)))
    taps = [xp[:, dy:dy + h, dx:dx + w, :] for dy in range(3) for dx in range(3)]
    patches = jnp.concatenate(taps, axis=-1).reshape(n, hw, 9 * cin)
    patches = jnp.pad(patches, ((0, 0), (0, 0), (0, 32 - 9 * cin))).astype(jnp.bfloat16)

    weight_keys = ("w1", "s1", "c1", "pm1", "t2", "w2", "s2", "c2",
                   "pm2", "t3", "w3", "s3", "c3", "fw1", "fb1", "fw2", "fb2")

    out = pl.pallas_call(
        _cifarnet_kernel,
        out_shape=jax.ShapeDtypeStruct((n, 1, 128), jnp.float32),
        grid=(n,),
        in_specs=[pl.BlockSpec((1, hw, 32), lambda i: (i, 0, 0))]
                 + [_full_block(params[k]) for k in weight_keys],
        out_specs=pl.BlockSpec((1, 1, 128), lambda i: (i, 0, 0)),
        compiler_params=pltpu.CompilerParams(dimension_semantics=("parallel",)),
    )(patches, *[params[k] for k in weight_keys])

    return out[:, 0, :10]


if __name__ == "__main__":
    key = jax.random.PRNGKey(0)
    k_x, k_p = jax.random.split(key)
    # small CIFAR-like input: batch=2, channels=3 (fixed by conv1), spatial=16
    x = jax.random.normal(k_x, (2, 3, 16, 16), jnp.float32)
    params = make_params(k_p, h=16, w=16)

    logits = jax.jit(cifarnet_forward)(params, x)
    logits = jax.block_until_ready(logits)
    assert logits.shape == (2, 10)
    assert bool(jnp.all(jnp.isfinite(logits)))
    print("KERNEL_OK")
</pallas_src>

<mosaic_0001>
module attributes {stable_mosaic.version = 11 : i64} {
  func.func @_cifarnet_kernel(%arg0: i32, %arg1: memref<1x256x32xbf16, #tpu.memory_space<vmem>>, %arg2: memref<32x64xbf16, #tpu.memory_space<vmem>>, %arg3: memref<1x64xf32, #tpu.memory_space<vmem>>, %arg4: memref<1x64xf32, #tpu.memory_space<vmem>>, %arg5: memref<4x64x256xbf16, #tpu.memory_space<vmem>>, %arg6: memref<9x64x64xbf16, #tpu.memory_space<vmem>>, %arg7: memref<9x64x128xbf16, #tpu.memory_space<vmem>>, %arg8: memref<1x128xf32, #tpu.memory_space<vmem>>, %arg9: memref<1x128xf32, #tpu.memory_space<vmem>>, %arg10: memref<4x16x64xbf16, #tpu.memory_space<vmem>>, %arg11: memref<9x16x16xbf16, #tpu.memory_space<vmem>>, %arg12: memref<9x128x256xbf16, #tpu.memory_space<vmem>>, %arg13: memref<1x256xf32, #tpu.memory_space<vmem>>, %arg14: memref<1x256xf32, #tpu.memory_space<vmem>>, %arg15: memref<256x128xbf16, #tpu.memory_space<vmem>>, %arg16: memref<1x128xf32, #tpu.memory_space<vmem>>, %arg17: memref<128x128xbf16, #tpu.memory_space<vmem>>, %arg18: memref<1x128xf32, #tpu.memory_space<vmem>>, %arg19: memref<1x1x128xf32, #tpu.memory_space<vmem>>) attributes {dimension_semantics = [#tpu.dimension_semantics<parallel>], iteration_bounds = array<i64: 2>, scalar_prefetch = 0 : i64, scratch_operands = 0 : i64, tpu.core_type = #tpu.core_type<tc>, window_params = [{transform_indices = @transform_0, window_bounds = array<i64: 1, 256, 32>}, {pipeline_mode = #tpu.pipeline_mode<synchronous>, transform_indices = @transform_1, window_bounds = array<i64: 32, 64>}, {pipeline_mode = #tpu.pipeline_mode<synchronous>, transform_indices = @transform_2, window_bounds = array<i64: 1, 64>}, {pipeline_mode = #tpu.pipeline_mode<synchronous>, transform_indices = @transform_3, window_bounds = array<i64: 1, 64>}, {pipeline_mode = #tpu.pipeline_mode<synchronous>, transform_indices = @transform_4, window_bounds = array<i64: 4, 64, 256>}, {pipeline_mode = #tpu.pipeline_mode<synchronous>, transform_indices = @transform_5, window_bounds = array<i64: 9, 64, 64>}, {pipeline_mode = #tpu.pipeline_mode<synchronous>, transform_indices = @transform_6, window_bounds = array<i64: 9, 64, 128>}, {pipeline_mode = #tpu.pipeline_mode<synchronous>, transform_indices = @transform_7, window_bounds = array<i64: 1, 128>}, {pipeline_mode = #tpu.pipeline_mode<synchronous>, transform_indices = @transform_8, window_bounds = array<i64: 1, 128>}, {pipeline_mode = #tpu.pipeline_mode<synchronous>, transform_indices = @transform_9, window_bounds = array<i64: 4, 16, 64>}, {pipeline_mode = #tpu.pipeline_mode<synchronous>, transform_indices = @transform_10, window_bounds = array<i64: 9, 16, 16>}, {pipeline_mode = #tpu.pipeline_mode<synchronous>, transform_indices = @transform_11, window_bounds = array<i64: 9, 128, 256>}, {pipeline_mode = #tpu.pipeline_mode<synchronous>, transform_indices = @transform_12, window_bounds = array<i64: 1, 256>}, {pipeline_mode = #tpu.pipeline_mode<synchronous>, transform_indices = @transform_13, window_bounds = array<i64: 1, 256>}, {pipeline_mode = #tpu.pipeline_mode<synchronous>, transform_indices = @transform_14, window_bounds = array<i64: 256, 128>}, {pipeline_mode = #tpu.pipeline_mode<synchronous>, transform_indices = @transform_15, window_bounds = array<i64: 1, 128>}, {pipeline_mode = #tpu.pipeline_mode<synchronous>, transform_indices = @transform_16, window_bounds = array<i64: 128, 128>}, {pipeline_mode = #tpu.pipeline_mode<synchronous>, transform_indices = @transform_17, window_bounds = array<i64: 1, 128>}, {transform_indices = @transform_18, window_bounds = array<i64: 1, 1, 128>}]} {
    %c0 = arith.constant 0 : index
    %c0_0 = arith.constant 0 : index
    %c0_1 = arith.constant 0 : index
    %0 = vector.load %arg1[%c0, %c0_0, %c0_1] : memref<1x256x32xbf16, #tpu.memory_space<vmem>>, vector<1x256x32xbf16>
    %1 = vector.shape_cast %0 : vector<1x256x32xbf16> to vector<256x32xbf16>
    %c0_2 = arith.constant 0 : index
    %c0_3 = arith.constant 0 : index
    %2 = vector.load %arg2[%c0_2, %c0_3] : memref<32x64xbf16, #tpu.memory_space<vmem>>, vector<32x64xbf16>
    %cst = arith.constant dense<0.000000e+00> : vector<256x64xf32>
    %3 = tpu.matmul %1, %2, %cst {dimension_numbers = #tpu.dot_dimension_numbers<[1], [0], [0], [1], [0, 0, 1, 1], [], []>} : vector<256x32xbf16>, vector<32x64xbf16>, vector<256x64xf32> -> vector<256x64xf32>
    %c0_4 = arith.constant 0 : index
    %c0_5 = arith.constant 0 : index
    %4 = vector.load %arg3[%c0_4, %c0_5] : memref<1x64xf32, #tpu.memory_space<vmem>>, vector<1x64xf32>
    %5 = vector.broadcast %4 : vector<1x64xf32> to vector<256x64xf32>
    %6 = arith.mulf %3, %5 : vector<256x64xf32>
    %c0_6 = arith.constant 0 : index
    %c0_7 = arith.constant 0 : index
    %7 = vector.load %arg4[%c0_6, %c0_7] : memref<1x64xf32, #tpu.memory_space<vmem>>, vector<1x64xf32>
    %8 = vector.broadcast %7 : vector<1x64xf32> to vector<256x64xf32>
    %9 = arith.addf %6, %8 : vector<256x64xf32>
    %cst_8 = arith.constant 0.000000e+00 : f32
    %10 = vector.broadcast %cst_8 : f32 to vector<256x64xf32>
    %11 = arith.maximumf %9, %10 : vector<256x64xf32>
    %12 = arith.truncf %11 : vector<256x64xf32> to vector<256x64xbf16>
    %c0_9 = arith.constant 0 : index
    %c0_10 = arith.constant 0 : index
    %c0_11 = arith.constant 0 : index
    %13 = vector.load %arg5[%c0_9, %c0_10, %c0_11] : memref<4x64x256xbf16, #tpu.memory_space<vmem>>, vector<1x64x256xbf16>
    %14 = vector.shape_cast %13 : vector<1x64x256xbf16> to vector<64x256xbf16>
    %cst_12 = arith.constant dense<0.000000e+00> : vector<64x64xf32>
    %15 = tpu.matmul %14, %12, %cst_12 {dimension_numbers = #tpu.dot_dimension_numbers<[1], [0], [0], [1], [0, 0, 1, 1], [], []>} : vector<64x256xbf16>, vector<256x64xbf16>, vector<64x64xf32> -> vector<64x64xf32>
    %c1 = arith.constant 1 : index
    %c0_13 = arith.constant 0 : index
    %c0_14 = arith.constant 0 : index
    %16 = vector.load %arg5[%c1, %c0_13, %c0_14] : memref<4x64x256xbf16, #tpu.memory_space<vmem>>, vector<1x64x256xbf16>
    %17 = vector.shape_cast %16 : vector<1x64x256xbf16> to vector<64x256xbf16>
    %cst_15 = arith.constant dense<0.000000e+00> : vector<64x64xf32>
    %18 = tpu.matmul %17, %12, %cst_15 {dimension_numbers = #tpu.dot_dimension_numbers<[1], [0], [0], [1], [0, 0, 1, 1], [], []>} : vector<64x256xbf16>, vector<256x64xbf16>, vector<64x64xf32> -> vector<64x64xf32>
    %19 = arith.maximumf %15, %18 : vector<64x64xf32>
    %c2 = arith.constant 2 : index
    %c0_16 = arith.constant 0 : index
    %c0_17 = arith.constant 0 : index
    %20 = vector.load %arg5[%c2, %c0_16, %c0_17] : memref<4x64x256xbf16, #tpu.memory_space<vmem>>, vector<1x64x256xbf16>
    %21 = vector.shape_cast %20 : vector<1x64x256xbf16> to vector<64x256xbf16>
    %cst_18 = arith.constant dense<0.000000e+00> : vector<64x64xf32>
    %22 = tpu.matmul %21, %12, %cst_18 {dimension_numbers = #tpu.dot_dimension_numbers<[1], [0], [0], [1], [0, 0, 1, 1], [], []>} : vector<64x256xbf16>, vector<256x64xbf16>, vector<64x64xf32> -> vector<64x64xf32>
    %23 = arith.maximumf %19, %22 : vector<64x64xf32>
    %c3 = arith.constant 3 : index
    %c0_19 = arith.constant 0 : index
    %c0_20 = arith.constant 0 : index
    %24 = vector.load %arg5[%c3, %c0_19, %c0_20] : memref<4x64x256xbf16, #tpu.memory_space<vmem>>, vector<1x64x256xbf16>
    %25 = vector.shape_cast %24 : vector<1x64x256xbf16> to vector<64x256xbf16>
    %cst_21 = arith.constant dense<0.000000e+00> : vector<64x64xf32>
    %26 = tpu.matmul %25, %12, %cst_21 {dimension_numbers = #tpu.dot_dimension_numbers<[1], [0], [0], [1], [0, 0, 1, 1], [], []>} : vector<64x256xbf16>, vector<256x64xbf16>, vector<64x64xf32> -> vector<64x64xf32>
    %27 = arith.maximumf %23, %26 : vector<64x64xf32>
    %28 = arith.truncf %27 : vector<64x64xf32> to vector<64x64xbf16>
    %cst_22 = arith.constant 0.000000e+00 : f32
    %29 = vector.broadcast %cst_22 : f32 to vector<64x128xf32>
    %c0_23 = arith.constant 0 : index
    %c0_24 = arith.constant 0 : index
    %c0_25 = arith.constant 0 : index
    %30 = vector.load %arg6[%c0_23, %c0_24, %c0_25] : memref<9x64x64xbf16, #tpu.memory_space<vmem>>, vector<1x64x64xbf16>
    %31 = vector.shape_cast %30 : vector<1x64x64xbf16> to vector<64x64xbf16>
    %cst_26 = arith.constant dense<0.000000e+00> : vector<64x64xf32>
    %32 = tpu.matmul %31, %28, %cst_26 {dimension_numbers = #tpu.dot_dimension_numbers<[1], [0], [0], [1], [0, 0, 1, 1], [], []>} : vector<64x64xbf16>, vector<64x64xbf16>, vector<64x64xf32> -> vector<64x64xf32>
    %33 = arith.truncf %32 : vector<64x64xf32> to vector<64x64xbf16>
    %c0_27 = arith.constant 0 : index
    %c0_28 = arith.constant 0 : index
    %c0_29 = arith.constant 0 : index
    %34 = vector.load %arg7[%c0_27, %c0_28, %c0_29] : memref<9x64x128xbf16, #tpu.memory_space<vmem>>, vector<1x64x128xbf16>
    %35 = vector.shape_cast %34 : vector<1x64x128xbf16> to vector<64x128xbf16>
    %cst_30 = arith.constant dense<0.000000e+00> : vector<64x128xf32>
    %36 = tpu.matmul %33, %35, %cst_30 {dimension_numbers = #tpu.dot_dimension_numbers<[1], [0], [0], [1], [0, 0, 1, 1], [], []>} : vector<64x64xbf16>, vector<64x128xbf16>, vector<64x128xf32> -> vector<64x128xf32>
    %37 = arith.addf %29, %36 : vector<64x128xf32>
    %c1_31 = arith.constant 1 : index
    %c0_32 = arith.constant 0 : index
    %c0_33 = arith.constant 0 : index
    %38 = vector.load %arg6[%c1_31, %c0_32, %c0_33] : memref<9x64x64xbf16, #tpu.memory_space<vmem>>, vector<1x64x64xbf16>
    %39 = vector.shape_cast %38 : vector<1x64x64xbf16> to vector<64x64xbf16>
    %cst_34 = arith.constant dense<0.000000e+00> : vector<64x64xf32>
    %40 = tpu.matmul %39, %28, %cst_34 {dimension_numbers = #tpu.dot_dimension_numbers<[1], [0], [0], [1], [0, 0, 1, 1], [], []>} : vector<64x64xbf16>, vector<64x64xbf16>, vector<64x64xf32> -> vector<64x64xf32>
    %41 = arith.truncf %40 : vector<64x64xf32> to vector<64x64xbf16>
    %c1_35 = arith.constant 1 : index
    %c0_36 = arith.constant 0 : index
    %c0_37 = arith.constant 0 : index
    %42 = vector.load %arg7[%c1_35, %c0_36, %c0_37] : memref<9x64x128xbf16, #tpu.memory_space<vmem>>, vector<1x64x128xbf16>
    %43 = vector.shape_cast %42 : vector<1x64x128xbf16> to vector<64x128xbf16>
    %cst_38 = arith.constant dense<0.000000e+00> : vector<64x128xf32>
    %44 = tpu.matmul %41, %43, %cst_38 {dimension_numbers = #tpu.dot_dimension_numbers<[1], [0], [0], [1], [0, 0, 1, 1], [], []>} : vector<64x64xbf16>, vector<64x128xbf16>, vector<64x128xf32> -> vector<64x128xf32>
    %45 = arith.addf %37, %44 : vector<64x128xf32>
    %c2_39 = arith.constant 2 : index
    %c0_40 = arith.constant 0 : index
    %c0_41 = arith.constant 0 : index
    %46 = vector.load %arg6[%c2_39, %c0_40, %c0_41] : memref<9x64x64xbf16, #tpu.memory_space<vmem>>, vector<1x64x64xbf16>
    %47 = vector.shape_cast %46 : vector<1x64x64xbf16> to vector<64x64xbf16>
    %cst_42 = arith.constant dense<0.000000e+00> : vector<64x64xf32>
    %48 = tpu.matmul %47, %28, %cst_42 {dimension_numbers = #tpu.dot_dimension_numbers<[1], [0], [0], [1], [0, 0, 1, 1], [], []>} : vector<64x64xbf16>, vector<64x64xbf16>, vector<64x64xf32> -> vector<64x64xf32>
    %49 = arith.truncf %48 : vector<64x64xf32> to vector<64x64xbf16>
    %c2_43 = arith.constant 2 : index
    %c0_44 = arith.constant 0 : index
    %c0_45 = arith.constant 0 : index
    %50 = vector.load %arg7[%c2_43, %c0_44, %c0_45] : memref<9x64x128xbf16, #tpu.memory_space<vmem>>, vector<1x64x128xbf16>
    %51 = vector.shape_cast %50 : vector<1x64x128xbf16> to vector<64x128xbf16>
    %cst_46 = arith.constant dense<0.000000e+00> : vector<64x128xf32>
    %52 = tpu.matmul %49, %51, %cst_46 {dimension_numbers = #tpu.dot_dimension_numbers<[1], [0], [0], [1], [0, 0, 1, 1], [], []>} : vector<64x64xbf16>, vector<64x128xbf16>, vector<64x128xf32> -> vector<64x128xf32>
    %53 = arith.addf %45, %52 : vector<64x128xf32>
    %c3_47 = arith.constant 3 : index
    %c0_48 = arith.constant 0 : index
    %c0_49 = arith.constant 0 : index
    %54 = vector.load %arg6[%c3_47, %c0_48, %c0_49] : memref<9x64x64xbf16, #tpu.memory_space<vmem>>, vector<1x64x64xbf16>
    %55 = vector.shape_cast %54 : vector<1x64x64xbf16> to vector<64x64xbf16>
    %cst_50 = arith.constant dense<0.000000e+00> : vector<64x64xf32>
    %56 = tpu.matmul %55, %28, %cst_50 {dimension_numbers = #tpu.dot_dimension_numbers<[1], [0], [0], [1], [0, 0, 1, 1], [], []>} : vector<64x64xbf16>, vector<64x64xbf16>, vector<64x64xf32> -> vector<64x64xf32>
    %57 = arith.truncf %56 : vector<64x64xf32> to vector<64x64xbf16>
    %c3_51 = arith.constant 3 : index
    %c0_52 = arith.constant 0 : index
    %c0_53 = arith.constant 0 : index
    %58 = vector.load %arg7[%c3_51, %c0_52, %c0_53] : memref<9x64x128xbf16, #tpu.memory_space<vmem>>, vector<1x64x128xbf16>
    %59 = vector.shape_cast %58 : vector<1x64x128xbf16> to vector<64x128xbf16>
    %cst_54 = arith.constant dense<0.000000e+00> : vector<64x128xf32>
    %60 = tpu.matmul %57, %59, %cst_54 {dimension_numbers = #tpu.dot_dimension_numbers<[1], [0], [0], [1], [0, 0, 1, 1], [], []>} : vector<64x64xbf16>, vector<64x128xbf16>, vector<64x128xf32> -> vector<64x128xf32>
    %61 = arith.addf %53, %60 : vector<64x128xf32>
    %c4 = arith.constant 4 : index
    %c0_55 = arith.constant 0 : index
    %c0_56 = arith.constant 0 : index
    %62 = vector.load %arg6[%c4, %c0_55, %c0_56] : memref<9x64x64xbf16, #tpu.memory_space<vmem>>, vector<1x64x64xbf16>
    %63 = vector.shape_cast %62 : vector<1x64x64xbf16> to vector<64x64xbf16>
    %cst_57 = arith.constant dense<0.000000e+00> : vector<64x64xf32>
    %64 = tpu.matmul %63, %28, %cst_57 {dimension_numbers = #tpu.dot_dimension_numbers<[1], [0], [0], [1], [0, 0, 1, 1], [], []>} : vector<64x64xbf16>, vector<64x64xbf16>, vector<64x64xf32> -> vector<64x64xf32>
    %65 = arith.truncf %64 : vector<64x64xf32> to vector<64x64xbf16>
    %c4_58 = arith.constant 4 : index
    %c0_59 = arith.constant 0 : index
    %c0_60 = arith.constant 0 : index
    %66 = vector.load %arg7[%c4_58, %c0_59, %c0_60] : memref<9x64x128xbf16, #tpu.memory_space<vmem>>, vector<1x64x128xbf16>
    %67 = vector.shape_cast %66 : vector<1x64x128xbf16> to vector<64x128xbf16>
    %cst_61 = arith.constant dense<0.000000e+00> : vector<64x128xf32>
    %68 = tpu.matmul %65, %67, %cst_61 {dimension_numbers = #tpu.dot_dimension_numbers<[1], [0], [0], [1], [0, 0, 1, 1], [], []>} : vector<64x64xbf16>, vector<64x128xbf16>, vector<64x128xf32> -> vector<64x128xf32>
    %69 = arith.addf %61, %68 : vector<64x128xf32>
    %c5 = arith.constant 5 : index
    %c0_62 = arith.constant 0 : index
    %c0_63 = arith.constant 0 : index
    %70 = vector.load %arg6[%c5, %c0_62, %c0_63] : memref<9x64x64xbf16, #tpu.memory_space<vmem>>, vector<1x64x64xbf16>
    %71 = vector.shape_cast %70 : vector<1x64x64xbf16> to vector<64x64xbf16>
    %cst_64 = arith.constant dense<0.000000e+00> : vector<64x64xf32>
    %72 = tpu.matmul %71, %28, %cst_64 {dimension_numbers = #tpu.dot_dimension_numbers<[1], [0], [0], [1], [0, 0, 1, 1], [], []>} : vector<64x64xbf16>, vector<64x64xbf16>, vector<64x64xf32> -> vector<64x64xf32>
    %73 = arith.truncf %72 : vector<64x64xf32> to vector<64x64xbf16>
    %c5_65 = arith.constant 5 : index
    %c0_66 = arith.constant 0 : index
    %c0_67 = arith.constant 0 : index
    %74 = vector.load %arg7[%c5_65, %c0_66, %c0_67] : memref<9x64x128xbf16, #tpu.memory_space<vmem>>, vector<1x64x128xbf16>
    %75 = vector.shape_cast %74 : vector<1x64x128xbf16> to vector<64x128xbf16>
    %cst_68 = arith.constant dense<0.000000e+00> : vector<64x128xf32>
    %76 = tpu.matmul %73, %75, %cst_68 {dimension_numbers = #tpu.dot_dimension_numbers<[1], [0], [0], [1], [0, 0, 1, 1], [], []>} : vector<64x64xbf16>, vector<64x128xbf16>, vector<64x128xf32> -> vector<64x128xf32>
    %77 = arith.addf %69, %76 : vector<64x128xf32>
    %c6 = arith.constant 6 : index
    %c0_69 = arith.constant 0 : index
    %c0_70 = arith.constant 0 : index
    %78 = vector.load %arg6[%c6, %c0_69, %c0_70] : memref<9x64x64xbf16, #tpu.memory_space<vmem>>, vector<1x64x64xbf16>
    %79 = vector.shape_cast %78 : vector<1x64x64xbf16> to vector<64x64xbf16>
    %cst_71 = arith.constant dense<0.000000e+00> : vector<64x64xf32>
    %80 = tpu.matmul %79, %28, %cst_71 {dimension_numbers = #tpu.dot_dimension_numbers<[1], [0], [0], [1], [0, 0, 1, 1], [], []>} : vector<64x64xbf16>, vector<64x64xbf16>, vector<64x64xf32> -> vector<64x64xf32>
    %81 = arith.truncf %80 : vector<64x64xf32> to vector<64x64xbf16>
    %c6_72 = arith.constant 6 : index
    %c0_73 = arith.constant 0 : index
    %c0_74 = arith.constant 0 : index
    %82 = vector.load %arg7[%c6_72, %c0_73, %c0_74] : memref<9x64x128xbf16, #tpu.memory_space<vmem>>, vector<1x64x128xbf16>
    %83 = vector.shape_cast %82 : vector<1x64x128xbf16> to vector<64x128xbf16>
    %cst_75 = arith.constant dense<0.000000e+00> : vector<64x128xf32>
    %84 = tpu.matmul %81, %83, %cst_75 {dimension_numbers = #tpu.dot_dimension_numbers<[1], [0], [0], [1], [0, 0, 1, 1], [], []>} : vector<64x64xbf16>, vector<64x128xbf16>, vector<64x128xf32> -> vector<64x128xf32>
    %85 = arith.addf %77, %84 : vector<64x128xf32>
    %c7 = arith.constant 7 : index
    %c0_76 = arith.constant 0 : index
    %c0_77 = arith.constant 0 : index
    %86 = vector.load %arg6[%c7, %c0_76, %c0_77] : memref<9x64x64xbf16, #tpu.memory_space<vmem>>, vector<1x64x64xbf16>
    %87 = vector.shape_cast %86 : vector<1x64x64xbf16> to vector<64x64xbf16>
    %cst_78 = arith.constant dense<0.000000e+00> : vector<64x64xf32>
    %88 = tpu.matmul %87, %28, %cst_78 {dimension_numbers = #tpu.dot_dimension_numbers<[1], [0], [0], [1], [0, 0, 1, 1], [], []>} : vector<64x64xbf16>, vector<64x64xbf16>, vector<64x64xf32> -> vector<64x64xf32>
    %89 = arith.truncf %88 : vector<64x64xf32> to vector<64x64xbf16>
    %c7_79 = arith.constant 7 : index
    %c0_80 = arith.constant 0 : index
    %c0_81 = arith.constant 0 : index
    %90 = vector.load %arg7[%c7_79, %c0_80, %c0_81] : memref<9x64x128xbf16, #tpu.memory_space<vmem>>, vector<1x64x128xbf16>
    %91 = vector.shape_cast %90 : vector<1x64x128xbf16> to vector<64x128xbf16>
    %cst_82 = arith.constant dense<0.000000e+00> : vector<64x128xf32>
    %92 = tpu.matmul %89, %91, %cst_82 {dimension_numbers = #tpu.dot_dimension_numbers<[1], [0], [0], [1], [0, 0, 1, 1], [], []>} : vector<64x64xbf16>, vector<64x128xbf16>, vector<64x128xf32> -> vector<64x128xf32>
    %93 = arith.addf %85, %92 : vector<64x128xf32>
    %c8 = arith.constant 8 : index
    %c0_83 = arith.constant 0 : index
    %c0_84 = arith.constant 0 : index
    %94 = vector.load %arg6[%c8, %c0_83, %c0_84] : memref<9x64x64xbf16, #tpu.memory_space<vmem>>, vector<1x64x64xbf16>
    %95 = vector.shape_cast %94 : vector<1x64x64xbf16> to vector<64x64xbf16>
    %cst_85 = arith.constant dense<0.000000e+00> : vector<64x64xf32>
    %96 = tpu.matmul %95, %28, %cst_85 {dimension_numbers = #tpu.dot_dimension_numbers<[1], [0], [0], [1], [0, 0, 1, 1], [], []>} : vector<64x64xbf16>, vector<64x64xbf16>, vector<64x64xf32> -> vector<64x64xf32>
    %97 = arith.truncf %96 : vector<64x64xf32> to vector<64x64xbf16>
    %c8_86 = arith.constant 8 : index
    %c0_87 = arith.constant 0 : index
    %c0_88 = arith.constant 0 : index
    %98 = vector.load %arg7[%c8_86, %c0_87, %c0_88] : memref<9x64x128xbf16, #tpu.memory_space<vmem>>, vector<1x64x128xbf16>
    %99 = vector.shape_cast %98 : vector<1x64x128xbf16> to vector<64x128xbf16>
    %cst_89 = arith.constant dense<0.000000e+00> : vector<64x128xf32>
    %100 = tpu.matmul %97, %99, %cst_89 {dimension_numbers = #tpu.dot_dimension_numbers<[1], [0], [0], [1], [0, 0, 1, 1], [], []>} : vector<64x64xbf16>, vector<64x128xbf16>, vector<64x128xf32> -> vector<64x128xf32>
    %101 = arith.addf %93, %100 : vector<64x128xf32>
    %c0_90 = arith.constant 0 : index
    %c0_91 = arith.constant 0 : index
    %102 = vector.load %arg8[%c0_90, %c0_91] : memref<1x128xf32, #tpu.memory_space<vmem>>, vector<1x128xf32>
    %103 = vector.broadcast %102 : vector<1x128xf32> to vector<64x128xf32>
    %104 = arith.mulf %101, %103 : vector<64x128xf32>
    %c0_92 = arith.constant 0 : index
    %c0_93 = arith.constant 0 : index
    %105 = vector.load %arg9[%c0_92, %c0_93] : memref<1x128xf32, #tpu.memory_space<vmem>>, vector<1x128xf32>
    %106 = vector.broadcast %105 : vector<1x128xf32> to vector<64x128xf32>
    %107 = arith.addf %104, %106 : vector<64x128xf32>
    %cst_94 = arith.constant 0.000000e+00 : f32
    %108 = vector.broadcast %cst_94 : f32 to vector<64x128xf32>
    %109 = arith.maximumf %107, %108 : vector<64x128xf32>
    %110 = arith.truncf %109 : vector<64x128xf32> to vector<64x128xbf16>
    %c0_95 = arith.constant 0 : index
    %c0_96 = arith.constant 0 : index
    %c0_97 = arith.constant 0 : index
    %111 = vector.load %arg10[%c0_95, %c0_96, %c0_97] : memref<4x16x64xbf16, #tpu.memory_space<vmem>>, vector<1x16x64xbf16>
    %112 = vector.shape_cast %111 : vector<1x16x64xbf16> to vector<16x64xbf16>
    %cst_98 = arith.constant dense<0.000000e+00> : vector<16x128xf32>
    %113 = tpu.matmul %112, %110, %cst_98 {dimension_numbers = #tpu.dot_dimension_numbers<[1], [0], [0], [1], [0, 0, 1, 1], [], []>} : vector<16x64xbf16>, vector<64x128xbf16>, vector<16x128xf32> -> vector<16x128xf32>
    %c1_99 = arith.constant 1 : index
    %c0_100 = arith.constant 0 : index
    %c0_101 = arith.constant 0 : index
    %114 = vector.load %arg10[%c1_99, %c0_100, %c0_101] : memref<4x16x64xbf16, #tpu.memory_space<vmem>>, vector<1x16x64xbf16>
    %115 = vector.shape_cast %114 : vector<1x16x64xbf16> to vector<16x64xbf16>
    %cst_102 = arith.constant dense<0.000000e+00> : vector<16x128xf32>
    %116 = tpu.matmul %115, %110, %cst_102 {dimension_numbers = #tpu.dot_dimension_numbers<[1], [0], [0], [1], [0, 0, 1, 1], [], []>} : vector<16x64xbf16>, vector<64x128xbf16>, vector<16x128xf32> -> vector<16x128xf32>
    %117 = arith.maximumf %113, %116 : vector<16x128xf32>
    %c2_103 = arith.constant 2 : index
    %c0_104 = arith.constant 0 : index
    %c0_105 = arith.constant 0 : index
    %118 = vector.load %arg10[%c2_103, %c0_104, %c0_105] : memref<4x16x64xbf16, #tpu.memory_space<vmem>>, vector<1x16x64xbf16>
    %119 = vector.shape_cast %118 : vector<1x16x64xbf16> to vector<16x64xbf16>
    %cst_106 = arith.constant dense<0.000000e+00> : vector<16x128xf32>
    %120 = tpu.matmul %119, %110, %cst_106 {dimension_numbers = #tpu.dot_dimension_numbers<[1], [0], [0], [1], [0, 0, 1, 1], [], []>} : vector<16x64xbf16>, vector<64x128xbf16>, vector<16x128xf32> -> vector<16x128xf32>
    %121 = arith.maximumf %117, %120 : vector<16x128xf32>
    %c3_107 = arith.constant 3 : index
    %c0_108 = arith.constant 0 : index
    %c0_109 = arith.constant 0 : index
    %122 = vector.load %arg10[%c3_107, %c0_108, %c0_109] : memref<4x16x64xbf16, #tpu.memory_space<vmem>>, vector<1x16x64xbf16>
    %123 = vector.shape_cast %122 : vector<1x16x64xbf16> to vector<16x64xbf16>
    %cst_110 = arith.constant dense<0.000000e+00> : vector<16x128xf32>
    %124 = tpu.matmul %123, %110, %cst_110 {dimension_numbers = #tpu.dot_dimension_numbers<[1], [0], [0], [1], [0, 0, 1, 1], [], []>} : vector<16x64xbf16>, vector<64x128xbf16>, vector<16x128xf32> -> vector<16x128xf32>
    %125 = arith.maximumf %121, %124 : vector<16x128xf32>
    %126 = arith.truncf %125 : vector<16x128xf32> to vector<16x128xbf16>
    %cst_111 = arith.constant 0.000000e+00 : f32
    %127 = vector.broadcast %cst_111 : f32 to vector<16x256xf32>
    %c0_112 = arith.constant 0 : index
    %c0_113 = arith.constant 0 : index
    %c0_114 = arith.constant 0 : index
    %128 = vector.load %arg11[%c0_112, %c0_113, %c0_114] : memref<9x16x16xbf16, #tpu.memory_space<vmem>>, vector<1x16x16xbf16>
    %129 = vector.shape_cast %128 : vector<1x16x16xbf16> to vector<16x16xbf16>
    %cst_115 = arith.constant dense<0.000000e+00> : vector<16x128xf32>
    %130 = tpu.matmul %129, %126, %cst_115 {dimension_numbers = #tpu.dot_dimension_numbers<[1], [0], [0], [1], [0, 0, 1, 1], [], []>} : vector<16x16xbf16>, vector<16x128xbf16>, vector<16x128xf32> -> vector<16x128xf32>
    %131 = arith.truncf %130 : vector<16x128xf32> to vector<16x128xbf16>
    %c0_116 = arith.constant 0 : index
    %c0_117 = arith.constant 0 : index
    %c0_118 = arith.constant 0 : index
    %132 = vector.load %arg12[%c0_116, %c0_117, %c0_118] : memref<9x128x256xbf16, #tpu.memory_space<vmem>>, vector<1x128x256xbf16>
    %133 = vector.shape_cast %132 : vector<1x128x256xbf16> to vector<128x256xbf16>
    %cst_119 = arith.constant dense<0.000000e+00> : vector<16x256xf32>
    %134 = tpu.matmul %131, %133, %cst_119 {dimension_numbers = #tpu.dot_dimension_numbers<[1], [0], [0], [1], [0, 0, 1, 1], [], []>} : vector<16x128xbf16>, vector<128x256xbf16>, vector<16x256xf32> -> vector<16x256xf32>
    %135 = arith.addf %127, %134 : vector<16x256xf32>
    %c1_120 = arith.constant 1 : index
    %c0_121 = arith.constant 0 : index
    %c0_122 = arith.constant 0 : index
    %136 = vector.load %arg11[%c1_120, %c0_121, %c0_122] : memref<9x16x16xbf16, #tpu.memory_space<vmem>>, vector<1x16x16xbf16>
    %137 = vector.shape_cast %136 : vector<1x16x16xbf16> to vector<16x16xbf16>
    %cst_123 = arith.constant dense<0.000000e+00> : vector<16x128xf32>
    %138 = tpu.matmul %137, %126, %cst_123 {dimension_numbers = #tpu.dot_dimension_numbers<[1], [0], [0], [1], [0, 0, 1, 1], [], []>} : vector<16x16xbf16>, vector<16x128xbf16>, vector<16x128xf32> -> vector<16x128xf32>
    %139 = arith.truncf %138 : vector<16x128xf32> to vector<16x128xbf16>
    %c1_124 = arith.constant 1 : index
    %c0_125 = arith.constant 0 : index
    %c0_126 = arith.constant 0 : index
    %140 = vector.load %arg12[%c1_124, %c0_125, %c0_126] : memref<9x128x256xbf16, #tpu.memory_space<vmem>>, vector<1x128x256xbf16>
    %141 = vector.shape_cast %140 : vector<1x128x256xbf16> to vector<128x256xbf16>
    %cst_127 = arith.constant dense<0.000000e+00> : vector<16x256xf32>
    %142 = tpu.matmul %139, %141, %cst_127 {dimension_numbers = #tpu.dot_dimension_numbers<[1], [0], [0], [1], [0, 0, 1, 1], [], []>} : vector<16x128xbf16>, vector<128x256xbf16>, vector<16x256xf32> -> vector<16x256xf32>
    %143 = arith.addf %135, %142 : vector<16x256xf32>
    %c2_128 = arith.constant 2 : index
    %c0_129 = arith.constant 0 : index
    %c0_130 = arith.constant 0 : index
    %144 = vector.load %arg11[%c2_128, %c0_129, %c0_130] : memref<9x16x16xbf16, #tpu.memory_space<vmem>>, vector<1x16x16xbf16>
    %145 = vector.shape_cast %144 : vector<1x16x16xbf16> to vector<16x16xbf16>
    %cst_131 = arith.constant dense<0.000000e+00> : vector<16x128xf32>
    %146 = tpu.matmul %145, %126, %cst_131 {dimension_numbers = #tpu.dot_dimension_numbers<[1], [0], [0], [1], [0, 0, 1, 1], [], []>} : vector<16x16xbf16>, vector<16x128xbf16>, vector<16x128xf32> -> vector<16x128xf32>
    %147 = arith.truncf %146 : vector<16x128xf32> to vector<16x128xbf16>
    %c2_132 = arith.constant 2 : index
    %c0_133 = arith.constant 0 : index
    %c0_134 = arith.constant 0 : index
    %148 = vector.load %arg12[%c2_132, %c0_133, %c0_134] : memref<9x128x256xbf16, #tpu.memory_space<vmem>>, vector<1x128x256xbf16>
    %149 = vector.shape_cast %148 : vector<1x128x256xbf16> to vector<128x256xbf16>
    %cst_135 = arith.constant dense<0.000000e+00> : vector<16x256xf32>
    %150 = tpu.matmul %147, %149, %cst_135 {dimension_numbers = #tpu.dot_dimension_numbers<[1], [0], [0], [1], [0, 0, 1, 1], [], []>} : vector<16x128xbf16>, vector<128x256xbf16>, vector<16x256xf32> -> vector<16x256xf32>
    %151 = arith.addf %143, %150 : vector<16x256xf32>
    %c3_136 = arith.constant 3 : index
    %c0_137 = arith.constant 0 : index
    %c0_138 = arith.constant 0 : index
    %152 = vector.load %arg11[%c3_136, %c0_137, %c0_138] : memref<9x16x16xbf16, #tpu.memory_space<vmem>>, vector<1x16x16xbf16>
    %153 = vector.shape_cast %152 : vector<1x16x16xbf16> to vector<16x16xbf16>
    %cst_139 = arith.constant dense<0.000000e+00> : vector<16x128xf32>
    %154 = tpu.matmul %153, %126, %cst_139 {dimension_numbers = #tpu.dot_dimension_numbers<[1], [0], [0], [1], [0, 0, 1, 1], [], []>} : vector<16x16xbf16>, vector<16x128xbf16>, vector<16x128xf32> -> vector<16x128xf32>
    %155 = arith.truncf %154 : vector<16x128xf32> to vector<16x128xbf16>
    %c3_140 = arith.constant 3 : index
    %c0_141 = arith.constant 0 : index
    %c0_142 = arith.constant 0 : index
    %156 = vector.load %arg12[%c3_140, %c0_141, %c0_142] : memref<9x128x256xbf16, #tpu.memory_space<vmem>>, vector<1x128x256xbf16>
    %157 = vector.shape_cast %156 : vector<1x128x256xbf16> to vector<128x256xbf16>
    %cst_143 = arith.constant dense<0.000000e+00> : vector<16x256xf32>
    %158 = tpu.matmul %155, %157, %cst_143 {dimension_numbers = #tpu.dot_dimension_numbers<[1], [0], [0], [1], [0, 0, 1, 1], [], []>} : vector<16x128xbf16>, vector<128x256xbf16>, vector<16x256xf32> -> vector<16x256xf32>
    %159 = arith.addf %151, %158 : vector<16x256xf32>
    %c4_144 = arith.constant 4 : index
    %c0_145 = arith.constant 0 : index
    %c0_146 = arith.constant 0 : index
    %160 = vector.load %arg11[%c4_144, %c0_145, %c0_146] : memref<9x16x16xbf16, #tpu.memory_space<vmem>>, vector<1x16x16xbf16>
    %161 = vector.shape_cast %160 : vector<1x16x16xbf16> to vector<16x16xbf16>
    %cst_147 = arith.constant dense<0.000000e+00> : vector<16x128xf32>
    %162 = tpu.matmul %161, %126, %cst_147 {dimension_numbers = #tpu.dot_dimension_numbers<[1], [0], [0], [1], [0, 0, 1, 1], [], []>} : vector<16x16xbf16>, vector<16x128xbf16>, vector<16x128xf32> -> vector<16x128xf32>
    %163 = arith.truncf %162 : vector<16x128xf32> to vector<16x128xbf16>
    %c4_148 = arith.constant 4 : index
    %c0_149 = arith.constant 0 : index
    %c0_150 = arith.constant 0 : index
    %164 = vector.load %arg12[%c4_148, %c0_149, %c0_150] : memref<9x128x256xbf16, #tpu.memory_space<vmem>>, vector<1x128x256xbf16>
    %165 = vector.shape_cast %164 : vector<1x128x256xbf16> to vector<128x256xbf16>
    %cst_151 = arith.constant dense<0.000000e+00> : vector<16x256xf32>
    %166 = tpu.matmul %163, %165, %cst_151 {dimension_numbers = #tpu.dot_dimension_numbers<[1], [0], [0], [1], [0, 0, 1, 1], [], []>} : vector<16x128xbf16>, vector<128x256xbf16>, vector<16x256xf32> -> vector<16x256xf32>
    %167 = arith.addf %159, %166 : vector<16x256xf32>
    %c5_152 = arith.constant 5 : index
    %c0_153 = arith.constant 0 : index
    %c0_154 = arith.constant 0 : index
    %168 = vector.load %arg11[%c5_152, %c0_153, %c0_154] : memref<9x16x16xbf16, #tpu.memory_space<vmem>>, vector<1x16x16xbf16>
    %169 = vector.shape_cast %168 : vector<1x16x16xbf16> to vector<16x16xbf16>
    %cst_155 = arith.constant dense<0.000000e+00> : vector<16x128xf32>
    %170 = tpu.matmul %169, %126, %cst_155 {dimension_numbers = #tpu.dot_dimension_numbers<[1], [0], [0], [1], [0, 0, 1, 1], [], []>} : vector<16x16xbf16>, vector<16x128xbf16>, vector<16x128xf32> -> vector<16x128xf32>
    %171 = arith.truncf %170 : vector<16x128xf32> to vector<16x128xbf16>
    %c5_156 = arith.constant 5 : index
    %c0_157 = arith.constant 0 : index
    %c0_158 = arith.constant 0 : index
    %172 = vector.load %arg12[%c5_156, %c0_157, %c0_158] : memref<9x128x256xbf16, #tpu.memory_space<vmem>>, vector<1x128x256xbf16>
    %173 = vector.shape_cast %172 : vector<1x128x256xbf16> to vector<128x256xbf16>
    %cst_159 = arith.constant dense<0.000000e+00> : vector<16x256xf32>
    %174 = tpu.matmul %171, %173, %cst_159 {dimension_numbers = #tpu.dot_dimension_numbers<[1], [0], [0], [1], [0, 0, 1, 1], [], []>} : vector<16x128xbf16>, vector<128x256xbf16>, vector<16x256xf32> -> vector<16x256xf32>
    %175 = arith.addf %167, %174 : vector<16x256xf32>
    %c6_160 = arith.constant 6 : index
    %c0_161 = arith.constant 0 : index
    %c0_162 = arith.constant 0 : index
    %176 = vector.load %arg11[%c6_160, %c0_161, %c0_162] : memref<9x16x16xbf16, #tpu.memory_space<vmem>>, vector<1x16x16xbf16>
    %177 = vector.shape_cast %176 : vector<1x16x16xbf16> to vector<16x16xbf16>
    %cst_163 = arith.constant dense<0.000000e+00> : vector<16x128xf32>
    %178 = tpu.matmul %177, %126, %cst_163 {dimension_numbers = #tpu.dot_dimension_numbers<[1], [0], [0], [1], [0, 0, 1, 1], [], []>} : vector<16x16xbf16>, vector<16x128xbf16>, vector<16x128xf32> -> vector<16x128xf32>
    %179 = arith.truncf %178 : vector<16x128xf32> to vector<16x128xbf16>
    %c6_164 = arith.constant 6 : index
    %c0_165 = arith.constant 0 : index
    %c0_166 = arith.constant 0 : index
    %180 = vector.load %arg12[%c6_164, %c0_165, %c0_166] : memref<9x128x256xbf16, #tpu.memory_space<vmem>>, vector<1x128x256xbf16>
    %181 = vector.shape_cast %180 : vector<1x128x256xbf16> to vector<128x256xbf16>
    %cst_167 = arith.constant dense<0.000000e+00> : vector<16x256xf32>
    %182 = tpu.matmul %179, %181, %cst_167 {dimension_numbers = #tpu.dot_dimension_numbers<[1], [0], [0], [1], [0, 0, 1, 1], [], []>} : vector<16x128xbf16>, vector<128x256xbf16>, vector<16x256xf32> -> vector<16x256xf32>
    %183 = arith.addf %175, %182 : vector<16x256xf32>
    %c7_168 = arith.constant 7 : index
    %c0_169 = arith.constant 0 : index
    %c0_170 = arith.constant 0 : index
    %184 = vector.load %arg11[%c7_168, %c0_169, %c0_170] : memref<9x16x16xbf16, #tpu.memory_space<vmem>>, vector<1x16x16xbf16>
    %185 = vector.shape_cast %184 : vector<1x16x16xbf16> to vector<16x16xbf16>
    %cst_171 = arith.constant dense<0.000000e+00> : vector<16x128xf32>
    %186 = tpu.matmul %185, %126, %cst_171 {dimension_numbers = #tpu.dot_dimension_numbers<[1], [0], [0], [1], [0, 0, 1, 1], [], []>} : vector<16x16xbf16>, vector<16x128xbf16>, vector<16x128xf32> -> vector<16x128xf32>
    %187 = arith.truncf %186 : vector<16x128xf32> to vector<16x128xbf16>
    %c7_172 = arith.constant 7 : index
    %c0_173 = arith.constant 0 : index
    %c0_174 = arith.constant 0 : index
    %188 = vector.load %arg12[%c7_172, %c0_173, %c0_174] : memref<9x128x256xbf16, #tpu.memory_space<vmem>>, vector<1x128x256xbf16>
    %189 = vector.shape_cast %188 : vector<1x128x256xbf16> to vector<128x256xbf16>
    %cst_175 = arith.constant dense<0.000000e+00> : vector<16x256xf32>
    %190 = tpu.matmul %187, %189, %cst_175 {dimension_numbers = #tpu.dot_dimension_numbers<[1], [0], [0], [1], [0, 0, 1, 1], [], []>} : vector<16x128xbf16>, vector<128x256xbf16>, vector<16x256xf32> -> vector<16x256xf32>
    %191 = arith.addf %183, %190 : vector<16x256xf32>
    %c8_176 = arith.constant 8 : index
    %c0_177 = arith.constant 0 : index
    %c0_178 = arith.constant 0 : index
    %192 = vector.load %arg11[%c8_176, %c0_177, %c0_178] : memref<9x16x16xbf16, #tpu.memory_space<vmem>>, vector<1x16x16xbf16>
    %193 = vector.shape_cast %192 : vector<1x16x16xbf16> to vector<16x16xbf16>
    %cst_179 = arith.constant dense<0.000000e+00> : vector<16x128xf32>
    %194 = tpu.matmul %193, %126, %cst_179 {dimension_numbers = #tpu.dot_dimension_numbers<[1], [0], [0], [1], [0, 0, 1, 1], [], []>} : vector<16x16xbf16>, vector<16x128xbf16>, vector<16x128xf32> -> vector<16x128xf32>
    %195 = arith.truncf %194 : vector<16x128xf32> to vector<16x128xbf16>
    %c8_180 = arith.constant 8 : index
    %c0_181 = arith.constant 0 : index
    %c0_182 = arith.constant 0 : index
    %196 = vector.load %arg12[%c8_180, %c0_181, %c0_182] : memref<9x128x256xbf16, #tpu.memory_space<vmem>>, vector<1x128x256xbf16>
    %197 = vector.shape_cast %196 : vector<1x128x256xbf16> to vector<128x256xbf16>
    %cst_183 = arith.constant dense<0.000000e+00> : vector<16x256xf32>
    %198 = tpu.matmul %195, %197, %cst_183 {dimension_numbers = #tpu.dot_dimension_numbers<[1], [0], [0], [1], [0, 0, 1, 1], [], []>} : vector<16x128xbf16>, vector<128x256xbf16>, vector<16x256xf32> -> vector<16x256xf32>
    %199 = arith.addf %191, %198 : vector<16x256xf32>
    %c0_184 = arith.constant 0 : index
    %c0_185 = arith.constant 0 : index
    %200 = vector.load %arg13[%c0_184, %c0_185] : memref<1x256xf32, #tpu.memory_space<vmem>>, vector<1x256xf32>
    %201 = vector.broadcast %200 : vector<1x256xf32> to vector<16x256xf32>
    %202 = arith.mulf %199, %201 : vector<16x256xf32>
    %c0_186 = arith.constant 0 : index
    %c0_187 = arith.constant 0 : index
    %203 = vector.load %arg14[%c0_186, %c0_187] : memref<1x256xf32, #tpu.memory_space<vmem>>, vector<1x256xf32>
    %204 = vector.broadcast %203 : vector<1x256xf32> to vector<16x256xf32>
    %205 = arith.addf %202, %204 : vector<16x256xf32>
    %cst_188 = arith.constant 0.000000e+00 : f32
    %206 = vector.broadcast %cst_188 : f32 to vector<16x256xf32>
    %207 = arith.maximumf %205, %206 : vector<16x256xf32>
    %cst_189 = arith.constant dense<0.000000e+00> : vector<256xf32>
    %208 = vector.multi_reduction <add>, %207, %cst_189 [0] : vector<16x256xf32> to vector<256xf32>
    %209 = vector.shape_cast %208 : vector<256xf32> to vector<1x256xf32>
    %cst_190 = arith.constant 1.600000e+01 : f32
    %210 = vector.broadcast %cst_190 : f32 to vector<1x256xf32>
    %211 = arith.divf %209, %210 : vector<1x256xf32>
    %212 = arith.truncf %211 : vector<1x256xf32> to vector<1x256xbf16>
    %c0_191 = arith.constant 0 : index
    %c0_192 = arith.constant 0 : index
    %213 = vector.load %arg15[%c0_191, %c0_192] : memref<256x128xbf16, #tpu.memory_space<vmem>>, vector<256x128xbf16>
    %cst_193 = arith.constant dense<0.000000e+00> : vector<1x128xf32>
    %214 = tpu.matmul %212, %213, %cst_193 {dimension_numbers = #tpu.dot_dimension_numbers<[1], [0], [0], [1], [0, 0, 1, 1], [], []>} : vector<1x256xbf16>, vector<256x128xbf16>, vector<1x128xf32> -> vector<1x128xf32>
    %c0_194 = arith.constant 0 : index
    %c0_195 = arith.constant 0 : index
    %215 = vector.load %arg16[%c0_194, %c0_195] : memref<1x128xf32, #tpu.memory_space<vmem>>, vector<1x128xf32>
    %216 = arith.addf %214, %215 : vector<1x128xf32>
    %cst_196 = arith.constant 0.000000e+00 : f32
    %217 = vector.broadcast %cst_196 : f32 to vector<1x128xf32>
    %218 = arith.maximumf %216, %217 : vector<1x128xf32>
    %219 = arith.truncf %218 : vector<1x128xf32> to vector<1x128xbf16>
    %c0_197 = arith.constant 0 : index
    %c0_198 = arith.constant 0 : index
    %220 = vector.load %arg17[%c0_197, %c0_198] : memref<128x128xbf16, #tpu.memory_space<vmem>>, vector<128x128xbf16>
    %cst_199 = arith.constant dense<0.000000e+00> : vector<1x128xf32>
    %221 = tpu.matmul %219, %220, %cst_199 {dimension_numbers = #tpu.dot_dimension_numbers<[1], [0], [0], [1], [0, 0, 1, 1], [], []>} : vector<1x128xbf16>, vector<128x128xbf16>, vector<1x128xf32> -> vector<1x128xf32>
    %c0_200 = arith.constant 0 : index
    %c0_201 = arith.constant 0 : index
    %222 = vector.load %arg18[%c0_200, %c0_201] : memref<1x128xf32, #tpu.memory_space<vmem>>, vector<1x128xf32>
    %223 = arith.addf %221, %222 : vector<1x128xf32>
    %c0_202 = arith.constant 0 : index
    %c0_203 = arith.constant 0 : index
    %c0_204 = arith.constant 0 : index
    %224 = vector.load %arg19[%c0_202, %c0_203, %c0_204] : memref<1x1x128xf32, #tpu.memory_space<vmem>>, vector<1x1x128xf32>
    %225 = vector.shape_cast %224 : vector<1x1x128xf32> to vector<1x128xf32>
    %226 = vector.shape_cast %223 : vector<1x128xf32> to vector<1x1x128xf32>
    tpu.vector_store %arg19[%c0_202, %c0_203, %c0_204], %226 {strides = array<i32>} : memref<1x1x128xf32, #tpu.memory_space<vmem>>, vector<1x1x128xf32>,
    return
  }
  func.func @transform_0(%arg0: i32) -> (i32, i32, i32) {
    %c0_i32 = arith.constant 0 : i32
    %c0_i32_0 = arith.constant 0 : i32
    %c0_i32_1 = arith.constant 0 : i32
    return %arg0, %c0_i32, %c0_i32_0 : i32, i32, i32
  }
  func.func @transform_1(%arg0: i32) -> (i32, i32) {
    %c0_i32 = arith.constant 0 : i32
    %c0_i32_0 = arith.constant 0 : i32
    %c0_i32_1 = arith.constant 0 : i32
    return %c0_i32, %c0_i32_0 : i32, i32
  }
  func.func @transform_2(%arg0: i32) -> (i32, i32) {
    %c0_i32 = arith.constant 0 : i32
    %c0_i32_0 = arith.constant 0 : i32
    %c0_i32_1 = arith.constant 0 : i32
    return %c0_i32, %c0_i32_0 : i32, i32
  }
  func.func @transform_3(%arg0: i32) -> (i32, i32) {
    %c0_i32 = arith.constant 0 : i32
    %c0_i32_0 = arith.constant 0 : i32
    %c0_i32_1 = arith.constant 0 : i32
    return %c0_i32, %c0_i32_0 : i32, i32
  }
  func.func @transform_4(%arg0: i32) -> (i32, i32, i32) {
    %c0_i32 = arith.constant 0 : i32
    %c0_i32_0 = arith.constant 0 : i32
    %c0_i32_1 = arith.constant 0 : i32
    %c0_i32_2 = arith.constant 0 : i32
    return %c0_i32, %c0_i32_0, %c0_i32_1 : i32, i32, i32
  }
  func.func @transform_5(%arg0: i32) -> (i32, i32, i32) {
    %c0_i32 = arith.constant 0 : i32
    %c0_i32_0 = arith.constant 0 : i32
    %c0_i32_1 = arith.constant 0 : i32
    %c0_i32_2 = arith.constant 0 : i32
    return %c0_i32, %c0_i32_0, %c0_i32_1 : i32, i32, i32
  }
  func.func @transform_6(%arg0: i32) -> (i32, i32, i32) {
    %c0_i32 = arith.constant 0 : i32
    %c0_i32_0 = arith.constant 0 : i32
    %c0_i32_1 = arith.constant 0 : i32
    %c0_i32_2 = arith.constant 0 : i32
    return %c0_i32, %c0_i32_0, %c0_i32_1 : i32, i32, i32
  }
  func.func @transform_7(%arg0: i32) -> (i32, i32) {
    %c0_i32 = arith.constant 0 : i32
    %c0_i32_0 = arith.constant 0 : i32
    %c0_i32_1 = arith.constant 0 : i32
    return %c0_i32, %c0_i32_0 : i32, i32
  }
  func.func @transform_8(%arg0: i32) -> (i32, i32) {
    %c0_i32 = arith.constant 0 : i32
    %c0_i32_0 = arith.constant 0 : i32
    %c0_i32_1 = arith.constant 0 : i32
    return %c0_i32, %c0_i32_0 : i32, i32
  }
  func.func @transform_9(%arg0: i32) -> (i32, i32, i32) {
    %c0_i32 = arith.constant 0 : i32
    %c0_i32_0 = arith.constant 0 : i32
    %c0_i32_1 = arith.constant 0 : i32
    %c0_i32_2 = arith.constant 0 : i32
    return %c0_i32, %c0_i32_0, %c0_i32_1 : i32, i32, i32
  }
  func.func @transform_10(%arg0: i32) -> (i32, i32, i32) {
    %c0_i32 = arith.constant 0 : i32
    %c0_i32_0 = arith.constant 0 : i32
    %c0_i32_1 = arith.constant 0 : i32
    %c0_i32_2 = arith.constant 0 : i32
    return %c0_i32, %c0_i32_0, %c0_i32_1 : i32, i32, i32
  }
  func.func @transform_11(%arg0: i32) -> (i32, i32, i32) {
    %c0_i32 = arith.constant 0 : i32
    %c0_i32_0 = arith.constant 0 : i32
    %c0_i32_1 = arith.constant 0 : i32
    %c0_i32_2 = arith.constant 0 : i32
    return %c0_i32, %c0_i32_0, %c0_i32_1 : i32, i32, i32
  }
  func.func @transform_12(%arg0: i32) -> (i32, i32) {
    %c0_i32 = arith.constant 0 : i32
    %c0_i32_0 = arith.constant 0 : i32
    %c0_i32_1 = arith.constant 0 : i32
    return %c0_i32, %c0_i32_0 : i32, i32
  }
  func.func @transform_13(%arg0: i32) -> (i32, i32) {
    %c0_i32 = arith.constant 0 : i32
    %c0_i32_0 = arith.constant 0 : i32
    %c0_i32_1 = arith.constant 0 : i32
    return %c0_i32, %c0_i32_0 : i32, i32
  }
  func.func @transform_14(%arg0: i32) -> (i32, i32) {
    %c0_i32 = arith.constant 0 : i32
    %c0_i32_0 = arith.constant 0 : i32
    %c0_i32_1 = arith.constant 0 : i32
    return %c0_i32, %c0_i32_0 : i32, i32
  }
  func.func @transform_15(%arg0: i32) -> (i32, i32) {
    %c0_i32 = arith.constant 0 : i32
    %c0_i32_0 = arith.constant 0 : i32
    %c0_i32_1 = arith.constant 0 : i32
    return %c0_i32, %c0_i32_0 : i32, i32
  }
  func.func @transform_16(%arg0: i32) -> (i32, i32) {
    %c0_i32 = arith.constant 0 : i32
    %c0_i32_0 = arith.constant 0 : i32
    %c0_i32_1 = arith.constant 0 : i32
    return %c0_i32, %c0_i32_0 : i32, i32
  }
  func.func @transform_17(%arg0: i32) -> (i32, i32) {
    %c0_i32 = arith.constant 0 : i32
    %c0_i32_0 = arith.constant 0 : i32
    %c0_i32_1 = arith.constant 0 : i32
    return %c0_i32, %c0_i32_0 : i32, i32
  }
  func.func @transform_18(%arg0: i32) -> (i32, i32, i32) {
    %c0_i32 = arith.constant 0 : i32
    %c0_i32_0 = arith.constant 0 : i32
    %c0_i32_1 = arith.constant 0 : i32
    return %arg0, %c0_i32, %c0_i32_0 : i32, i32, i32
  }
}

</mosaic_0001>

<bundles_post_ra>
// kernel: cifarnet_forward.1
= control target key start
LH: loop header
LB: loop body
LE: loop exit
PB: predicated region body
PF: predicated region fallthrough
CT: control target
= control target key end

     0   :  { %s9962_s0 = inlined_call_operand.vmem [shape: bf16[2,256,32], index: 0, kind: input, shape index: {}]   ;;  %s9963_s1 = inlined_call_operand.vmem [shape: bf16[32,64], index: 1, kind: input, shape index: {}]   ;;  %s9964_s2 = inlined_call_operand.vmem [shape: f32[1,64], index: 2, kind: input, shape index: {}]   ;;  %s9965_s3 = inlined_call_operand.vmem [shape: f32[1,64], index: 3, kind: input, shape index: {}]   ;;  %s9966_s4 = inlined_call_operand.vmem [shape: bf16[4,64,256], index: 4, kind: input, shape index: {}]   ;;  %s9967_s5 = inlined_call_operand.vmem [shape: bf16[9,64,64], index: 5, kind: input, shape index: {}]   ;;  %s9968_s6 = inlined_call_operand.vmem [shape: bf16[9,64,128], index: 6, kind: input, shape index: {}]   ;;  %s9969_s7 = inlined_call_operand.vmem [shape: f32[1,128], index: 7, kind: input, shape index: {}]   ;;  %s9970_s8 = inlined_call_operand.vmem [shape: f32[1,128], index: 8, kind: input, shape index: {}]   ;;  %s9971_s9 = inlined_call_operand.hbm [shape: bf16[4,16,64], index: 9, kind: input, shape index: {}]   ;;  %s9972_s10 = inlined_call_operand.vmem [shape: bf16[9,16,16], index: 10, kind: input, shape index: {}]   ;;  %s9973_s11 = inlined_call_operand.vmem [shape: bf16[9,128,256], index: 11, kind: input, shape index: {}]   ;;  %s9974_s12 = inlined_call_operand.vmem [shape: f32[1,256], index: 12, kind: input, shape index: {}]   ;;  %s9975_s13 = inlined_call_operand.vmem [shape: f32[1,256], index: 13, kind: input, shape index: {}]   ;;  %s9976_s14 = inlined_call_operand.vmem [shape: bf16[256,128], index: 14, kind: input, shape index: {}]   ;;  %s9977_s15 = inlined_call_operand.vmem [shape: f32[1,128], index: 15, kind: input, shape index: {}]   ;;  %s9978_s16 = inlined_call_operand.hbm [shape: bf16[128,128], index: 16, kind: input, shape index: {}]   ;;  %s9979_s17 = inlined_call_operand.vmem [shape: f32[1,128], index: 17, kind: input, shape index: {}]   ;;  %s9980_s18 = inlined_call_operand.hbm [shape: f32[2,1,128], index: 18, kind: output, shape index: {}]  }
   0x1   :  { %9994 = sst [smem:[#allocation18_spill]] %s9962_s0 }
   0x2   :  { %9995 = sst [smem:[#allocation19_spill]] %s9963_s1 }
   0x3   :  { %9996 = sst [smem:[#allocation20_spill]] %s9964_s2 }
   0x4   :  { %9997 = sst [smem:[#allocation21_spill]] %s9979_s17 }
   0x5   :  { %9998 = sst [smem:[#allocation22_spill]] %s9980_s18 }
   0x6   :  { %23 = vsyncpa [#allocation3], 0 }
   0x7   :  { %24 = vsyncpa [#allocation6], 0 }
   0x8   :  { %25 = vsyncpa [#allocation4], 0 }
   0x9   :  { %27 = vsyncpa [#allocation4 + $0x1], 0  ;;  %s8382_s27 = smov 0   ;;  %s8384_s28 = smov 0  }
   0xa   :  { %s8386_s29 = smov 0   ;;  %s8388_s30 = smov 0  }
   0xb LB: > { %9999 = sst [smem:[#allocation11_spill]] %s8265_s27  ;;  %s8403_s0 = sadd.s32 4294967295, %s8277_s30   ;;  %s8277_s30 = sphi %s8388_s30, %s10027_s30   ;;  %s8273_s29 = sphi %s8386_s29, %s10029_s29   ;;  %s8269_s28 = sphi %s8384_s28, %s10031_s28   ;;  %s8265_s27 = sphi %s8382_s27, %s10030_s27  }
   0xc   : > { %10000 = sst [smem:[#allocation12_spill]] %s8273_s29  ;;  %s6028_s19 = sadd.s32 4294967294, %s8277_s30  }
   0xd   : > { %10001 = sst [smem:[#allocation13_spill]] %s8277_s30  ;;  %s8407_s1 = sadd.s32 1, %s8277_s30  }
   0xe   : > { %10002 = sst [smem:[#allocation14_spill]] %s8407_s1  ;;  %s423_s20 = sadd.s32 1, %s8273_s29 }
   0xf   : > { %s420_s21 = ssub.s32 %s8277_s30, %s8407_s1  ;;  %p433_p0 = scmp.ne.s32.totalorder %s8273_s29, %s8269_s28 }
  0x10   : > { %p421_p1 = scmp.eq.s32.totalorder %s420_s21, 0  ;;  %p434_p2 = scmp.eq.s32.totalorder %s8403_s0, 1 }
  0x11   : > { %p439_p3 = scmp.ne.s32.totalorder %s8269_s28, %s8265_s27  ;;  %p440_p4 = scmp.eq.s32.totalorder %s6028_s19, 1 }
  0x12   : > { %s8418_s22 = scalar_select %p421_p1, %s8273_s29, %s423_s20  }
  0x13   : > { %p8420_p5 = por %p434_p2, %p433_p0  ;;  %p8424_p6 = por %p440_p4, %p439_p3 }
  0x14   : > { %10003 = sst [smem:[#allocation15_spill]] %s8418_s22  ;;  %p6029_p7 = scmp.ge.s32.totalorder %s8277_s30, 1 }
  0x15   : > { %s10004_s2 = scalar_select %p8420_p5, 1, 0 }
  0x16   : > { %s10006_s23 = scalar_select %p8424_p6, 1, 0 }
  0x17   : > { %10005 = sst [smem:[#allocation16_spill]] %s10004_s2  ;;  %p447_p8 = scmp.lt.s32.totalorder %s8277_s30, 3 }
  0x18   : > { %10007 = sst [smem:[#allocation17_spill]] %s10006_s23  ;;  %p9988_p9 = scmp.eq.s32.totalorder %s8403_s0, 0 }
  0x19   : > { %p8431_p10 = pnand %p6029_p7, %p447_p8  ;;  %s8279_s25 = smov [#allocation2]  }
  0x1a   : > { %s483_s26 = sshll.u32 %s8279_s25, 4  ;;  %s8280_s20 = smov [#allocation5]   ;;  %s484_s26 = int_to_ptr.vmem [resolvable:$true] %s483_s26 }
  0x1b   : > { %s10008_s24 = scalar_select %p8431_p10, 1, 0 }
  0x1c   : > { %p7705_p11 = pneg %p8431_p10  ;;  %s514_s21 = sshll.u32 %s8280_s20, 4  ;;  %s8443_s21 = int_to_ptr.vmem [resolvable:$true] %s514_s21 }
  0x1d   : > { %s8151_s1 = scalar_lea.hbm %s9971_s9, 512 }
  0x1e   : > { %p8439_p12 = pnand %p9988_p9, %p7705_p11  ;;  %p8152_p13 = scmp.ne.s32.totalorder %s9971_s9, %s8151_s1 }
  0x1f   : > { %p8158_p3 = scmp.lt.u32.totalorder %s8151_s1, %s9971_s9 }
  0x20   : > { %p8153_p0 = pneg %p8439_p12 }
  0x22   : > { %p8154_p1 = pnand %p8153_p0, %p8152_p13 }
  0x24   : > { %p8155_p2 = pneg %p8154_p1 }
  0x26   : > { %p8160_p4 = pnand %p8158_p3, %p8155_p2 }
  0x28   : > { %8163 = shalt.err (!%p8160_p4)
}
  0x29   : > { %s8164_s20 = scalar_lea.vmem %s484_s26, 512  ;;  %p8172_p9 = scmp.lt.s32.totalorder %s484_s26, %s484_s26 }
  0x2a   : > { %p8165_p7 = scmp.ne.s32.totalorder %s484_s26, %s8164_s20  ;;  %p8173_p6 = scmp.lt.s32.totalorder %s8164_s20, %s8164_s20 }
  0x2c   : > { %p8167_p8 = pnand %p8165_p7, %p8153_p0  ;;  %p8174_p5 = por %p8173_p6, %p8172_p9 }
  0x2e   : > { %p8168_p11 = pneg %p8167_p8 }
  0x30   : > { %p8175_p10 = pnand %p8174_p5, %p8168_p11 }
  0x32   : > { %8178 = shalt.err (!%p8175_p10)
}
  0x33   : > { %s8281_s29 = smov 64   ;;  %s8282_s22 = smov 4  }
  0x34   : > { %7708 = dma.hbm_to_vmem [thread:$0]  (!%p8439_p12), %s9971_s9, 512, %s484_s26, [#allocation3], %s8281_s29, %s8281_s29, %s8282_s22  }
  0x35   : > { %s8179_s25 = scalar_lea.hbm %s9978_s16, 1024 }
  0x36   : > { %p8180_p13 = scmp.ne.s32.totalorder %s9978_s16, %s8179_s25  ;;  %p8186_p9 = scmp.lt.u32.totalorder %s8179_s25, %s9978_s16 }
  0x38   : > { %p8182_p5 = pnand %p8180_p13, %p8153_p0 }
  0x3a   : > { %p8183_p6 = pneg %p8182_p5 }
  0x3c   : > { %p8188_p10 = pnand %p8186_p9, %p8183_p6 }
  0x3e   : > { %8191 = shalt.err (!%p8188_p10)
}
  0x3f   : > { %s8192_s26 = scalar_lea.vmem %s8443_s21, 1024  ;;  %p8200_p4 = scmp.lt.s32.totalorder %s8443_s21, %s8443_s21 }
  0x40   : > { %p8193_p1 = scmp.ne.s32.totalorder %s8443_s21, %s8192_s26  ;;  %p8201_p7 = scmp.lt.s32.totalorder %s8192_s26, %s8192_s26 }
  0x42   : > { %p8195_p2 = pnand %p8193_p1, %p8153_p0  ;;  %p8202_p8 = por %p8201_p7, %p8200_p4 }
  0x44   : > { %p8196_p3 = pneg %p8195_p2 }
  0x46   : > { %p8203_p11 = pnand %p8202_p8, %p8196_p3 }
  0x48   : > { %8206 = shalt.err (!%p8203_p11)
}
  0x49   : > { %7711 = dma.hbm_to_vmem [thread:$0]  (!%p8439_p12), %s9978_s16, 1024, %s8443_s21, [#allocation6], %s8281_s29, %s8281_s29, %s8282_s22  }
  0x4a   : > { %p10010_p13 = scmp.ne.s32.totalorder %s10008_s24, 0 }
  0x4b   : > { %p10011_p5 = scmp.eq.s32.totalorder (!%p10010_p13), %s8403_s0, 0 }
  0x4c   : > { %541 = sbr.rel (%p10010_p13) target bundleno = 2742 (0xab6), region = 92 }
  0x53   : > { %8252 = dma.done.wait (%p10011_p5), [#allocation3], 512   ;;  %p10012_p0 = pmov %p10011_p5 }
  0x55   : > { %8254 = vsyncadd (%p10012_p0), [#allocation3], 4294966784  ;;  %p10013_p6 = pmov %p10012_p0 }
  0x56   : > { %p10014_p9 = pmov %p10012_p0 }
  0x57   : > { %8256 = dma.done.wait (%p10013_p6), [#allocation6], 1024  }
  0x58   : > { %8258 = vsyncadd (%p10014_p9), [#allocation6], 4294966272  ;;  %p598_p10 = scmp.lt.s32.totalorder %s8403_s0, 1  ;;  %s10015_s29 = sld [smem:[#allocation18_spill]]  ;;  %vm732_vm0 = vcmask 261120   ;;  %vm1579_vm1 = vcmask 523264  }
  0x59   : > { %s10016_s1 = sld [smem:[#allocation19_spill]]  ;;  %v7780_v18 = vld [vmem:[%s9966_s4 + $0x4] ss:$8 sps:$4 sm:$0xff]   ;;  %v8558_v21 = vld [vmem:[%s9965_s3] ss:$0 sm:$0xff]  ;;  %vm8284_vm2 = vmmov 0  }
  0x5a   : > { %s599_s2 = scalar_select %p598_p10, %s8403_s0, 1  ;;  %vm3849_vm3 = vcmask 130048  }
  0x5b   : > { %s596_s26 = sand.u32 1, %s8269_s28   ;;  %s6742_s21 = sshll.u32 %s8403_s0, 4 }
  0x5c   : > { %s6745_s19 = sshll.u32 %s599_s2, 7  ;;  %s10017_s2 = sld [smem:[#allocation20_spill]] }
  0x5d   : > { %s597_s24 = scalar_lea.vmem [#allocation7], %s596_s26  ;;  %s10020_s30 = sld [smem:[#allocation22_spill]] }
  0x5e   : > { %s8507_s22 = scalar_lea.vmem %s10015_s29, %s6745_s19  ;;  %s10019_s19 = sld [smem:[#allocation16_spill]] }
  0x5f   : > { %v7760_v0 = vld [vmem:[%s10016_s1] sm:$0xff]   ;;  %v7761_v1 = vld [vmem:[%s10016_s1 + $0x8] sm:$0xff]   ;;  %v7764_v4 = vld [vmem:[%s8507_s22 + $0x10] sm:$0xff]   ;;  %s5951_s29 = sshll.u32 %s597_s24, 4  ;;  %s5939_s20 = scalar_lea.sflag [#allocation4], %s596_s26  ;;  %s9922_s29 = int_to_ptr.vmem [resolvable:$true] %s5951_s29 }
  0x60   : > { %7137 = vmatprep.subr.bf16.mxu0 %v7760_v0  ;;  %v7762_v2 = vld [vmem:[%s8507_s22] sm:$0xff]   ;;  %v7763_v3 = vld [vmem:[%s8507_s22 + $0x8] sm:$0xff]   ;;  %v7765_v5 = vld [vmem:[%s8507_s22 + $0x18] sm:$0xff]   ;;  %s8207_s0 = scalar_lea.vmem %s9922_s29, 16  ;;  %s8286_s17 = smov [#allocation7]  }
  0x61   : > { %7138 = vmatpush3.bf16.msra.mxu0 %v7760_v0  ;;  %7141 = vmatprep.mubr.msk.bf16.mxu0 %vm732_vm0, %v7762_v2  ;;  %v7766_v6 = vld [vmem:[%s8507_s22 + $0x20] sm:$0xff]   ;;  %v7767_v7 = vld [vmem:[%s8507_s22 + $0x28] sm:$0xff]   ;;  %v7768_v8 = vld [vmem:[%s8507_s22 + $0x30] sm:$0xff]   ;;  %p8208_p12 = scmp.ne.s32.totalorder %s9922_s29, %s8207_s0  ;;  %s8211_s18 = sshll.u32 %s8286_s17, 4  ;;  %s8212_s18 = int_to_ptr.vmem [resolvable:$false] %s8211_s18 }
  0x62   : > { %7139 = vmatprep.subr.bf16.mxu0 %v7761_v1  ;;  %v7769_v9 = vld [vmem:[%s8507_s22 + $0x38] sm:$0xff]   ;;  %v7770_v10 = vld [vmem:[%s8507_s22 + $0x40] sm:$0xff]   ;;  %v7771_v11 = vld [vmem:[%s8507_s22 + $0x48] sm:$0xff]   ;;  %p8214_p4 = scmp.lt.s32.totalorder %s9922_s29, %s8212_s18 }
  0x63   : > { %v7772_v12 = vld [vmem:[%s8507_s22 + $0x50] sm:$0xff]   ;;  %v7773_v13 = vld [vmem:[%s8507_s22 + $0x58] sm:$0xff]   ;;  %v7774_v14 = vld [vmem:[%s8507_s22 + $0x60] sm:$0xff]   ;;  %s10021_s23 = smov %s10020_s30  ;;  %s9920_s25 = scalar_lea.hbm %s10020_s30, %s6742_s21 }
  0x64   : > { %v7775_v15 = vld [vmem:[%s8507_s22 + $0x68] sm:$0xff]   ;;  %v7776_v16 = vld [vmem:[%s8507_s22 + $0x70] sm:$0xff]   ;;  %v7777_v17 = vld [vmem:[%s8507_s22 + $0x78] sm:$0xff]   ;;  %p10022_p1 = scmp.ne.s32.totalorder %s10019_s19, 0 }
  0x65   : > { %7140 = vmatpush3.bf16.msra.mxu0 %v7761_v1  ;;  %v8553_v19 = vld [vmem:[%s10017_s2] ss:$0 sm:$0xff]  ;;  %s10018_s2 = sld [smem:[#allocation21_spill]] }
  0x66   : > { %p8209_p2 = pnand %p8208_p12, %p10022_p1 }
  0x68   : > { %7142 = vmatmul.mubr.msk.bf16.vlgmr.msra.gmra.mrb[0].mxu0 %vm732_vm0, %v7763_v3  ;;  %p8210_p3 = pneg %p8209_p2 }
  0x69   : > { %7145 = vmatprep.mubr.msk.bf16.mxu0 %vm732_vm0, %v7764_v4 }
  0x70   : > { %7146 = vmatmul.mubr.msk.bf16.gmra.mrb[4].mxu0 %vm732_vm0, %v7765_v5 }
  0x71   : > { %7149 = vmatprep.mubr.msk.bf16.mxu0 %vm732_vm0, %v7766_v6 }
  0x78   : > { %7150 = vmatmul.mubr.msk.bf16.gmra.mrb[8].mxu0 %vm732_vm0, %v7767_v7 }
  0x79   : > { %7153 = vmatprep.mubr.msk.bf16.mxu0 %vm732_vm0, %v7768_v8 }
  0x80   : > { %7154 = vmatmul.mubr.msk.bf16.gmra.mrb[12].mxu0 %vm732_vm0, %v7769_v9 }
  0x81   : > { %7157 = vmatprep.mubr.msk.bf16.mxu0 %vm732_vm0, %v7770_v10 }
  0x88   : > { %7158 = vmatmul.mubr.msk.bf16.gmra.mrb[16].mxu0 %vm732_vm0, %v7771_v11 }
  0x89   : > { %7161 = vmatprep.mubr.msk.bf16.mxu0 %vm732_vm0, %v7772_v12 }
  0x90   : > { %7162 = vmatmul.mubr.msk.bf16.gmra.mrb[20].mxu0 %vm732_vm0, %v7773_v13 }
  0x91   : > { %7165 = vmatprep.mubr.msk.bf16.mxu0 %vm732_vm0, %v7774_v14 }
  0x98   : > { %7166 = vmatmul.mubr.msk.bf16.gmra.mrb[24].mxu0 %vm732_vm0, %v7775_v15 }
  0x99   : > { %7169 = vmatprep.mubr.msk.bf16.mxu0 %vm732_vm0, %v7776_v16 }
  0xa0   : > { %7170 = vmatmul.mubr.msk.bf16.gmra.mrb[28].mxu0 %vm732_vm0, %v7777_v17 }
  0xa1   : > { %1148 = vmatprep.mubr.bf16.mxu0 %v7780_v18 }
 0x13b   : > { %v7143_v20 = vpop.f32.mrb[0].mxu0 }
 0x13c   : > { %v951_v22 = vmul.f32 %v7143_v20, %v8553_v19  ;;  %v815_v23 = vpop.f32.mrb[1].mxu0  ;;  %v7813_v20 = vld [vmem:[%s9966_s4 + $0xe4] ss:$8 sps:$4 sm:$0xff]  }
 0x13d   : > { %v949_v24 = vmul.f32 %v8553_v19, %v815_v23  ;;  %v7144_v25 = vpop.f32.mrb[2].mxu0  ;;  %1522 = vmatprep.mubr.bf16.mxu1 %v7813_v20 }
 0x13e   : > { %v990_v26 = vadd.f32 %v8558_v21, %v951_v22  ;;  %v952_v27 = vmul.f32 %v7144_v25, %v8553_v19  ;;  %v818_v28 = vpop.f32.mrb[3].mxu0 }
 0x13f   : > { %v988_v29 = vadd.f32 %v8558_v21, %v949_v24  ;;  %v950_v30 = vmul.f32 %v8553_v19, %v818_v28 }
 0x140   : > { %v991_v31 = vadd.f32 %v8558_v21, %v952_v27  ;;  %v1022_v33 = vmax.f32 %v990_v26, 0.0 }
 0x141   : > { %v989_v32 = vadd.f32 %v8558_v21, %v950_v30  ;;  %v1020_v35 = vmax.f32 %v988_v29, 0.0 }
 0x142   : > { %v1023_v34 = vmax.f32 %v991_v31, 0.0 }
 0x143   : > { %v1021_v36 = vmax.f32 %v989_v32, 0.0  ;;  %v7147_v37 = vpop.f32.mrb[4].mxu0 }
 0x144   : > { %v8568_v38 = vpack.c.bf16 %v1023_v34, %v1022_v33  ;;  %v955_v39 = vmul.f32 %v7147_v37, %v8553_v19  ;;  %v831_v40 = vpop.f32.mrb[5].mxu0 }
 0x145   : > { %v8571_v41 = vpack.c.bf16 %v1021_v36, %v1020_v35  ;;  %v953_v42 = vmul.f32 %v8553_v19, %v831_v40  ;;  %v7148_v43 = vpop.f32.mrb[6].mxu0 }
 0x146   : > { %v994_v44 = vadd.f32 %v8558_v21, %v955_v39  ;;  %v956_v45 = vmul.f32 %v7148_v43, %v8553_v19  ;;  %v834_v46 = vpop.f32.mrb[7].mxu0 }
 0x147   : > { %v992_v47 = vadd.f32 %v8558_v21, %v953_v42  ;;  %v954_v48 = vmul.f32 %v8553_v19, %v834_v46 }
 0x148   : > { %v995_v49 = vadd.f32 %v8558_v21, %v956_v45  ;;  %v1026_v51 = vmax.f32 %v994_v44, 0.0 }
 0x149   : > { %v993_v50 = vadd.f32 %v8558_v21, %v954_v48  ;;  %v1024_v53 = vmax.f32 %v992_v47, 0.0 }
 0x14a   : > { %v1027_v52 = vmax.f32 %v995_v49, 0.0 }
 0x14b   : > { %v1025_v54 = vmax.f32 %v993_v50, 0.0  ;;  %v7151_v55 = vpop.f32.mrb[8].mxu0 }
 0x14c   : > { %v8580_v56 = vpack.c.bf16 %v1027_v52, %v1026_v51  ;;  %v959_v57 = vmul.f32 %v7151_v55, %v8553_v19  ;;  %v847_v58 = vpop.f32.mrb[9].mxu0 }
 0x14d   : > { %v8583_v59 = vpack.c.bf16 %v1025_v54, %v1024_v53  ;;  %v957_v60 = vmul.f32 %v8553_v19, %v847_v58  ;;  %v7152_v61 = vpop.f32.mrb[10].mxu0 }
 0x14e   : > { %v998_v62 = vadd.f32 %v8558_v21, %v959_v57  ;;  %v960_v63 = vmul.f32 %v7152_v61, %v8553_v19  ;;  %v850_v0 = vpop.f32.mrb[11].mxu0 }
 0x14f   : > { %v996_v1 = vadd.f32 %v8558_v21, %v957_v60  ;;  %v958_v2 = vmul.f32 %v8553_v19, %v850_v0 }
 0x150   : > { %v999_v3 = vadd.f32 %v8558_v21, %v960_v63  ;;  %v1030_v5 = vmax.f32 %v998_v62, 0.0 }
 0x151   : > { %v997_v4 = vadd.f32 %v8558_v21, %v958_v2  ;;  %v1028_v7 = vmax.f32 %v996_v1, 0.0 }
 0x152   : > { %v1031_v6 = vmax.f32 %v999_v3, 0.0 }
 0x153   : > { %v1029_v8 = vmax.f32 %v997_v4, 0.0  ;;  %v7155_v9 = vpop.f32.mrb[12].mxu0 }
 0x154   : > { %v8592_v10 = vpack.c.bf16 %v1031_v6, %v1030_v5  ;;  %v963_v11 = vmul.f32 %v7155_v9, %v8553_v19  ;;  %v863_v12 = vpop.f32.mrb[13].mxu0 }
 0x155   : > { %v8595_v13 = vpack.c.bf16 %v1029_v8, %v1028_v7  ;;  %v961_v14 = vmul.f32 %v8553_v19, %v863_v12  ;;  %v7156_v15 = vpop.f32.mrb[14].mxu0 }
 0x156   : > { %v1002_v16 = vadd.f32 %v8558_v21, %v963_v11  ;;  %v964_v17 = vmul.f32 %v7156_v15, %v8553_v19  ;;  %v866_v18 = vpop.f32.mrb[15].mxu0 }
 0x157   : > { %v1000_v22 = vadd.f32 %v8558_v21, %v961_v14  ;;  %v962_v23 = vmul.f32 %v8553_v19, %v866_v18 }
 0x158   : > { %v1003_v24 = vadd.f32 %v8558_v21, %v964_v17  ;;  %v1034_v26 = vmax.f32 %v1002_v16, 0.0 }
 0x159   : > { %v1001_v25 = vadd.f32 %v8558_v21, %v962_v23  ;;  %v1032_v28 = vmax.f32 %v1000_v22, 0.0 }
 0x15a   : > { %v1035_v27 = vmax.f32 %v1003_v24, 0.0 }
 0x15b   : > { %v1033_v29 = vmax.f32 %v1001_v25, 0.0  ;;  %v7159_v30 = vpop.f32.mrb[16].mxu0 }
 0x15c   : > { %v8607_v31 = vpack.c.bf16 %v1035_v27, %v1034_v26  ;;  %v967_v32 = vmul.f32 %v7159_v30, %v8553_v19  ;;  %v879_v33 = vpop.f32.mrb[17].mxu0 }
 0x15d   : > { %v8610_v34 = vpack.c.bf16 %v1033_v29, %v1032_v28  ;;  %v965_v35 = vmul.f32 %v8553_v19, %v879_v33  ;;  %v7160_v36 = vpop.f32.mrb[18].mxu0 }
 0x15e   : > { %v1006_v37 = vadd.f32 %v8558_v21, %v967_v32  ;;  %v968_v39 = vmul.f32 %v7160_v36, %v8553_v19  ;;  %v882_v40 = vpop.f32.mrb[19].mxu0 }
 0x15f   : > { %v1004_v42 = vadd.f32 %v8558_v21, %v965_v35  ;;  %v966_v43 = vmul.f32 %v8553_v19, %v882_v40 }
 0x160   : > { %v1007_v44 = vadd.f32 %v8558_v21, %v968_v39  ;;  %v1038_v46 = vmax.f32 %v1006_v37, 0.0 }
 0x161   : > { %v1005_v45 = vadd.f32 %v8558_v21, %v966_v43  ;;  %v1036_v48 = vmax.f32 %v1004_v42, 0.0 }
 0x162   : > { %v1039_v47 = vmax.f32 %v1007_v44, 0.0 }
 0x163   : > { %v1037_v49 = vmax.f32 %v1005_v45, 0.0  ;;  %v7163_v50 = vpop.f32.mrb[20].mxu0 }
 0x164   : > { %v8619_v51 = vpack.c.bf16 %v1039_v47, %v1038_v46  ;;  %v971_v52 = vmul.f32 %v7163_v50, %v8553_v19  ;;  %v895_v53 = vpop.f32.mrb[21].mxu0 }
 0x165   : > { %v8622_v54 = vpack.c.bf16 %v1037_v49, %v1036_v48  ;;  %v969_v55 = vmul.f32 %v8553_v19, %v895_v53  ;;  %v7164_v57 = vpop.f32.mrb[22].mxu0  ;;  %v7781_v53 = vld [vmem:[%s9966_s4 + $0x14] ss:$8 sps:$4 sm:$0xff]  }
 0x166   : > { %v1010_v58 = vadd.f32 %v8558_v21, %v971_v52  ;;  %v972_v60 = vmul.f32 %v7164_v57, %v8553_v19  ;;  %v898_v61 = vpop.f32.mrb[23].mxu0  ;;  %v7811_v52 = vld [vmem:[%s9966_s4 + $0xe0] ss:$8 sps:$4 sm:$0xff]   ;;  %v7783_v57 = vld [vmem:[%s9966_s4 + $0x10] ss:$8 sps:$4 sm:$0xff]  }
 0x167   : > { %v1008_v62 = vadd.f32 %v8558_v21, %v969_v55  ;;  %v970_v63 = vmul.f32 %v8553_v19, %v898_v61  ;;  %6764 = vmatprep.subr.bf16.mxu0 %v8622_v54  ;;  %7583 = vmatprep.subr.bf16.mxu1 %v8622_v54  ;;  %v7817_v55 = vld [vmem:[%s9966_s4 + $0xf4] ss:$8 sps:$4 sm:$0xff]   ;;  %v7786_v61 = vld [vmem:[%s9966_s4 + $0x20] ss:$8 sps:$4 sm:$0xff]  }
 0x168   : > { %v1011_v0 = vadd.f32 %v8558_v21, %v972_v60  ;;  %6765 = vmatpush3.bf16.msra.mxu0 %v8571_v41  ;;  %7591 = vmatpush3.bf16.msra.mxu1 %v8571_v41  ;;  %v1042_v2 = vmax.f32 %v1010_v58, 0.0  ;;  %v7819_v58 = vld [vmem:[%s9966_s4 + $0xf0] ss:$8 sps:$4 sm:$0xff]   ;;  %v7784_v60 = vld [vmem:[%s9966_s4 + $0x24] ss:$8 sps:$4 sm:$0xff]  }
 0x169   : > { %v1009_v1 = vadd.f32 %v8558_v21, %v970_v63  ;;  %6766 = vmatprep.subr.bf16.mxu0 %v8619_v51  ;;  %7584 = vmatprep.subr.bf16.mxu1 %v8619_v51  ;;  %v1040_v4 = vmax.f32 %v1008_v62, 0.0  ;;  %v7787_v62 = vld [vmem:[%s9966_s4 + $0x34] ss:$8 sps:$4 sm:$0xff]   ;;  %v7789_v63 = vld [vmem:[%s9966_s4 + $0x30] ss:$8 sps:$4 sm:$0xff]  }
 0x16a   : > { %v1043_v3 = vmax.f32 %v1011_v0, 0.0  ;;  %v7792_v0 = vld [vmem:[%s9966_s4 + $0x44] ss:$8 sps:$4 sm:$0xff]  }
 0x16b   : > { %v1041_v5 = vmax.f32 %v1009_v1, 0.0  ;;  %v7167_v6 = vpop.f32.mrb[24].mxu0  ;;  %v7790_v1 = vld [vmem:[%s9966_s4 + $0x40] ss:$8 sps:$4 sm:$0xff]  }
 0x16c   : > { %v8637_v7 = vpack.c.bf16 %v1043_v3, %v1042_v2  ;;  %v975_v8 = vmul.f32 %v7167_v6, %v8553_v19  ;;  %v911_v9 = vpop.f32.mrb[25].mxu0  ;;  %6767 = vmatpush3.bf16.msra.mxu0 %v8568_v38  ;;  %7592 = vmatpush3.bf16.msra.mxu1 %v8568_v38  ;;  %v7793_v2 = vld [vmem:[%s9966_s4 + $0x54] ss:$8 sps:$4 sm:$0xff]   ;;  %v7795_v3 = vld [vmem:[%s9966_s4 + $0x50] ss:$8 sps:$4 sm:$0xff]  }
 0x16d   : > { %v8642_v11 = vpack.c.bf16 %v1041_v5, %v1040_v4  ;;  %v973_v12 = vmul.f32 %v8553_v19, %v911_v9  ;;  %v7168_v14 = vpop.f32.mrb[26].mxu0  ;;  %v7796_v4 = vld [vmem:[%s9966_s4 + $0x64] ss:$8 sps:$4 sm:$0xff]   ;;  %v7798_v5 = vld [vmem:[%s9966_s4 + $0x60] ss:$8 sps:$4 sm:$0xff]  }
 0x16e   : > { %v1014_v15 = vadd.f32 %v8558_v21, %v975_v8  ;;  %v976_v16 = vmul.f32 %v7168_v14, %v8553_v19  ;;  %v914_v17 = vpop.f32.mrb[27].mxu0  ;;  %v7799_v6 = vld [vmem:[%s9966_s4 + $0x74] ss:$8 sps:$4 sm:$0xff]   ;;  %v7801_v8 = vld [vmem:[%s9966_s4 + $0x70] ss:$8 sps:$4 sm:$0xff]  }
 0x16f   : > { %v1012_v18 = vadd.f32 %v8558_v21, %v973_v12  ;;  %v974_v20 = vmul.f32 %v8553_v19, %v914_v17  ;;  %6768 = vmatprep.subr.bf16.mxu0 %v8642_v11  ;;  %7585 = vmatprep.subr.bf16.mxu1 %v8642_v11  ;;  %v7804_v9 = vld [vmem:[%s9966_s4 + $0x84] ss:$8 sps:$4 sm:$0xff]   ;;  %v7802_v12 = vld [vmem:[%s9966_s4 + $0x80] ss:$8 sps:$4 sm:$0xff]   ;;  %v7805_v14 = vld [vmem:[%s9966_s4 + $0x94] ss:$8 sps:$4 sm:$0xff]  }
 0x170   : > { %v1015_v22 = vadd.f32 %v8558_v21, %v976_v16  ;;  %6769 = vmatpush3.bf16.msra.mxu0 %v8583_v59  ;;  %7593 = vmatpush3.bf16.msra.mxu1 %v8583_v59  ;;  %v1046_v24 = vmax.f32 %v1014_v15, 0.0  ;;  %v7807_v15 = vld [vmem:[%s9966_s4 + $0x90] ss:$8 sps:$4 sm:$0xff]   ;;  %v7808_v16 = vld [vmem:[%s9966_s4 + $0xa4] ss:$8 sps:$4 sm:$0xff]  }
 0x171   : > { %v1013_v23 = vadd.f32 %v8558_v21, %v974_v20  ;;  %6770 = vmatprep.subr.bf16.mxu0 %v8637_v7  ;;  %7586 = vmatprep.subr.bf16.mxu1 %v8637_v7  ;;  %v1044_v26 = vmax.f32 %v1012_v18, 0.0 }
 0x172   : > { %v1047_v25 = vmax.f32 %v1015_v22, 0.0 }
 0x173   : > { %v1045_v27 = vmax.f32 %v1013_v23, 0.0  ;;  %v7171_v28 = vpop.f32.mrb[28].mxu0 }
 0x174   : > { %v8657_v29 = vpack.c.bf16 %v1047_v25, %v1046_v24  ;;  %v979_v30 = vmul.f32 %v7171_v28, %v8553_v19  ;;  %v927_v32 = vpop.f32.mrb[29].mxu0  ;;  %6771 = vmatpush3.bf16.msra.mxu0 %v8580_v56  ;;  %7594 = vmatpush3.bf16.msra.mxu1 %v8580_v56 }
 0x175   : > { %v8662_v33 = vpack.c.bf16 %v1045_v27, %v1044_v26  ;;  %v977_v35 = vmul.f32 %v8553_v19, %v927_v32  ;;  %v7172_v36 = vpop.f32.mrb[30].mxu0 }
 0x176   : > { %v1018_v37 = vadd.f32 %v8558_v21, %v979_v30  ;;  %v980_v39 = vmul.f32 %v7172_v36, %v8553_v19  ;;  %v930_v40 = vpop.f32.mrb[31].mxu0 }
 0x177   : > { %v1016_v42 = vadd.f32 %v8558_v21, %v977_v35  ;;  %v978_v43 = vmul.f32 %v8553_v19, %v930_v40  ;;  %6772 = vmatprep.subr.bf16.mxu0 %v8662_v33  ;;  %7587 = vmatprep.subr.bf16.mxu1 %v8662_v33 }
 0x178   : > { %v1019_v44 = vadd.f32 %v8558_v21, %v980_v39  ;;  %6773 = vmatpush3.bf16.msra.mxu0 %v8595_v13  ;;  %7595 = vmatpush3.bf16.msra.mxu1 %v8595_v13  ;;  %v1050_v46 = vmax.f32 %v1018_v37, 0.0 }
 0x179   : > { %v1017_v45 = vadd.f32 %v8558_v21, %v978_v43  ;;  %6774 = vmatprep.subr.bf16.mxu0 %v8657_v29  ;;  %7588 = vmatprep.subr.bf16.mxu1 %v8657_v29  ;;  %v1048_v48 = vmax.f32 %v1016_v42, 0.0  ;;  %v7778_v21 = vld [vmem:[%s9966_s4] ss:$8 sps:$4 sm:$0xff]  }
 0x17a   : > { %v1051_v47 = vmax.f32 %v1019_v44, 0.0 }
 0x17b   : > { %v1049_v19 = vmax.f32 %v1017_v45, 0.0 }
 0x17c   : > { %v8677_v49 = vpack.c.bf16 %v1051_v47, %v1050_v46  ;;  %6775 = vmatpush3.bf16.msra.mxu0 %v8592_v10  ;;  %7596 = vmatpush3.bf16.msra.mxu1 %v8592_v10 }
 0x17d   : > { %v8681_v50 = vpack.c.bf16 %v1049_v19, %v1048_v48 }
 0x17f   : > { %6776 = vmatprep.subr.bf16.mxu0 %v8681_v50  ;;  %7589 = vmatprep.subr.bf16.mxu1 %v8681_v50 }
 0x180   : > { %6777 = vmatpush3.bf16.msra.mxu0 %v8610_v34  ;;  %7597 = vmatpush3.bf16.msra.mxu1 %v8610_v34 }
 0x181   : > { %6778 = vmatprep.subr.bf16.mxu0 %v8677_v49  ;;  %7590 = vmatprep.subr.bf16.mxu1 %v8677_v49 }
 0x184   : > { %6779 = vmatpush3.bf16.msra.mxu0 %v8607_v31  ;;  %7598 = vmatpush3.bf16.msra.mxu1 %v8607_v31 }
 0x185   : > { %6804 = vmatprep.subr.bf16.mxu0 %v8622_v54 }
 0x187   : > { %1149 = vmatmul.mubr.bf16.vlgmr.msra.gmra.mrb[32].mxu0 %v7778_v21  ;;  %1523 = vmatmul.mubr.bf16.vlgmr.msra.gmra.mrb[0].mxu1 %v7811_v52 }
 0x188   : > { %6805 = vmatpush3.bf16.msra.mxu0 %v8571_v41  ;;  %1156 = vmatprep.mubr.bf16.mxu0 %v7781_v53 }
 0x189   : > { %6806 = vmatprep.subr.bf16.mxu0 %v8619_v51  ;;  %1530 = vmatprep.mubr.bf16.mxu1 %v7817_v55 }
 0x18c   : > { %6807 = vmatpush3.bf16.msra.mxu0 %v8568_v38 }
 0x18d   : > { %6808 = vmatprep.subr.bf16.mxu0 %v8642_v11 }
 0x18f   : > { %1157 = vmatmul.mubr.bf16.gmra.mrb[36].mxu0 %v7783_v57  ;;  %1531 = vmatmul.mubr.bf16.gmra.mrb[4].mxu1 %v7819_v58 }
 0x190   : > { %6809 = vmatpush3.bf16.msra.mxu0 %v8583_v59  ;;  %1164 = vmatprep.mubr.bf16.mxu0 %v7784_v60 }
 0x191   : > { %6810 = vmatprep.subr.bf16.mxu0 %v8637_v7 }
 0x194   : > { %6811 = vmatpush3.bf16.msra.mxu0 %v8580_v56 }
 0x195   : > { %6812 = vmatprep.subr.bf16.mxu0 %v8662_v33 }
 0x197   : > { %1165 = vmatmul.mubr.bf16.gmra.mrb[40].mxu0 %v7786_v61 }
 0x198   : > { %6813 = vmatpush3.bf16.msra.mxu0 %v8595_v13  ;;  %1172 = vmatprep.mubr.bf16.mxu0 %v7787_v62 }
 0x199   : > { %6814 = vmatprep.subr.bf16.mxu0 %v8657_v29 }
 0x19c   : > { %6815 = vmatpush3.bf16.msra.mxu0 %v8592_v10 }
 0x19d   : > { %6816 = vmatprep.subr.bf16.mxu0 %v8681_v50 }
 0x19f   : > { %1173 = vmatmul.mubr.bf16.gmra.mrb[44].mxu0 %v7789_v63 }
 0x1a0   : > { %6817 = vmatpush3.bf16.msra.mxu0 %v8610_v34  ;;  %1262 = vmatprep.mubr.bf16.mxu0 %v7792_v0 }
 0x1a1   : > { %6818 = vmatprep.subr.bf16.mxu0 %v8677_v49 }
 0x1a4   : > { %6819 = vmatpush3.bf16.msra.mxu0 %v8607_v31 }
 0x1a5   : > { %6844 = vmatprep.subr.bf16.mxu0 %v8622_v54 }
 0x1a7   : > { %1263 = vmatmul.mubr.bf16.vlgmr.msra.gmra.mrb[48].mxu0 %v7790_v1 }
 0x1a8   : > { %6845 = vmatpush3.bf16.msra.mxu0 %v8571_v41  ;;  %1270 = vmatprep.mubr.bf16.mxu0 %v7793_v2 }
 0x1a9   : > { %6846 = vmatprep.subr.bf16.mxu0 %v8619_v51 }
 0x1ac   : > { %6847 = vmatpush3.bf16.msra.mxu0 %v8568_v38 }
 0x1ad   : > { %6848 = vmatprep.subr.bf16.mxu0 %v8642_v11 }
 0x1af   : > { %1271 = vmatmul.mubr.bf16.gmra.mrb[52].mxu0 %v7795_v3 }
 0x1b0   : > { %6849 = vmatpush3.bf16.msra.mxu0 %v8583_v59  ;;  %1278 = vmatprep.mubr.bf16.mxu0 %v7796_v4 }
 0x1b1   : > { %6850 = vmatprep.subr.bf16.mxu0 %v8637_v7 }
 0x1b4   : > { %6851 = vmatpush3.bf16.msra.mxu0 %v8580_v56 }
 0x1b5   : > { %6852 = vmatprep.subr.bf16.mxu0 %v8662_v33 }
 0x1b7   : > { %1279 = vmatmul.mubr.bf16.gmra.mrb[56].mxu0 %v7798_v5 }
 0x1b8   : > { %6853 = vmatpush3.bf16.msra.mxu0 %v8595_v13  ;;  %1286 = vmatprep.mubr.bf16.mxu0 %v7799_v6 }
 0x1b9   : > { %6854 = vmatprep.subr.bf16.mxu0 %v8657_v29 }
 0x1bc   : > { %6855 = vmatpush3.bf16.msra.mxu0 %v8592_v10 }
 0x1bd   : > { %6856 = vmatprep.subr.bf16.mxu0 %v8681_v50 }
 0x1bf   : > { %1287 = vmatmul.mubr.bf16.gmra.mrb[60].mxu0 %v7801_v8 }
 0x1c0   : > { %6857 = vmatpush3.bf16.msra.mxu0 %v8610_v34  ;;  %1384 = vmatprep.mubr.bf16.mxu0 %v7804_v9 }
 0x1c1   : > { %6858 = vmatprep.subr.bf16.mxu0 %v8677_v49 }
 0x1c4   : > { %6859 = vmatpush3.bf16.msra.mxu0 %v8607_v31 }
 0x1c5   : > { %6884 = vmatprep.subr.bf16.mxu0 %v8622_v54 }
 0x1c7   : > { %1385 = vmatmul.mubr.bf16.vlgmr.msra.gmra.mrb[64].mxu0 %v7802_v12 }
 0x1c8   : > { %6885 = vmatpush3.bf16.msra.mxu0 %v8571_v41  ;;  %1392 = vmatprep.mubr.bf16.mxu0 %v7805_v14  ;;  %v7810_v41 = vld [vmem:[%s9966_s4 + $0xa0] ss:$8 sps:$4 sm:$0xff]  }
 0x1c9   : > { %6886 = vmatprep.subr.bf16.mxu0 %v8619_v51  ;;  %v7825_v51 = vld [vmem:[%s9966_s4 + $0xd0] ss:$8 sps:$4 sm:$0xff]  }
 0x1cc   : > { %6887 = vmatpush3.bf16.msra.mxu0 %v8568_v38  ;;  %v7814_v38 = vld [vmem:[%s9966_s4 + $0xb4] ss:$8 sps:$4 sm:$0xff]  }
 0x1cd   : > { %6888 = vmatprep.subr.bf16.mxu0 %v8642_v11 }
 0x1cf   : > { %1393 = vmatmul.mubr.bf16.gmra.mrb[68].mxu0 %v7807_v15 }
 0x1d0   : > { %6889 = vmatpush3.bf16.msra.mxu0 %v8583_v59  ;;  %1400 = vmatprep.mubr.bf16.mxu0 %v7808_v16  ;;  %v7816_v59 = vld [vmem:[%s9966_s4 + $0xb0] ss:$8 sps:$4 sm:$0xff]  }
 0x1d1   : > { %6890 = vmatprep.subr.bf16.mxu0 %v8637_v7 }
 0x1d4   : > { %6891 = vmatpush3.bf16.msra.mxu0 %v8580_v56  ;;  %v7822_v56 = vld [vmem:[%s9966_s4 + $0xc4] ss:$8 sps:$4 sm:$0xff]  }
 0x1d5   : > { %6892 = vmatprep.subr.bf16.mxu0 %v8662_v33 }
 0x1d7   : > { %1401 = vmatmul.mubr.bf16.gmra.mrb[72].mxu0 %v7810_v41 }
 0x1d8   : > { %6893 = vmatpush3.bf16.msra.mxu0 %v8595_v13  ;;  %1408 = vmatprep.mubr.bf16.mxu0 %v7814_v38  ;;  %v7820_v13 = vld [vmem:[%s9966_s4 + $0xc0] ss:$8 sps:$4 sm:$0xff]  }
 0x1d9   : > { %6894 = vmatprep.subr.bf16.mxu0 %v8657_v29 }
 0x1dc   : > { %6895 = vmatpush3.bf16.msra.mxu0 %v8592_v10  ;;  %v7823_v10 = vld [vmem:[%s9966_s4 + $0xd4] ss:$8 sps:$4 sm:$0xff]  }
 0x1dd   : > { %6896 = vmatprep.subr.bf16.mxu0 %v8681_v50 }
 0x1df   : > { %1409 = vmatmul.mubr.bf16.gmra.mrb[76].mxu0 %v7816_v59 }
 0x1e0   : > { %6897 = vmatpush3.bf16.msra.mxu0 %v8610_v34  ;;  %1506 = vmatprep.mubr.bf16.mxu0 %v7822_v56  ;;  %v7826_v34 = vld [vmem:[%s9967_s5] sm:$0xff]  }
 0x1e1   : > { %6898 = vmatprep.subr.bf16.mxu0 %v8677_v49 }
 0x1e4   : > { %6899 = vmatpush3.bf16.msra.mxu0 %v8607_v31 }
 0x1e7   : > { %1507 = vmatmul.mubr.bf16.vlgmr.msra.gmra.mrb[80].mxu0 %v7820_v13 }
 0x1e8   : > { %1514 = vmatprep.mubr.bf16.mxu0 %v7823_v10 }
 0x1ef   : > { %1515 = vmatmul.mubr.bf16.gmra.mrb[84].mxu0 %v7825_v51 }
 0x1f0   : > { %7181 = vmatprep.mubr.msk.bf16.mxu0 %vm1579_vm1, %v7826_v34 }
 0x25a   : > { %v6780_v54 = vpop.f32.mrb[32].mxu0  ;;  %v6912_v31 = vpop.f32.mrb[0].mxu1 }
 0x25b   : > { %v6781_v7 = vpop.f32.mrb[33].mxu0  ;;  %v6913_v11 = vpop.f32.mrb[1].mxu1 }
 0x25c   : > { %v8833_v17 = vadd.f32 %v6781_v7, %v6780_v54  ;;  %v6783_v18 = vpop.f32.mrb[34].mxu0  ;;  %v8835_v20 = vadd.f32 %v6913_v11, %v6912_v31  ;;  %v6915_v22 = vpop.f32.mrb[2].mxu1 }
 0x25d   : > { %v6784_v23 = vpop.f32.mrb[35].mxu0  ;;  %v6916_v24 = vpop.f32.mrb[3].mxu1 }
 0x25e   : > { %v8837_v25 = vadd.f32 %v6784_v23, %v6783_v18  ;;  %v8839_v26 = vadd.f32 %v6916_v24, %v6915_v22 }
 0x262   : > { %v6786_v27 = vpop.f32.mrb[36].mxu0  ;;  %v6918_v28 = vpop.f32.mrb[4].mxu1 }
 0x263   : > { %v6787_v29 = vpop.f32.mrb[37].mxu0  ;;  %v6919_v30 = vpop.f32.mrb[5].mxu1 }
 0x264   : > { %v8841_v32 = vadd.f32 %v6787_v29, %v6786_v27  ;;  %v6789_v33 = vpop.f32.mrb[38].mxu0  ;;  %v8843_v35 = vadd.f32 %v6919_v30, %v6918_v28  ;;  %v6921_v36 = vpop.f32.mrb[6].mxu1 }
 0x265   : > { %v6790_v37 = vpop.f32.mrb[39].mxu0  ;;  %v6922_v39 = vpop.f32.mrb[7].mxu1 }
 0x266   : > { %v6791_v40 = vadd.f32 %v6790_v37, %v6789_v33  ;;  %v8845_v42 = vadd.f32 %v6922_v39, %v6921_v36 }
 0x26a   : > { %v6792_v43 = vpop.f32.mrb[40].mxu0 }
 0x26b   : > { %v6793_v44 = vpop.f32.mrb[41].mxu0 }
 0x26c   : > { %v8847_v45 = vadd.f32 %v6793_v44, %v6792_v43  ;;  %v6795_v46 = vpop.f32.mrb[42].mxu0 }
 0x26d   : > { %v6796_v47 = vpop.f32.mrb[43].mxu0 }
 0x26e   : > { %v8849_v48 = vadd.f32 %v6796_v47, %v6795_v46 }
 0x272   : > { %v6798_v19 = vpop.f32.mrb[44].mxu0 }
 0x273   : > { %v6799_v49 = vpop.f32.mrb[45].mxu0 }
 0x274   : > { %v8851_v50 = vadd.f32 %v6799_v49, %v6798_v19  ;;  %v6801_v21 = vpop.f32.mrb[46].mxu0 }
 0x275   : > { %v6802_v52 = vpop.f32.mrb[47].mxu0 }
 0x276   : > { %v8853_v53 = vadd.f32 %v6802_v52, %v6801_v21 }
 0x27a   : > { %v6820_v55 = vpop.f32.mrb[48].mxu0 }
 0x27b   : > { %v6821_v57 = vpop.f32.mrb[49].mxu0 }
 0x27c   : > { %v6822_v58 = vadd.f32 %v6821_v57, %v6820_v55  ;;  %v6823_v60 = vpop.f32.mrb[50].mxu0 }
 0x27d   : > { %v6824_v61 = vpop.f32.mrb[51].mxu0 }
 0x27e   : > { %v1295_v62 = vmax.f32 %v8833_v17, %v6822_v58  ;;  %v6825_v63 = vadd.f32 %v6824_v61, %v6823_v60 }
 0x280   : > { %v1296_v0 = vmax.f32 %v8837_v25, %v6825_v63 }
 0x282   : > { %v6826_v1 = vpop.f32.mrb[52].mxu0 }
 0x283   : > { %v6827_v2 = vpop.f32.mrb[53].mxu0 }
 0x284   : > { %v6828_v3 = vadd.f32 %v6827_v2, %v6826_v1  ;;  %v6829_v4 = vpop.f32.mrb[54].mxu0 }
 0x285   : > { %v6830_v5 = vpop.f32.mrb[55].mxu0 }
 0x286   : > { %v1297_v6 = vmax.f32 %v8841_v32, %v6828_v3  ;;  %v6831_v8 = vadd.f32 %v6830_v5, %v6829_v4 }
 0x288   : > { %v1298_v9 = vmax.f32 %v6791_v40, %v6831_v8 }
 0x28a   : > { %v6832_v12 = vpop.f32.mrb[56].mxu0 }
 0x28b   : > { %v6833_v14 = vpop.f32.mrb[57].mxu0 }
 0x28c   : > { %v6834_v15 = vadd.f32 %v6833_v14, %v6832_v12  ;;  %v6835_v16 = vpop.f32.mrb[58].mxu0 }
 0x28d   : > { %v6836_v41 = vpop.f32.mrb[59].mxu0 }
 0x28e   : > { %v1299_v38 = vmax.f32 %v8847_v45, %v6834_v15  ;;  %v6837_v59 = vadd.f32 %v6836_v41, %v6835_v16 }
 0x290   : > { %v1300_v56 = vmax.f32 %v8849_v48, %v6837_v59 }
 0x292   : > { %v6838_v13 = vpop.f32.mrb[60].mxu0 }
 0x293   : > { %v6839_v10 = vpop.f32.mrb[61].mxu0 }
 0x294   : > { %v6840_v51 = vadd.f32 %v6839_v10, %v6838_v13  ;;  %v6841_v34 = vpop.f32.mrb[62].mxu0  ;;  %v7827_v13 = vld [vmem:[%s9967_s5 + $0x8] sm:$0xff]   ;;  %v7828_v10 = vld [vmem:[%s9967_s5 + $0x10] sm:$0xff]  }
 0x295   : > { %v6842_v54 = vpop.f32.mrb[63].mxu0 }
 0x296   : > { %v1301_v31 = vmax.f32 %v8851_v50, %v6840_v51  ;;  %v6843_v7 = vadd.f32 %v6842_v54, %v6841_v34  ;;  %v7829_v51 = vld [vmem:[%s9967_s5 + $0x18] sm:$0xff]   ;;  %v7830_v34 = vld [vmem:[%s9967_s5 + $0x20] sm:$0xff]  }
 0x297   : > { %v7862_v54 = vld [vmem:[%s9968_s6 + $0x20] sm:$0xff]  }
 0x298   : > { %v1302_v11 = vmax.f32 %v8853_v53, %v6843_v7  ;;  %7205 = vmatprep.subr.bf16.mxu1 %v7862_v54  ;;  %v7832_v7 = vld [vmem:[%s9967_s5 + $0x30] sm:$0xff]  }
 0x299   : > { %7206 = vmatpush3.bf16.msra.mxu1 %v7862_v54  ;;  %v7870_v54 = vld [vmem:[%s9968_s6 + $0x40] sm:$0xff]  }
 0x29a   : > { %v6860_v17 = vpop.f32.mrb[64].mxu0 }
 0x29b   : > { %v6861_v18 = vpop.f32.mrb[65].mxu0 }
 0x29c   : > { %v6862_v22 = vadd.f32 %v6861_v18, %v6860_v17  ;;  %v6863_v23 = vpop.f32.mrb[66].mxu0  ;;  %v7834_v17 = vld [vmem:[%s9967_s5 + $0x40] sm:$0xff]   ;;  %v7835_v18 = vld [vmem:[%s9967_s5 + $0x48] sm:$0xff]  }
 0x29d   : > { %v6864_v24 = vpop.f32.mrb[67].mxu0 }
 0x29e   : > { %v1417_v25 = vmax.f32 %v1295_v62, %v6862_v22  ;;  %v6865_v27 = vadd.f32 %v6864_v24, %v6863_v23  ;;  %v7836_v22 = vld [vmem:[%s9967_s5 + $0x50] sm:$0xff]   ;;  %v7837_v23 = vld [vmem:[%s9967_s5 + $0x58] sm:$0xff]   ;;  %v7838_v24 = vld [vmem:[%s9967_s5 + $0x60] sm:$0xff]  }
 0x2a0   : > { %v1418_v28 = vmax.f32 %v1296_v0, %v6865_v27  ;;  %v7840_v27 = vld [vmem:[%s9967_s5 + $0x70] sm:$0xff]  }
 0x2a2   : > { %v6866_v29 = vpop.f32.mrb[68].mxu0 }
 0x2a3   : > { %v6867_v30 = vpop.f32.mrb[69].mxu0 }
 0x2a4   : > { %v6868_v32 = vadd.f32 %v6867_v30, %v6866_v29  ;;  %v6869_v33 = vpop.f32.mrb[70].mxu0  ;;  %v7842_v29 = vld [vmem:[%s9967_s5 + $0x80] sm:$0xff]   ;;  %v7843_v30 = vld [vmem:[%s9967_s5 + $0x88] sm:$0xff]  }
 0x2a5   : > { %v6870_v36 = vpop.f32.mrb[71].mxu0 }
 0x2a6   : > { %v1419_v37 = vmax.f32 %v1297_v6, %v6868_v32  ;;  %v6871_v39 = vadd.f32 %v6870_v36, %v6869_v33  ;;  %v7844_v32 = vld [vmem:[%s9967_s5 + $0x90] sm:$0xff]   ;;  %v7845_v33 = vld [vmem:[%s9967_s5 + $0x98] sm:$0xff]   ;;  %v7846_v36 = vld [vmem:[%s9967_s5 + $0xa0] sm:$0xff]  }
 0x2a8   : > { %v1420_v40 = vmax.f32 %v1298_v9, %v6871_v39  ;;  %v7848_v39 = vld [vmem:[%s9967_s5 + $0xb0] sm:$0xff]  }
 0x2aa   : > { %v6872_v43 = vpop.f32.mrb[72].mxu0 }
 0x2ab   : > { %v6873_v44 = vpop.f32.mrb[73].mxu0 }
 0x2ac   : > { %v6874_v45 = vadd.f32 %v6873_v44, %v6872_v43  ;;  %v6875_v46 = vpop.f32.mrb[74].mxu0  ;;  %v7850_v43 = vld [vmem:[%s9967_s5 + $0xc0] sm:$0xff]   ;;  %v7863_v44 = vld [vmem:[%s9968_s6 + $0x28] sm:$0xff]  }
 0x2ad   : > { %v6876_v47 = vpop.f32.mrb[75].mxu0  ;;  %7207 = vmatprep.subr.bf16.mxu1 %v7863_v44 }
 0x2ae   : > { %v1421_v48 = vmax.f32 %v1299_v38, %v6874_v45  ;;  %v6877_v19 = vadd.f32 %v6876_v47, %v6875_v46  ;;  %7208 = vmatpush3.bf16.msra.mxu1 %v7863_v44  ;;  %v7851_v45 = vld [vmem:[%s9967_s5 + $0xc8] sm:$0xff]   ;;  %v7852_v46 = vld [vmem:[%s9967_s5 + $0xd0] sm:$0xff]  }
 0x2af   : > { %v7864_v47 = vld [vmem:[%s9968_s6 + $0x30] sm:$0xff]  }
 0x2b0   : > { %v1422_v49 = vmax.f32 %v1300_v56, %v6877_v19  ;;  %v1543_v50 = vmax.f32 %v1421_v48, %v8835_v20  ;;  %7209 = vmatprep.subr.bf16.mxu1 %v7864_v47  ;;  %v7853_v48 = vld [vmem:[%s9967_s5 + $0xd8] sm:$0xff]  }
 0x2b1   : > { %v7865_v19 = vld [vmem:[%s9968_s6 + $0x38] sm:$0xff]  }
 0x2b2   : > { %v1544_v21 = vmax.f32 %v1422_v49, %v8839_v26  ;;  %v6878_v52 = vpop.f32.mrb[76].mxu0  ;;  %7210 = vmatpush3.bf16.msra.mxu1 %v7864_v47  ;;  %v7854_v49 = vld [vmem:[%s9967_s5 + $0xe0] sm:$0xff]   ;;  %v7876_v47 = vld [vmem:[%s9968_s6 + $0x70] sm:$0xff]  }
 0x2b3   : > { %v6879_v53 = vpop.f32.mrb[77].mxu0  ;;  %7211 = vmatprep.subr.bf16.mxu1 %v7865_v19 }
 0x2b4   : > { %v8864_v55 = vpack.c.bf16 %v1544_v21, %v1543_v50  ;;  %v6880_v57 = vadd.f32 %v6879_v53, %v6878_v52  ;;  %v6881_v58 = vpop.f32.mrb[78].mxu0  ;;  %v7866_v50 = vld [vmem:[%s9968_s6] sm:$0xff]   ;;  %v7855_v21 = vld [vmem:[%s9967_s5 + $0xe8] sm:$0xff]   ;;  %v7856_v52 = vld [vmem:[%s9967_s5 + $0xf0] sm:$0xff]  }
 0x2b5   : > { %v6882_v60 = vpop.f32.mrb[79].mxu0  ;;  %v7857_v53 = vld [vmem:[%s9967_s5 + $0xf8] sm:$0xff]  }
 0x2b6   : > { %v1423_v61 = vmax.f32 %v1301_v31, %v6880_v57  ;;  %v6883_v62 = vadd.f32 %v6882_v60, %v6881_v58  ;;  %v7831_v31 = vld [vmem:[%s9967_s5 + $0x28] sm:$0xff]   ;;  %7212 = vmatpush3.bf16.msra.mxu1 %v7865_v19  ;;  %v7858_v57 = vld [vmem:[%s9967_s5 + $0x100] sm:$0xff]   ;;  %v7860_v60 = vld [vmem:[%s9967_s5 + $0x110] sm:$0xff]  }
 0x2b7   : > { %7221 = vmatprep.subr.bf16.mxu1 %v7866_v50  ;;  %v7859_v58 = vld [vmem:[%s9967_s5 + $0x108] sm:$0xff]  }
 0x2b8   : > { %v1424_v63 = vmax.f32 %v1302_v11, %v6883_v62  ;;  %v1545_v0 = vmax.f32 %v1423_v61, %v8843_v35  ;;  %v7833_v11 = vld [vmem:[%s9967_s5 + $0x38] sm:$0xff]  }
 0x2ba   : > { %v1546_v1 = vmax.f32 %v1424_v63, %v8845_v42  ;;  %v6900_v2 = vpop.f32.mrb[80].mxu0 }
 0x2bb   : > { %v6901_v3 = vpop.f32.mrb[81].mxu0 }
 0x2bc   : > { %v8868_v4 = vpack.c.bf16 %v1546_v1, %v1545_v0  ;;  %v6902_v20 = vadd.f32 %v6901_v3, %v6900_v2  ;;  %v6903_v26 = vpop.f32.mrb[82].mxu0 }
 0x2bd   : > { %v6904_v5 = vpop.f32.mrb[83].mxu0 }
 0x2be   : > { %v1539_v6 = vmax.f32 %v1417_v25, %v6902_v20  ;;  %v6905_v8 = vadd.f32 %v6904_v5, %v6903_v26  ;;  %v7839_v25 = vld [vmem:[%s9967_s5 + $0x68] sm:$0xff]  }
 0x2c0   : > { %v1540_v9 = vmax.f32 %v1418_v28, %v6905_v8  ;;  %v7841_v28 = vld [vmem:[%s9967_s5 + $0x78] sm:$0xff]  }
 0x2c2   : > { %v8870_v12 = vpack.c.bf16 %v1540_v9, %v1539_v6  ;;  %v6906_v14 = vpop.f32.mrb[84].mxu0 }
 0x2c3   : > { %v6907_v15 = vpop.f32.mrb[85].mxu0 }
 0x2c4   : > { %v6908_v16 = vadd.f32 %v6907_v15, %v6906_v14  ;;  %v6909_v41 = vpop.f32.mrb[86].mxu0  ;;  %7173 = vmatprep.subr.bf16.mxu0 %v8870_v12 }
 0x2c5   : > { %v6910_v35 = vpop.f32.mrb[87].mxu0  ;;  %7174 = vmatpush3.bf16.msra.mxu0 %v8870_v12 }
 0x2c6   : > { %v1541_v42 = vmax.f32 %v1419_v37, %v6908_v16  ;;  %v6911_v38 = vadd.f32 %v6910_v35, %v6909_v41  ;;  %v7847_v37 = vld [vmem:[%s9967_s5 + $0xa8] sm:$0xff]  }
 0x2c7   : > { %v7867_v41 = vld [vmem:[%s9968_s6 + $0x8] sm:$0xff]  }
 0x2c8   : > { %v1542_v59 = vmax.f32 %v1420_v40, %v6911_v38  ;;  %v7849_v40 = vld [vmem:[%s9967_s5 + $0xb8] sm:$0xff]   ;;  %v7868_v38 = vld [vmem:[%s9968_s6 + $0x10] sm:$0xff]  }
 0x2ca   : > { %v8874_v56 = vpack.c.bf16 %v1542_v59, %v1541_v42 }
 0x2cc   : > { %7175 = vmatprep.subr.bf16.mxu0 %v8874_v56 }
 0x2cd   : > { %7176 = vmatpush3.bf16.msra.mxu0 %v8874_v56 }
 0x2ce   : > { %7177 = vmatprep.subr.bf16.mxu0 %v8864_v55 }
 0x2d1   : > { %7178 = vmatpush3.bf16.msra.mxu0 %v8864_v55 }
 0x2d2   : > { %7179 = vmatprep.subr.bf16.mxu0 %v8868_v4 }
 0x2d5   : > { %7180 = vmatpush3.bf16.msra.mxu0 %v8868_v4 }
 0x2d6   : > { %7189 = vmatprep.subr.bf16.mxu0 %v8870_v12 }
 0x2d8   : > { %7182 = vmatmul.mubr.msk.bf16.vlgmr.msra.gmra.mrb[88].mxu0 %vm1579_vm1, %v7827_v13 }
 0x2d9   : > { %7190 = vmatpush3.bf16.msra.mxu0 %v8870_v12  ;;  %7185 = vmatprep.mubr.msk.bf16.mxu0 %vm1579_vm1, %v7828_v10 }
 0x2da   : > { %7191 = vmatprep.subr.bf16.mxu0 %v8874_v56 }
 0x2dd   : > { %7192 = vmatpush3.bf16.msra.mxu0 %v8874_v56 }
 0x2de   : > { %7193 = vmatprep.subr.bf16.mxu0 %v8864_v55 }
 0x2e0   : > { %7186 = vmatmul.mubr.msk.bf16.gmra.mrb[92].mxu0 %vm1579_vm1, %v7829_v51  ;;  %v7869_v51 = vld [vmem:[%s9968_s6 + $0x18] sm:$0xff]  }
 0x2e1   : > { %7194 = vmatpush3.bf16.msra.mxu0 %v8864_v55  ;;  %7197 = vmatprep.mubr.msk.bf16.mxu0 %vm1579_vm1, %v7830_v34 }
 0x2e2   : > { %7195 = vmatprep.subr.bf16.mxu0 %v8868_v4 }
 0x2e5   : > { %7196 = vmatpush3.bf16.msra.mxu0 %v8868_v4 }
 0x2e6   : > { %7237 = vmatprep.subr.bf16.mxu0 %v8870_v12 }
 0x2e8   : > { %7198 = vmatmul.mubr.msk.bf16.vlgmr.msra.gmra.mrb[96].mxu0 %vm1579_vm1, %v7831_v31 }
 0x2e9   : > { %7238 = vmatpush3.bf16.msra.mxu0 %v8870_v12  ;;  %7201 = vmatprep.mubr.msk.bf16.mxu0 %vm1579_vm1, %v7832_v7 }
 0x2ea   : > { %7239 = vmatprep.subr.bf16.mxu0 %v8874_v56 }
 0x2ed   : > { %7240 = vmatpush3.bf16.msra.mxu0 %v8874_v56 }
 0x2ee   : > { %7241 = vmatprep.subr.bf16.mxu0 %v8864_v55 }
 0x2f0   : > { %7202 = vmatmul.mubr.msk.bf16.gmra.mrb[100].mxu0 %vm1579_vm1, %v7833_v11 }
 0x2f1   : > { %7242 = vmatpush3.bf16.msra.mxu0 %v8864_v55  ;;  %7245 = vmatprep.mubr.msk.bf16.mxu0 %vm1579_vm1, %v7834_v17 }
 0x2f2   : > { %7243 = vmatprep.subr.bf16.mxu0 %v8868_v4 }
 0x2f5   : > { %7244 = vmatpush3.bf16.msra.mxu0 %v8868_v4 }
 0x2f6   : > { %7269 = vmatprep.subr.bf16.mxu0 %v8870_v12 }
 0x2f8   : > { %7246 = vmatmul.mubr.msk.bf16.vlgmr.msra.gmra.mrb[104].mxu0 %vm1579_vm1, %v7835_v18 }
 0x2f9   : > { %7270 = vmatpush3.bf16.msra.mxu0 %v8870_v12  ;;  %7249 = vmatprep.mubr.msk.bf16.mxu0 %vm1579_vm1, %v7836_v22  ;;  %v7871_v22 = vld [vmem:[%s9968_s6 + $0x48] sm:$0xff]  }
 0x2fa   : > { %7271 = vmatprep.subr.bf16.mxu0 %v8874_v56 }
 0x2fd   : > { %7272 = vmatpush3.bf16.msra.mxu0 %v8874_v56 }
 0x2fe   : > { %7273 = vmatprep.subr.bf16.mxu0 %v8864_v55 }
 0x300   : > { %7250 = vmatmul.mubr.msk.bf16.gmra.mrb[108].mxu0 %vm1579_vm1, %v7837_v23 }
 0x301   : > { %7274 = vmatpush3.bf16.msra.mxu0 %v8864_v55  ;;  %7277 = vmatprep.mubr.msk.bf16.mxu0 %vm1579_vm1, %v7838_v24  ;;  %v7872_v24 = vld [vmem:[%s9968_s6 + $0x50] sm:$0xff]  }
 0x302   : > { %7275 = vmatprep.subr.bf16.mxu0 %v8868_v4 }
 0x305   : > { %7276 = vmatpush3.bf16.msra.mxu0 %v8868_v4 }
 0x306   : > { %7301 = vmatprep.subr.bf16.mxu0 %v8870_v12 }
 0x308   : > { %7278 = vmatmul.mubr.msk.bf16.vlgmr.msra.gmra.mrb[112].mxu0 %vm1579_vm1, %v7839_v25 }
 0x309   : > { %7302 = vmatpush3.bf16.msra.mxu0 %v8870_v12  ;;  %7281 = vmatprep.mubr.msk.bf16.mxu0 %vm1579_vm1, %v7840_v27 }
 0x30a   : > { %7303 = vmatprep.subr.bf16.mxu0 %v8874_v56 }
 0x30d   : > { %7304 = vmatpush3.bf16.msra.mxu0 %v8874_v56 }
 0x30e   : > { %7305 = vmatprep.subr.bf16.mxu0 %v8864_v55 }
 0x310   : > { %7282 = vmatmul.mubr.msk.bf16.gmra.mrb[116].mxu0 %vm1579_vm1, %v7841_v28 }
 0x311   : > { %7306 = vmatpush3.bf16.msra.mxu0 %v8864_v55  ;;  %7309 = vmatprep.mubr.msk.bf16.mxu0 %vm1579_vm1, %v7842_v29 }
 0x312   : > { %7307 = vmatprep.subr.bf16.mxu0 %v8868_v4 }
 0x315   : > { %7308 = vmatpush3.bf16.msra.mxu0 %v8868_v4 }
 0x316   : > { %7333 = vmatprep.subr.bf16.mxu0 %v8870_v12 }
 0x318   : > { %7310 = vmatmul.mubr.msk.bf16.vlgmr.msra.gmra.mrb[120].mxu0 %vm1579_vm1, %v7843_v30 }
 0x319   : > { %7334 = vmatpush3.bf16.msra.mxu0 %v8870_v12  ;;  %7313 = vmatprep.mubr.msk.bf16.mxu0 %vm1579_vm1, %v7844_v32  ;;  %v7873_v32 = vld [vmem:[%s9968_s6 + $0x58] sm:$0xff]  }
 0x31a   : > { %7335 = vmatprep.subr.bf16.mxu0 %v8874_v56 }
 0x31d   : > { %7336 = vmatpush3.bf16.msra.mxu0 %v8874_v56 }
 0x31e   : > { %7337 = vmatprep.subr.bf16.mxu0 %v8864_v55 }
 0x320   : > { %7314 = vmatmul.mubr.msk.bf16.gmra.mrb[124].mxu0 %vm1579_vm1, %v7845_v33 }
 0x321   : > { %7338 = vmatpush3.bf16.msra.mxu0 %v8864_v55  ;;  %7341 = vmatprep.mubr.msk.bf16.mxu0 %vm1579_vm1, %v7846_v36  ;;  %v7874_v36 = vld [vmem:[%s9968_s6 + $0x60] sm:$0xff]  }
 0x322   : > { %7339 = vmatprep.subr.bf16.mxu0 %v8868_v4 }
 0x325   : > { %7340 = vmatpush3.bf16.msra.mxu0 %v8868_v4 }
 0x326   : > { %7365 = vmatprep.subr.bf16.mxu0 %v8870_v12 }
 0x328   : > { %7342 = vmatmul.mubr.msk.bf16.vlgmr.msra.gmra.mrb[128].mxu0 %vm1579_vm1, %v7847_v37 }
 0x329   : > { %7366 = vmatpush3.bf16.msra.mxu0 %v8870_v12  ;;  %7345 = vmatprep.mubr.msk.bf16.mxu0 %vm1579_vm1, %v7848_v39 }
 0x32a   : > { %7367 = vmatprep.subr.bf16.mxu0 %v8874_v56 }
 0x32d   : > { %7368 = vmatpush3.bf16.msra.mxu0 %v8874_v56 }
 0x32e   : > { %7369 = vmatprep.subr.bf16.mxu0 %v8864_v55 }
 0x330   : > { %7346 = vmatmul.mubr.msk.bf16.gmra.mrb[132].mxu0 %vm1579_vm1, %v7849_v40 }
 0x331   : > { %7370 = vmatpush3.bf16.msra.mxu0 %v8864_v55  ;;  %7373 = vmatprep.mubr.msk.bf16.mxu0 %vm1579_vm1, %v7850_v43 }
 0x332   : > { %7371 = vmatprep.subr.bf16.mxu0 %v8868_v4 }
 0x335   : > { %7372 = vmatpush3.bf16.msra.mxu0 %v8868_v4 }
 0x336   : > { %7397 = vmatprep.subr.bf16.mxu0 %v8870_v12 }
 0x338   : > { %7374 = vmatmul.mubr.msk.bf16.vlgmr.msra.gmra.mrb[136].mxu0 %vm1579_vm1, %v7851_v45  ;;  %v7875_v45 = vld [vmem:[%s9968_s6 + $0x68] sm:$0xff]  }
 0x339   : > { %7398 = vmatpush3.bf16.msra.mxu0 %v8870_v12  ;;  %7377 = vmatprep.mubr.msk.bf16.mxu0 %vm1579_vm1, %v7852_v46 }
 0x33a   : > { %7399 = vmatprep.subr.bf16.mxu0 %v8874_v56 }
 0x33d   : > { %7400 = vmatpush3.bf16.msra.mxu0 %v8874_v56 }
 0x33e   : > { %7401 = vmatprep.subr.bf16.mxu0 %v8864_v55 }
 0x340   : > { %7378 = vmatmul.mubr.msk.bf16.gmra.mrb[140].mxu0 %vm1579_vm1, %v7853_v48 }
 0x341   : > { %7402 = vmatpush3.bf16.msra.mxu0 %v8864_v55  ;;  %7405 = vmatprep.mubr.msk.bf16.mxu0 %vm1579_vm1, %v7854_v49 }
 0x342   : > { %7403 = vmatprep.subr.bf16.mxu0 %v8868_v4 }
 0x345   : > { %7404 = vmatpush3.bf16.msra.mxu0 %v8868_v4 }
 0x346   : > { %7429 = vmatprep.subr.bf16.mxu0 %v8870_v12 }
 0x348   : > { %7406 = vmatmul.mubr.msk.bf16.vlgmr.msra.gmra.mrb[144].mxu0 %vm1579_vm1, %v7855_v21 }
 0x349   : > { %7430 = vmatpush3.bf16.msra.mxu0 %v8870_v12  ;;  %7409 = vmatprep.mubr.msk.bf16.mxu0 %vm1579_vm1, %v7856_v52  ;;  %v7877_v52 = vld [vmem:[%s9968_s6 + $0x78] sm:$0xff]  }
 0x34a   : > { %7431 = vmatprep.subr.bf16.mxu0 %v8874_v56 }
 0x34d   : > { %7432 = vmatpush3.bf16.msra.mxu0 %v8874_v56 }
 0x34e   : > { %7433 = vmatprep.subr.bf16.mxu0 %v8864_v55 }
 0x350   : > { %7410 = vmatmul.mubr.msk.bf16.gmra.mrb[148].mxu0 %vm1579_vm1, %v7857_v53 }
 0x351   : > { %7434 = vmatpush3.bf16.msra.mxu0 %v8864_v55  ;;  %7437 = vmatprep.mubr.msk.bf16.mxu0 %vm1579_vm1, %v7858_v57  ;;  %v7861_v55 = vld [vmem:[%s9967_s5 + $0x118] sm:$0xff]   ;;  %v7878_v57 = vld [vmem:[%s9968_s6 + $0x80] sm:$0xff]  }
 0x352   : > { %7435 = vmatprep.subr.bf16.mxu0 %v8868_v4 }
 0x355   : > { %7436 = vmatpush3.bf16.msra.mxu0 %v8868_v4 }
 0x358   : > { %7438 = vmatmul.mubr.msk.bf16.vlgmr.msra.gmra.mrb[152].mxu0 %vm1579_vm1, %v7859_v58 }
 0x359   : > { %7441 = vmatprep.mubr.msk.bf16.mxu0 %vm1579_vm1, %v7860_v60 }
 0x360   : > { %7442 = vmatmul.mubr.msk.bf16.gmra.mrb[156].mxu0 %vm1579_vm1, %v7861_v55 }
 0x3ab   : > { %v7183_v61 = vpop.f32.mrb[88].mxu0 }
 0x3ac   : > { %v1626_v62 = vpop.f32.mrb[89].mxu0 }
 0x3ad   : > { %v7184_v63 = vpop.f32.mrb[90].mxu0 }
 0x3ae   : > { %v1658_v0 = vpack.c.bf16 %v7184_v63, %v7183_v61  ;;  %v1629_v1 = vpop.f32.mrb[91].mxu0  ;;  %v7879_v63 = vld [vmem:[%s9968_s6 + $0x88] sm:$0xff]  }
 0x3af   : > { %v1657_v2 = vpack.c.bf16 %v1629_v1, %v1626_v62  ;;  %v7880_v1 = vld [vmem:[%s9968_s6 + $0x90] sm:$0xff]  }
 0x3b3   : > { %v7187_v3 = vpop.f32.mrb[92].mxu0 }
 0x3b4   : > { %v1642_v4 = vpop.f32.mrb[93].mxu0 }
 0x3b5   : > { %v7188_v20 = vpop.f32.mrb[94].mxu0 }
 0x3b6   : > { %v1660_v26 = vpack.c.bf16 %v7188_v20, %v7187_v3  ;;  %v1645_v5 = vpop.f32.mrb[95].mxu0 }
 0x3b7   : > { %v1659_v6 = vpack.c.bf16 %v1645_v5, %v1642_v4  ;;  %v7881_v5 = vld [vmem:[%s9968_s6 + $0x98] sm:$0xff]  }
 0x3bb   : > { %v7199_v8 = vpop.f32.mrb[96].mxu0 }
 0x3bc   : > { %v1744_v9 = vpop.f32.mrb[97].mxu0 }
 0x3bd   : > { %v7200_v12 = vpop.f32.mrb[98].mxu0 }
 0x3be   : > { %v1776_v14 = vpack.c.bf16 %v7200_v12, %v7199_v8  ;;  %v1747_v15 = vpop.f32.mrb[99].mxu0  ;;  %v7882_v8 = vld [vmem:[%s9968_s6 + $0xa0] sm:$0xff]  }
 0x3bf   : > { %v1775_v16 = vpack.c.bf16 %v1747_v15, %v1744_v9 }
 0x3c1   : > { %7213 = vmatprep.mubr.msk.bf16.mxu1 %vm1579_vm1, %v1775_v16 }
 0x3c2   : > { %7214 = vmatmul.mubr.msk.bf16.vlgmr.msra.gmra.mrb[8].mxu1 %vm1579_vm1, %v1776_v14 }
 0x3c3   : > { %v7203_v35 = vpop.f32.mrb[100].mxu0  ;;  %7222 = vmatpush3.bf16.msra.mxu1 %v7866_v50 }
 0x3c4   : > { %v1760_v42 = vpop.f32.mrb[101].mxu0  ;;  %7223 = vmatprep.subr.bf16.mxu1 %v7867_v41 }
 0x3c5   : > { %v7204_v59 = vpop.f32.mrb[102].mxu0 }
 0x3c6   : > { %v1778_v56 = vpack.c.bf16 %v7204_v59, %v7203_v35  ;;  %v1763_v13 = vpop.f32.mrb[103].mxu0 }
 0x3c7   : > { %v1777_v10 = vpack.c.bf16 %v1763_v13, %v1760_v42  ;;  %7224 = vmatpush3.bf16.msra.mxu1 %v7867_v41  ;;  %v7883_v41 = vld [vmem:[%s9968_s6 + $0xa8] sm:$0xff]   ;;  %v7884_v42 = vld [vmem:[%s9968_s6 + $0xb0] sm:$0xff]  }
 0x3c8   : > { %7225 = vmatprep.subr.bf16.mxu1 %v7868_v38 }
 0x3c9   : > { %7217 = vmatprep.mubr.msk.bf16.mxu1 %vm1579_vm1, %v1777_v10 }
 0x3ca   : > { %7218 = vmatmul.mubr.msk.bf16.gmra.mrb[12].mxu1 %vm1579_vm1, %v1778_v56 }
 0x3cb   : > { %7226 = vmatpush3.bf16.msra.mxu1 %v7868_v38  ;;  %7229 = vmatprep.mubr.msk.bf16.mxu1 %vm1579_vm1, %v1657_v2  ;;  %v7247_v34 = vpop.f32.mrb[104].mxu0 }
 0x3cc   : > { %7227 = vmatprep.subr.bf16.mxu1 %v7869_v51  ;;  %v2065_v31 = vpop.f32.mrb[105].mxu0 }
 0x3cd   : > { %v7248_v7 = vpop.f32.mrb[106].mxu0 }
 0x3ce   : > { %v2097_v11 = vpack.c.bf16 %v7248_v7, %v7247_v34  ;;  %v2068_v17 = vpop.f32.mrb[107].mxu0 }
 0x3cf   : > { %7228 = vmatpush3.bf16.msra.mxu1 %v7869_v51  ;;  %v2096_v18 = vpack.c.bf16 %v2068_v17, %v2065_v31  ;;  %v7885_v51 = vld [vmem:[%s9968_s6 + $0xb8] sm:$0xff]  }
 0x3d0   : > { %7253 = vmatprep.subr.bf16.mxu1 %v7870_v54 }
 0x3d2   : > { %7230 = vmatmul.mubr.msk.bf16.vlgmr.msra.gmra.mrb[8].mxu1 %vm1579_vm1, %v1658_v0 }
 0x3d3   : > { %7233 = vmatprep.mubr.msk.bf16.mxu1 %vm1579_vm1, %v1659_v6  ;;  %7254 = vmatpush3.bf16.msra.mxu1 %v7870_v54  ;;  %v7251_v23 = vpop.f32.mrb[108].mxu0  ;;  %v7886_v54 = vld [vmem:[%s9968_s6 + $0xc0] sm:$0xff]  }
 0x3d4   : > { %7255 = vmatprep.subr.bf16.mxu1 %v7871_v22  ;;  %v2081_v25 = vpop.f32.mrb[109].mxu0 }
 0x3d5   : > { %v7252_v27 = vpop.f32.mrb[110].mxu0 }
 0x3d6   : > { %v2099_v28 = vpack.c.bf16 %v7252_v27, %v7251_v23  ;;  %v2084_v29 = vpop.f32.mrb[111].mxu0 }
 0x3d7   : > { %7256 = vmatpush3.bf16.msra.mxu1 %v7871_v22  ;;  %v2098_v30 = vpack.c.bf16 %v2084_v29, %v2081_v25  ;;  %v7887_v22 = vld [vmem:[%s9968_s6 + $0xc8] sm:$0xff]  }
 0x3d8   : > { %7257 = vmatprep.subr.bf16.mxu1 %v7872_v24 }
 0x3da   : > { %7234 = vmatmul.mubr.msk.bf16.gmra.mrb[12].mxu1 %vm1579_vm1, %v1660_v26 }
 0x3db   : > { %7258 = vmatpush3.bf16.msra.mxu1 %v7872_v24  ;;  %7261 = vmatprep.mubr.msk.bf16.mxu1 %vm1579_vm1, %v2096_v18  ;;  %v7279_v33 = vpop.f32.mrb[112].mxu0  ;;  %v7888_v24 = vld [vmem:[%s9968_s6 + $0xd0] sm:$0xff]  }
 0x3dc   : > { %7259 = vmatprep.subr.bf16.mxu1 %v7873_v32  ;;  %v2293_v37 = vpop.f32.mrb[113].mxu0 }
 0x3dd   : > { %v7280_v39 = vpop.f32.mrb[114].mxu0 }
 0x3de   : > { %v2325_v40 = vpack.c.bf16 %v7280_v39, %v7279_v33  ;;  %v2296_v43 = vpop.f32.mrb[115].mxu0 }
 0x3df   : > { %7260 = vmatpush3.bf16.msra.mxu1 %v7873_v32  ;;  %v2324_v44 = vpack.c.bf16 %v2296_v43, %v2293_v37  ;;  %v7889_v32 = vld [vmem:[%s9968_s6 + $0xd8] sm:$0xff]  }
 0x3e0   : > { %7285 = vmatprep.subr.bf16.mxu1 %v7874_v36 }
 0x3e2   : > { %7262 = vmatmul.mubr.msk.bf16.vlgmr.msra.gmra.mrb[8].mxu1 %vm1579_vm1, %v2097_v11 }
 0x3e3   : > { %7286 = vmatpush3.bf16.msra.mxu1 %v7874_v36  ;;  %7265 = vmatprep.mubr.msk.bf16.mxu1 %vm1579_vm1, %v2098_v30  ;;  %v7283_v46 = vpop.f32.mrb[116].mxu0  ;;  %v7890_v36 = vld [vmem:[%s9968_s6 + $0xe0] sm:$0xff]  }
 0x3e4   : > { %7287 = vmatprep.subr.bf16.mxu1 %v7875_v45  ;;  %v2309_v48 = vpop.f32.mrb[117].mxu0 }
 0x3e5   : > { %v7284_v19 = vpop.f32.mrb[118].mxu0 }
 0x3e6   : > { %v2327_v49 = vpack.c.bf16 %v7284_v19, %v7283_v46  ;;  %v2312_v50 = vpop.f32.mrb[119].mxu0 }
 0x3e7   : > { %7288 = vmatpush3.bf16.msra.mxu1 %v7875_v45  ;;  %v2326_v21 = vpack.c.bf16 %v2312_v50, %v2309_v48  ;;  %v7891_v45 = vld [vmem:[%s9968_s6 + $0xe8] sm:$0xff]  }
 0x3e8   : > { %7289 = vmatprep.subr.bf16.mxu1 %v7876_v47 }
 0x3ea   : > { %7266 = vmatmul.mubr.msk.bf16.gmra.mrb[12].mxu1 %vm1579_vm1, %v2099_v28 }
 0x3eb   : > { %7290 = vmatpush3.bf16.msra.mxu1 %v7876_v47  ;;  %7293 = vmatprep.mubr.msk.bf16.mxu1 %vm1579_vm1, %v2324_v44  ;;  %v7311_v53 = vpop.f32.mrb[120].mxu0  ;;  %v7892_v47 = vld [vmem:[%s9968_s6 + $0xf0] sm:$0xff]  }
 0x3ec   : > { %7291 = vmatprep.subr.bf16.mxu1 %v7877_v52  ;;  %v2521_v58 = vpop.f32.mrb[121].mxu0 }
 0x3ed   : > { %v7312_v60 = vpop.f32.mrb[122].mxu0 }
 0x3ee   : > { %v2553_v55 = vpack.c.bf16 %v7312_v60, %v7311_v53  ;;  %v2524_v61 = vpop.f32.mrb[123].mxu0 }
 0x3ef   : > { %7292 = vmatpush3.bf16.msra.mxu1 %v7877_v52  ;;  %v2552_v62 = vpack.c.bf16 %v2524_v61, %v2521_v58  ;;  %v7893_v52 = vld [vmem:[%s9968_s6 + $0xf8] sm:$0xff]  }
 0x3f0   : > { %7317 = vmatprep.subr.bf16.mxu1 %v7878_v57 }
 0x3f2   : > { %7294 = vmatmul.mubr.msk.bf16.vlgmr.msra.gmra.mrb[8].mxu1 %vm1579_vm1, %v2325_v40 }
 0x3f3   : > { %7318 = vmatpush3.bf16.msra.mxu1 %v7878_v57  ;;  %7297 = vmatprep.mubr.msk.bf16.mxu1 %vm1579_vm1, %v2326_v21  ;;  %v7315_v0 = vpop.f32.mrb[124].mxu0  ;;  %v7894_v57 = vld [vmem:[%s9968_s6 + $0x100] sm:$0xff]  }
 0x3f4   : > { %7319 = vmatprep.subr.bf16.mxu1 %v7879_v63  ;;  %v2537_v2 = vpop.f32.mrb[125].mxu0 }
 0x3f5   : > { %v7316_v3 = vpop.f32.mrb[126].mxu0 }
 0x3f6   : > { %v2555_v4 = vpack.c.bf16 %v7316_v3, %v7315_v0  ;;  %v2540_v20 = vpop.f32.mrb[127].mxu0 }
 0x3f7   : > { %7320 = vmatpush3.bf16.msra.mxu1 %v7879_v63  ;;  %v2554_v26 = vpack.c.bf16 %v2540_v20, %v2537_v2  ;;  %v7895_v63 = vld [vmem:[%s9968_s6 + $0x108] sm:$0xff]  }
 0x3f8   : > { %7321 = vmatprep.subr.bf16.mxu1 %v7880_v1 }
 0x3fa   : > { %7298 = vmatmul.mubr.msk.bf16.gmra.mrb[12].mxu1 %vm1579_vm1, %v2327_v49 }
 0x3fb   : > { %7322 = vmatpush3.bf16.msra.mxu1 %v7880_v1  ;;  %7325 = vmatprep.mubr.msk.bf16.mxu1 %vm1579_vm1, %v2552_v62  ;;  %v7343_v6 = vpop.f32.mrb[128].mxu0  ;;  %v7896_v1 = vld [vmem:[%s9968_s6 + $0x110] sm:$0xff]  }
 0x3fc   : > { %7323 = vmatprep.subr.bf16.mxu1 %v7881_v5  ;;  %v2749_v9 = vpop.f32.mrb[129].mxu0 }
 0x3fd   : > { %v7344_v12 = vpop.f32.mrb[130].mxu0 }
 0x3fe   : > { %v2781_v14 = vpack.c.bf16 %v7344_v12, %v7343_v6  ;;  %v2752_v15 = vpop.f32.mrb[131].mxu0  ;;  %v8283_v6 = vmov 0.0   ;;  %v6403_v12 = vld [vmem:[%s9970_s8] ss:$0 sm:$0xff] }
 0x3ff   : > { %7324 = vmatpush3.bf16.msra.mxu1 %v7881_v5  ;;  %v2780_v16 = vpack.c.bf16 %v2752_v15, %v2749_v9  ;;  %v7897_v5 = vld [vmem:[%s9968_s6 + $0x118] sm:$0xff]   ;;  %7461 = vmatprep.subr.bf16.mxu0 %v8283_v6 }
 0x400   : > { %7349 = vmatprep.subr.bf16.mxu1 %v7882_v8  ;;  %7469 = vmatprep.mubr.msk.bf16.mxu0 %vm8284_vm2, %v8283_v6 }
 0x402   : > { %7326 = vmatmul.mubr.msk.bf16.vlgmr.msra.gmra.mrb[8].mxu1 %vm1579_vm1, %v2553_v55 }
 0x403   : > { %7350 = vmatpush3.bf16.msra.mxu1 %v7882_v8  ;;  %7329 = vmatprep.mubr.msk.bf16.mxu1 %vm1579_vm1, %v2554_v26  ;;  %v7347_v35 = vpop.f32.mrb[132].mxu0  ;;  %v6402_v8 = vld [vmem:[%s9969_s7] ss:$0 sm:$0xff] }
 0x404   : > { %7351 = vmatprep.subr.bf16.mxu1 %v7883_v41  ;;  %v2765_v38 = vpop.f32.mrb[133].mxu0 }
 0x405   : > { %v7348_v59 = vpop.f32.mrb[134].mxu0 }
 0x406   : > { %v2783_v56 = vpack.c.bf16 %v7348_v59, %v7347_v35  ;;  %v2768_v13 = vpop.f32.mrb[135].mxu0 }
 0x407   : > { %7352 = vmatpush3.bf16.msra.mxu1 %v7883_v41  ;;  %v2782_v10 = vpack.c.bf16 %v2768_v13, %v2765_v38 }
 0x408   : > { %7353 = vmatprep.subr.bf16.mxu1 %v7884_v42 }
 0x40a   : > { %7330 = vmatmul.mubr.msk.bf16.gmra.mrb[12].mxu1 %vm1579_vm1, %v2555_v4 }
 0x40b   : > { %7354 = vmatpush3.bf16.msra.mxu1 %v7884_v42  ;;  %7357 = vmatprep.mubr.msk.bf16.mxu1 %vm1579_vm1, %v2780_v16  ;;  %v7375_v34 = vpop.f32.mrb[136].mxu0 }
 0x40c   : > { %7355 = vmatprep.subr.bf16.mxu1 %v7885_v51  ;;  %v2977_v31 = vpop.f32.mrb[137].mxu0 }
 0x40d   : > { %v7376_v7 = vpop.f32.mrb[138].mxu0 }
 0x40e   : > { %v3009_v11 = vpack.c.bf16 %v7376_v7, %v7375_v34  ;;  %v2980_v17 = vpop.f32.mrb[139].mxu0 }
 0x40f   : > { %7356 = vmatpush3.bf16.msra.mxu1 %v7885_v51  ;;  %v3008_v18 = vpack.c.bf16 %v2980_v17, %v2977_v31 }
 0x410   : > { %7381 = vmatprep.subr.bf16.mxu1 %v7886_v54 }
 0x412   : > { %7358 = vmatmul.mubr.msk.bf16.vlgmr.msra.gmra.mrb[8].mxu1 %vm1579_vm1, %v2781_v14 }
 0x413   : > { %7382 = vmatpush3.bf16.msra.mxu1 %v7886_v54  ;;  %7361 = vmatprep.mubr.msk.bf16.mxu1 %vm1579_vm1, %v2782_v10  ;;  %v7379_v23 = vpop.f32.mrb[140].mxu0 }
 0x414   : > { %7383 = vmatprep.subr.bf16.mxu1 %v7887_v22  ;;  %v2993_v25 = vpop.f32.mrb[141].mxu0 }
 0x415   : > { %v7380_v27 = vpop.f32.mrb[142].mxu0 }
 0x416   : > { %v3011_v28 = vpack.c.bf16 %v7380_v27, %v7379_v23  ;;  %v2996_v29 = vpop.f32.mrb[143].mxu0 }
 0x417   : > { %7384 = vmatpush3.bf16.msra.mxu1 %v7887_v22  ;;  %v3010_v30 = vpack.c.bf16 %v2996_v29, %v2993_v25 }
 0x418   : > { %7385 = vmatprep.subr.bf16.mxu1 %v7888_v24 }
 0x41a   : > { %7362 = vmatmul.mubr.msk.bf16.gmra.mrb[12].mxu1 %vm1579_vm1, %v2783_v56 }
 0x41b   : > { %7386 = vmatpush3.bf16.msra.mxu1 %v7888_v24  ;;  %7389 = vmatprep.mubr.msk.bf16.mxu1 %vm1579_vm1, %v3008_v18  ;;  %v7407_v33 = vpop.f32.mrb[144].mxu0 }
 0x41c   : > { %7387 = vmatprep.subr.bf16.mxu1 %v7889_v32  ;;  %v3205_v37 = vpop.f32.mrb[145].mxu0 }
 0x41d   : > { %v7408_v39 = vpop.f32.mrb[146].mxu0 }
 0x41e   : > { %v3237_v40 = vpack.c.bf16 %v7408_v39, %v7407_v33  ;;  %v3208_v43 = vpop.f32.mrb[147].mxu0 }
 0x41f   : > { %7388 = vmatpush3.bf16.msra.mxu1 %v7889_v32  ;;  %v3236_v44 = vpack.c.bf16 %v3208_v43, %v3205_v37 }
 0x420   : > { %7413 = vmatprep.subr.bf16.mxu1 %v7890_v36 }
 0x422   : > { %7390 = vmatmul.mubr.msk.bf16.vlgmr.msra.gmra.mrb[8].mxu1 %vm1579_vm1, %v3009_v11 }
 0x423   : > { %7414 = vmatpush3.bf16.msra.mxu1 %v7890_v36  ;;  %7393 = vmatprep.mubr.msk.bf16.mxu1 %vm1579_vm1, %v3010_v30  ;;  %v7411_v46 = vpop.f32.mrb[148].mxu0 }
 0x424   : > { %7415 = vmatprep.subr.bf16.mxu1 %v7891_v45  ;;  %v3221_v48 = vpop.f32.mrb[149].mxu0 }
 0x425   : > { %v7412_v19 = vpop.f32.mrb[150].mxu0 }
 0x426   : > { %v3239_v49 = vpack.c.bf16 %v7412_v19, %v7411_v46  ;;  %v3224_v50 = vpop.f32.mrb[151].mxu0  ;;  %v7900_v46 = vld [vmem:[#allocation2 + $0x10] sm:$0xff]  }
 0x427   : > { %7416 = vmatpush3.bf16.msra.mxu1 %v7891_v45  ;;  %v3238_v21 = vpack.c.bf16 %v3224_v50, %v3221_v48  ;;  %v7898_v45 = vld [vmem:[#allocation2] sm:$0xff]   ;;  %v7901_v48 = vld [vmem:[#allocation2 + $0x18] sm:$0xff]  }
 0x428   : > { %7417 = vmatprep.subr.bf16.mxu1 %v7892_v47 }
 0x42a   : > { %7394 = vmatmul.mubr.msk.bf16.gmra.mrb[12].mxu1 %vm1579_vm1, %v3011_v28 }
 0x42b   : > { %7418 = vmatpush3.bf16.msra.mxu1 %v7892_v47  ;;  %7421 = vmatprep.mubr.msk.bf16.mxu1 %vm1579_vm1, %v3236_v44  ;;  %v7439_v53 = vpop.f32.mrb[152].mxu0  ;;  %v7899_v47 = vld [vmem:[#allocation2 + $0x8] sm:$0xff]  }
 0x42c   : > { %7419 = vmatprep.subr.bf16.mxu1 %v7893_v52  ;;  %v3433_v58 = vpop.f32.mrb[153].mxu0 }
 0x42d   : > { %v7440_v60 = vpop.f32.mrb[154].mxu0 }
 0x42e   : > { %v3465_v55 = vpack.c.bf16 %v7440_v60, %v7439_v53  ;;  %v3436_v61 = vpop.f32.mrb[155].mxu0 }
 0x42f   : > { %7420 = vmatpush3.bf16.msra.mxu1 %v7893_v52  ;;  %v3464_v62 = vpack.c.bf16 %v3436_v61, %v3433_v58 }
 0x430   : > { %7445 = vmatprep.subr.bf16.mxu1 %v7894_v57 }
 0x432   : > { %7422 = vmatmul.mubr.msk.bf16.vlgmr.msra.gmra.mrb[8].mxu1 %vm1579_vm1, %v3237_v40 }
 0x433   : > { %7446 = vmatpush3.bf16.msra.mxu1 %v7894_v57  ;;  %7425 = vmatprep.mubr.msk.bf16.mxu1 %vm1579_vm1, %v3238_v21  ;;  %v7443_v0 = vpop.f32.mrb[156].mxu0 }
 0x434   : > { %7447 = vmatprep.subr.bf16.mxu1 %v7895_v63  ;;  %v3449_v2 = vpop.f32.mrb[157].mxu0 }
 0x435   : > { %v7444_v3 = vpop.f32.mrb[158].mxu0 }
 0x436   : > { %v3467_v4 = vpack.c.bf16 %v7444_v3, %v7443_v0  ;;  %v3452_v20 = vpop.f32.mrb[159].mxu0 }
 0x437   : > { %7448 = vmatpush3.bf16.msra.mxu1 %v7895_v63  ;;  %v3466_v26 = vpack.c.bf16 %v3452_v20, %v3449_v2 }
 0x438   : > { %7449 = vmatprep.subr.bf16.mxu1 %v7896_v1 }
 0x43a   : > { %7426 = vmatmul.mubr.msk.bf16.gmra.mrb[12].mxu1 %vm1579_vm1, %v3239_v49 }
 0x43b   : > { %7450 = vmatpush3.bf16.msra.mxu1 %v7896_v1  ;;  %7453 = vmatprep.mubr.msk.bf16.mxu1 %vm1579_vm1, %v3464_v62 }
 0x43c   : > { %7451 = vmatprep.subr.bf16.mxu1 %v7897_v5 }
 0x43f   : > { %7452 = vmatpush3.bf16.msra.mxu1 %v7897_v5 }
 0x440   : > { %7485 = vmatprep.subr.bf16.mxu1 %v8283_v6 }
 0x442   : > { %7454 = vmatmul.mubr.msk.bf16.vlgmr.msra.gmra.mrb[8].mxu1 %vm1579_vm1, %v3465_v55 }
 0x443   : > { %7457 = vmatprep.mubr.msk.bf16.mxu1 %vm1579_vm1, %v3466_v26 }
 0x44a   : > { %7458 = vmatmul.mubr.msk.bf16.gmra.mrb[12].mxu1 %vm1579_vm1, %v3467_v4 }
 0x44b   : > { %7493 = vmatprep.mubr.msk.bf16.mxu1 %vm8284_vm2, %v8283_v6 }
 0x515   : > { %v7455_v9 = vpop.f32.mrb[8].mxu1 }
 0x516   : > { %v3595_v14 = vmul.f32 %v7455_v9, %v6402_v8  ;;  %v3547_v15 = vpop.f32.mrb[9].mxu1  ;;  %v7912_v9 = vld [vmem:[%s9973_s11 + $0x84] ss:$8 sps:$4 sm:$0xff]  }
 0x517   : > { %v3593_v16 = vmul.f32 %v6402_v8, %v3547_v15  ;;  %v7456_v41 = vpop.f32.mrb[10].mxu1  ;;  %v7906_v15 = vld [vmem:[%s9972_s10] sm:$0xff]  }
 0x518   : > { %v3610_v35 = vadd.f32 %v6403_v12, %v3595_v14  ;;  %v3596_v42 = vmul.f32 %v7456_v41, %v6402_v8  ;;  %v3550_v38 = vpop.f32.mrb[11].mxu1  ;;  %v7902_v14 = vld [vmem:[%s9972_s10 + $0x8] sm:$0xff]   ;;  %v7915_v41 = vld [vmem:[%s9973_s11 + $0x94] ss:$8 sps:$4 sm:$0xff]  }
 0x519   : > { %v3608_v59 = vadd.f32 %v6403_v12, %v3593_v16  ;;  %v3594_v56 = vmul.f32 %v6402_v8, %v3550_v38  ;;  %v7910_v16 = vld [vmem:[%s9973_s11 + $0x80] ss:$8 sps:$4 sm:$0xff]   ;;  %v7903_v38 = vld [vmem:[%s9972_s10 + $0x10] sm:$0xff]  }
 0x51a   : > { %v3611_v13 = vadd.f32 %v6403_v12, %v3596_v42  ;;  %v3618_v51 = vmax.f32 %v3610_v35, 0.0  ;;  %v7913_v35 = vld [vmem:[%s9973_s11 + $0x90] ss:$8 sps:$4 sm:$0xff]   ;;  %v7918_v42 = vld [vmem:[%s9973_s11 + $0xa4] ss:$8 sps:$4 sm:$0xff]  }
 0x51b   : > { %v3609_v10 = vadd.f32 %v6403_v12, %v3594_v56  ;;  %v3616_v54 = vmax.f32 %v3608_v59, 0.0  ;;  %v7916_v59 = vld [vmem:[%s9973_s11 + $0xa0] ss:$8 sps:$4 sm:$0xff]   ;;  %v7921_v56 = vld [vmem:[%s9973_s11 + $0xb4] ss:$8 sps:$4 sm:$0xff]  }
 0x51c   : > { %v3619_v34 = vmax.f32 %v3611_v13, 0.0  ;;  %v7919_v13 = vld [vmem:[%s9973_s11 + $0xb0] ss:$8 sps:$4 sm:$0xff]  }
 0x51d   : > { %v3617_v31 = vmax.f32 %v3609_v10, 0.0  ;;  %v7459_v7 = vpop.f32.mrb[12].mxu1  ;;  %v7924_v10 = vld [vmem:[%s9973_s11 + $0xc4] ss:$8 sps:$4 sm:$0xff]  }
 0x51e   : > { %v3625_v11 = vpack.c.bf16 %v3619_v34, %v3618_v51  ;;  %v3599_v17 = vmul.f32 %v7459_v7, %v6402_v8  ;;  %v3563_v18 = vpop.f32.mrb[13].mxu1  ;;  %v7904_v51 = vld [vmem:[%s9972_s10 + $0x18] sm:$0xff]   ;;  %v7922_v34 = vld [vmem:[%s9973_s11 + $0xc0] ss:$8 sps:$4 sm:$0xff]   ;;  %v7930_v7 = vld [vmem:[%s9973_s11 + $0xe4] ss:$8 sps:$4 sm:$0xff]  }
 0x51f   : > { %v3624_v22 = vpack.c.bf16 %v3617_v31, %v3616_v54  ;;  %v3597_v23 = vmul.f32 %v6402_v8, %v3563_v18  ;;  %v7460_v24 = vpop.f32.mrb[14].mxu1  ;;  %v7927_v54 = vld [vmem:[%s9973_s11 + $0xd4] ss:$8 sps:$4 sm:$0xff]   ;;  %v7925_v31 = vld [vmem:[%s9973_s11 + $0xd0] ss:$8 sps:$4 sm:$0xff]   ;;  %v7907_v18 = vld [vmem:[%s9972_s10 + $0x28] sm:$0xff]  }
 0x520   : > { %v3614_v25 = vadd.f32 %v6403_v12, %v3599_v17  ;;  %v3600_v27 = vmul.f32 %v7460_v24, %v6402_v8  ;;  %v3566_v28 = vpop.f32.mrb[15].mxu1  ;;  %v7928_v17 = vld [vmem:[%s9973_s11 + $0xe0] ss:$8 sps:$4 sm:$0xff]   ;;  %v7933_v24 = vld [vmem:[%s9973_s11 + $0xf4] ss:$8 sps:$4 sm:$0xff]  }
 0x521   : > { %v3612_v29 = vadd.f32 %v6403_v12, %v3597_v23  ;;  %v3598_v30 = vmul.f32 %v6402_v8, %v3566_v28  ;;  %7462 = vmatpush3.bf16.msra.mxu0 %v3624_v22  ;;  %7486 = vmatpush3.bf16.msra.mxu1 %v3624_v22  ;;  %v7909_v23 = vld [vmem:[%s9972_s10 + $0x38] sm:$0xff]   ;;  %v8285_v28 = vmov 0  }
 0x522   : > { %v3615_v32 = vadd.f32 %v6403_v12, %v3600_v27  ;;  %7463 = vmatprep.subr.bf16.mxu0 %v8283_v6  ;;  %7487 = vmatprep.subr.bf16.mxu1 %v8283_v6  ;;  %v3622_v36 = vmax.f32 %v3614_v25, 0.0  ;;  %v7931_v25 = vld [vmem:[%s9973_s11 + $0xf0] ss:$8 sps:$4 sm:$0xff]   ;;  %v7936_v27 = vld [vmem:[%s9973_s11 + $0x4] ss:$8 sps:$4 sm:$0xff]  }
 0x523   : > { %v3613_v33 = vadd.f32 %v6403_v12, %v3598_v30  ;;  %v3620_v39 = vmax.f32 %v3612_v29, 0.0  ;;  %v7967_v29 = vld [vmem:[%s9972_s10 + $0x40] sm:$0xff]  }
 0x524   : > { %v3623_v37 = vmax.f32 %v3615_v32, 0.0 }
 0x525   : > { %v3621_v40 = vmax.f32 %v3613_v33, 0.0  ;;  %7464 = vmatpush3.bf16.msra.mxu0 %v3625_v11  ;;  %7488 = vmatpush3.bf16.msra.mxu1 %v3625_v11 }
 0x526   : > { %v3627_v43 = vpack.c.bf16 %v3623_v37, %v3622_v36  ;;  %7465 = vmatprep.subr.bf16.mxu0 %v8283_v6  ;;  %7489 = vmatprep.subr.bf16.mxu1 %v8283_v6 }
 0x527   : > { %v3626_v44 = vpack.c.bf16 %v3621_v40, %v3620_v39  ;;  %v7934_v39 = vld [vmem:[%s9973_s11] ss:$8 sps:$4 sm:$0xff]  }
 0x529   : > { %7466 = vmatpush3.bf16.msra.mxu0 %v3626_v44  ;;  %7490 = vmatpush3.bf16.msra.mxu1 %v3626_v44 }
 0x52a   : > { %7467 = vmatprep.subr.bf16.mxu0 %v8283_v6  ;;  %7491 = vmatprep.subr.bf16.mxu1 %v8283_v6 }
 0x52d   : > { %7468 = vmatpush3.bf16.msra.mxu0 %v3627_v43  ;;  %7492 = vmatpush3.bf16.msra.mxu1 %v3627_v43 }
 0x52e   : > { %7473 = vmatprep.subr.bf16.mxu0 %v8283_v6  ;;  %7509 = vmatprep.subr.bf16.mxu1 %v8283_v6 }
 0x530   : > { %7470 = vmatmul.mubr.msk.bf16.vlgmr.msra.gmra.mrb[160].mxu0 %vm1579_vm1, %v7898_v45  ;;  %7494 = vmatmul.mubr.msk.bf16.vlgmr.msra.gmra.mrb[16].mxu1 %vm1579_vm1, %v7900_v46 }
 0x531   : > { %7474 = vmatpush3.bf16.msra.mxu0 %v3624_v22  ;;  %7481 = vmatprep.mubr.msk.bf16.mxu0 %vm8284_vm2, %v8283_v6 }
 0x532   : > { %7475 = vmatprep.subr.bf16.mxu0 %v8283_v6  ;;  %7511 = vmatprep.mubr.msk.bf16.mxu1 %vm8284_vm2, %v8283_v6 }
 0x535   : > { %7476 = vmatpush3.bf16.msra.mxu0 %v3625_v11 }
 0x536   : > { %7477 = vmatprep.subr.bf16.mxu0 %v8283_v6 }
 0x539   : > { %7478 = vmatpush3.bf16.msra.mxu0 %v3626_v44 }
 0x53a   : > { %7479 = vmatprep.subr.bf16.mxu0 %v8283_v6 }
 0x53d   : > { %7480 = vmatpush3.bf16.msra.mxu0 %v3627_v43 }
 0x53e   : > { %7497 = vmatprep.subr.bf16.mxu0 %v8283_v6 }
 0x540   : > { %7482 = vmatmul.mubr.msk.bf16.vlgmr.msra.gmra.mrb[164].mxu0 %vm1579_vm1, %v7899_v47 }
 0x541   : > { %7498 = vmatpush3.bf16.msra.mxu0 %v3624_v22  ;;  %7505 = vmatprep.mubr.msk.bf16.mxu0 %vm8284_vm2, %v8283_v6  ;;  %v7908_v22 = vld [vmem:[%s9972_s10 + $0x30] sm:$0xff]  }
 0x542   : > { %7499 = vmatprep.subr.bf16.mxu0 %v8283_v6 }
 0x545   : > { %7500 = vmatpush3.bf16.msra.mxu0 %v3625_v11  ;;  %v7905_v11 = vld [vmem:[%s9972_s10 + $0x20] sm:$0xff]  }
 0x546   : > { %7501 = vmatprep.subr.bf16.mxu0 %v8283_v6 }
 0x549   : > { %7502 = vmatpush3.bf16.msra.mxu0 %v3626_v44  ;;  %v7939_v44 = vld [vmem:[%s9973_s11 + $0x14] ss:$8 sps:$4 sm:$0xff]  }
 0x54a   : > { %7503 = vmatprep.subr.bf16.mxu0 %v8283_v6 }
 0x54d   : > { %7504 = vmatpush3.bf16.msra.mxu0 %v3627_v43 }
 0x54e   : > { %7515 = vmatprep.subr.bf16.mxu0 %v8283_v6 }
 0x550   : > { %7506 = vmatmul.mubr.msk.bf16.vlgmr.msra.gmra.mrb[168].mxu0 %vm1579_vm1, %v7901_v48  ;;  %v7937_v48 = vld [vmem:[%s9973_s11 + $0x10] ss:$8 sps:$4 sm:$0xff]  }
 0x551   : > { %7517 = vmatprep.mubr.msk.bf16.mxu0 %vm8284_vm2, %v8283_v6 }
 0x603   : > { %v3672_v19 = vpop.f32.mrb[160].mxu0  ;;  %v3778_v49 = vpop.f32.mrb[16].mxu1 }
 0x604   : > { %v7471_v50 = vpop.f32.mrb[161].mxu0  ;;  %v7495_v21 = vpop.f32.mrb[17].mxu1 }
 0x605   : > { %v3675_v52 = vpop.f32.mrb[162].mxu0  ;;  %v3781_v53 = vpop.f32.mrb[18].mxu1  ;;  %v7940_v21 = vld [vmem:[%s9973_s11 + $0x20] ss:$8 sps:$4 sm:$0xff]  }
 0x606   : > { %v7472_v57 = vpop.f32.mrb[163].mxu0  ;;  %v7496_v58 = vpop.f32.mrb[19].mxu1 }
 0x613   : > { %v3724_v60 = vpop.f32.mrb[164].mxu0 }
 0x614   : > { %v3731_v55 = vmax.f32 %v3672_v19, %v3724_v60  ;;  %v7483_v61 = vpop.f32.mrb[165].mxu0  ;;  %v7942_v19 = vld [vmem:[%s9973_s11 + $0x24] ss:$8 sps:$4 sm:$0xff]   ;;  %v7943_v60 = vld [vmem:[%s9973_s11 + $0x30] ss:$8 sps:$4 sm:$0xff]  }
 0x615   : > { %v3727_v62 = vpop.f32.mrb[166].mxu0 }
 0x616   : > { %v3732_v63 = vmax.f32 %v3675_v52, %v3727_v62  ;;  %v3785_v0 = vmax.f32 %v3731_v55, %v3778_v49  ;;  %v7484_v1 = vpop.f32.mrb[167].mxu0  ;;  %v7948_v55 = vld [vmem:[%s9973_s11 + $0x44] ss:$8 sps:$4 sm:$0xff]  }
 0x617   : > { %v7951_v1 = vld [vmem:[%s9973_s11 + $0x54] ss:$8 sps:$4 sm:$0xff]  }
 0x618   : > { %v3786_v2 = vmax.f32 %v3732_v63, %v3781_v53  ;;  %v7945_v53 = vld [vmem:[%s9973_s11 + $0x34] ss:$8 sps:$4 sm:$0xff]   ;;  %v7946_v63 = vld [vmem:[%s9973_s11 + $0x40] ss:$8 sps:$4 sm:$0xff]  }
 0x623   : > { %v3832_v3 = vpop.f32.mrb[168].mxu0 }
 0x624   : > { %v3839_v4 = vmax.f32 %v3785_v0, %v3832_v3  ;;  %v7507_v20 = vpop.f32.mrb[169].mxu0 }
 0x625   : > { %v3835_v26 = vpop.f32.mrb[170].mxu0  ;;  %v7954_v20 = vld [vmem:[%s9973_s11 + $0x64] ss:$8 sps:$4 sm:$0xff]  }
 0x626   : > { %v3840_v5 = vmax.f32 %v3786_v2, %v3835_v26  ;;  %v7508_v8 = vpop.f32.mrb[171].mxu0 }
 0x627   : > { %v7952_v8 = vld [vmem:[%s9973_s11 + $0x60] ss:$8 sps:$4 sm:$0xff]  }
 0x628   : > { %v9273_v12 = vpack.c.bf16 %v3840_v5, %v3839_v4  ;;  %v7949_v4 = vld [vmem:[%s9973_s11 + $0x50] ss:$8 sps:$4 sm:$0xff]  }
 0x62a   : > { %7510 = vmatpush3.bf16.msra.mxu1 %v9273_v12  ;;  %7516 = vmatpush3.bf16.msra.mxu0 %v9273_v12 }
 0x62b   : > { %7521 = vmatprep.subr.bf16.mxu0 %v8283_v6  ;;  %4061 = vmatprep.subr.bf16.mxu1 %v7912_v9 }
 0x62d   : > { %7518 = vmatmul.mubr.msk.bf16.vlgmr.msra.gmra.mrb[172].mxu0 %vm3849_vm3, %v7902_v14  ;;  %7512 = vmatmul.mubr.msk.bf16.vlgmr.msra.gmra.mrb[20].mxu1 %vm3849_vm3, %v7906_v15 }
 0x62e   : > { %7522 = vmatpush3.bf16.msra.mxu0 %v9273_v12  ;;  %7523 = vmatprep.mubr.msk.bf16.mxu0 %vm8284_vm2, %v8283_v6 }
 0x62f   : > { %7527 = vmatprep.subr.bf16.mxu0 %v8283_v6  ;;  %4062 = vmatpush1.bf16.msra.mxu1 %v7910_v16  ;;  %v7955_v16 = vld [vmem:[%s9973_s11 + $0x70] ss:$8 sps:$4 sm:$0xff]  }
 0x630   : > { %4063 = vmatprep.subr.bf16.mxu1 %v7915_v41  ;;  %4093 = vmatprep.mubr.bf16.mxu1 %v8285_v28  ;;  %v7960_v41 = vld [vmem:[%s9973_s11 + $0x104] ss:$8 sps:$4 sm:$0xff]  }
 0x633   : > { %4064 = vmatpush1.bf16.msra.mxu1 %v7913_v35 }
 0x634   : > { %4065 = vmatprep.subr.bf16.mxu1 %v7918_v42 }
 0x635   : > { %7524 = vmatmul.mubr.msk.bf16.vlgmr.msra.gmra.mrb[176].mxu0 %vm3849_vm3, %v7903_v38  ;;  %v7958_v38 = vld [vmem:[%s9973_s11 + $0x100] ss:$8 sps:$4 sm:$0xff]  }
 0x636   : > { %7528 = vmatpush3.bf16.msra.mxu0 %v9273_v12  ;;  %7529 = vmatprep.mubr.msk.bf16.mxu0 %vm8284_vm2, %v8283_v6 }
 0x637   : > { %7533 = vmatprep.subr.bf16.mxu0 %v8283_v6  ;;  %4066 = vmatpush1.bf16.msra.mxu1 %v7916_v59 }
 0x638   : > { %4067 = vmatprep.subr.bf16.mxu1 %v7921_v56  ;;  %v7963_v56 = vld [vmem:[%s9973_s11 + $0x114] ss:$8 sps:$4 sm:$0xff]  }
 0x63b   : > { %4068 = vmatpush1.bf16.msra.mxu1 %v7919_v13 }
 0x63c   : > { %4069 = vmatprep.subr.bf16.mxu1 %v7924_v10 }
 0x63d   : > { %7530 = vmatmul.mubr.msk.bf16.vlgmr.msra.gmra.mrb[180].mxu0 %vm3849_vm3, %v7904_v51  ;;  %v7961_v51 = vld [vmem:[%s9973_s11 + $0x110] ss:$8 sps:$4 sm:$0xff]  }
 0x63e   : > { %7534 = vmatpush3.bf16.msra.mxu0 %v9273_v12  ;;  %7535 = vmatprep.mubr.msk.bf16.mxu0 %vm8284_vm2, %v8283_v6 }
 0x63f   : > { %7539 = vmatprep.subr.bf16.mxu0 %v8283_v6  ;;  %4070 = vmatpush1.bf16.msra.mxu1 %v7922_v34  ;;  %v7966_v34 = vld [vmem:[%s9973_s11 + $0x124] ss:$8 sps:$4 sm:$0xff]  }
 0x640   : > { %4071 = vmatprep.subr.bf16.mxu1 %v7927_v54  ;;  %v7964_v54 = vld [vmem:[%s9973_s11 + $0x120] ss:$8 sps:$4 sm:$0xff]  }
 0x643   : > { %4072 = vmatpush1.bf16.msra.mxu1 %v7925_v31  ;;  %v7970_v31 = vld [vmem:[%s9973_s11 + $0x134] ss:$8 sps:$4 sm:$0xff]  }
 0x644   : > { %4073 = vmatprep.subr.bf16.mxu1 %v7930_v7  ;;  %v7968_v7 = vld [vmem:[%s9973_s11 + $0x130] ss:$8 sps:$4 sm:$0xff]  }
 0x645   : > { %7536 = vmatmul.mubr.msk.bf16.vlgmr.msra.gmra.mrb[184].mxu0 %vm3849_vm3, %v7905_v11  ;;  %v7973_v11 = vld [vmem:[%s9973_s11 + $0x144] ss:$8 sps:$4 sm:$0xff]  }
 0x646   : > { %7540 = vmatpush3.bf16.msra.mxu0 %v9273_v12  ;;  %7541 = vmatprep.mubr.msk.bf16.mxu0 %vm8284_vm2, %v8283_v6 }
 0x647   : > { %7545 = vmatprep.subr.bf16.mxu0 %v8283_v6  ;;  %4074 = vmatpush1.bf16.msra.mxu1 %v7928_v17  ;;  %v7971_v17 = vld [vmem:[%s9973_s11 + $0x140] ss:$8 sps:$4 sm:$0xff]  }
 0x648   : > { %4075 = vmatprep.subr.bf16.mxu1 %v7933_v24  ;;  %v7977_v24 = vld [vmem:[%s9973_s11 + $0x160] ss:$8 sps:$4 sm:$0xff]  }
 0x64b   : > { %4076 = vmatpush1.bf16.msra.mxu1 %v7931_v25  ;;  %v7982_v25 = vld [vmem:[%s9973_s11 + $0x174] ss:$8 sps:$4 sm:$0xff]  }
 0x64c   : > { %4184 = vmatprep.subr.bf16.mxu1 %v7936_v27  ;;  %v7980_v27 = vld [vmem:[%s9973_s11 + $0x170] ss:$8 sps:$4 sm:$0xff]  }
 0x64d   : > { %7542 = vmatmul.mubr.msk.bf16.vlgmr.msra.gmra.mrb[188].mxu0 %vm3849_vm3, %v7907_v18  ;;  %v7976_v18 = vld [vmem:[%s9973_s11 + $0x154] ss:$8 sps:$4 sm:$0xff]  }
 0x64e   : > { %7546 = vmatpush3.bf16.msra.mxu0 %v9273_v12  ;;  %7547 = vmatprep.mubr.msk.bf16.mxu0 %vm8284_vm2, %v8283_v6 }
 0x64f   : > { %7551 = vmatprep.subr.bf16.mxu0 %v8283_v6 }
 0x655   : > { %7548 = vmatmul.mubr.msk.bf16.vlgmr.msra.gmra.mrb[192].mxu0 %vm3849_vm3, %v7908_v22  ;;  %v7974_v22 = vld [vmem:[%s9973_s11 + $0x150] ss:$8 sps:$4 sm:$0xff]  }
 0x656   : > { %7552 = vmatpush3.bf16.msra.mxu0 %v9273_v12  ;;  %7553 = vmatprep.mubr.msk.bf16.mxu0 %vm8284_vm2, %v8283_v6 }
 0x657   : > { %7557 = vmatprep.subr.bf16.mxu0 %v8283_v6 }
 0x65d   : > { %7554 = vmatmul.mubr.msk.bf16.vlgmr.msra.gmra.mrb[196].mxu0 %vm3849_vm3, %v7909_v23  ;;  %v7979_v23 = vld [vmem:[%s9973_s11 + $0x164] ss:$8 sps:$4 sm:$0xff]  }
 0x65e   : > { %7558 = vmatpush3.bf16.msra.mxu0 %v9273_v12  ;;  %7559 = vmatprep.mubr.msk.bf16.mxu0 %vm8284_vm2, %v8283_v6  ;;  %v7957_v12 = vld [vmem:[%s9973_s11 + $0x74] ss:$8 sps:$4 sm:$0xff]  }
 0x665   : > { %7560 = vmatmul.mubr.msk.bf16.vlgmr.msra.gmra.mrb[200].mxu0 %vm3849_vm3, %v7967_v29 }
 0x700   : > { %v3956_v30 = vpop.f32.mrb[172].mxu0  ;;  %v9390_v32 = vpop.f32.mrb[20].mxu1 }
 0x701   : > { %v7519_v33 = vpop.f32.mrb[173].mxu0  ;;  %v7513_v36 = vpop.f32.mrb[21].mxu1 }
 0x702   : > { %v3959_v37 = vpop.f32.mrb[174].mxu0  ;;  %v3890_v40 = vpop.f32.mrb[22].mxu1 }
 0x703   : > { %v3963_v43 = vpack.c.bf16 %v3959_v37, %v3956_v30  ;;  %v7520_v45 = vpop.f32.mrb[175].mxu0  ;;  %v3894_v46 = vpack.c.bf16 %v3890_v40, %v9390_v32  ;;  %v7514_v47 = vpop.f32.mrb[23].mxu1  ;;  %v7985_v30 = vld [vmem:[%s9973_s11 + $0x184] ss:$8 sps:$4 sm:$0xff]   ;;  %v7983_v37 = vld [vmem:[%s9973_s11 + $0x180] ss:$8 sps:$4 sm:$0xff]  }
 0x704   : > { %v7988_v40 = vld [vmem:[%s9973_s11 + $0x194] ss:$8 sps:$4 sm:$0xff]   ;;  %v7989_v45 = vld [vmem:[%s9973_s11 + $0x1a0] ss:$8 sps:$4 sm:$0xff]   ;;  %v7992_v47 = vld [vmem:[%s9973_s11 + $0x1b0] ss:$8 sps:$4 sm:$0xff]  }
 0x705   : > { %4094 = vmatmul.mubr.bf16.vlgmr.msra.gmra.mrb[24].mxu1 %v3963_v43  ;;  %v7986_v43 = vld [vmem:[%s9973_s11 + $0x190] ss:$8 sps:$4 sm:$0xff]  }
 0x706   : > { %4185 = vmatpush1.bf16.msra.mxu1 %v7934_v39  ;;  %4216 = vmatprep.mubr.bf16.mxu1 %v8285_v28 }
 0x707   : > { %4186 = vmatprep.subr.bf16.mxu1 %v7939_v44  ;;  %v7991_v44 = vld [vmem:[%s9973_s11 + $0x1a4] ss:$8 sps:$4 sm:$0xff]  }
 0x708   : > { %v9406_v49 = vpop.f32.mrb[176].mxu0 }
 0x709   : > { %v7525_v50 = vpop.f32.mrb[177].mxu0 }
 0x70a   : > { %4187 = vmatpush1.bf16.msra.mxu1 %v7937_v48  ;;  %v9411_v52 = vpop.f32.mrb[178].mxu0  ;;  %v7997_v48 = vld [vmem:[%s9973_s11 + $0x1c4] ss:$8 sps:$4 sm:$0xff]   ;;  %v7998_v50 = vld [vmem:[%s9973_s11 + $0x1d0] ss:$8 sps:$4 sm:$0xff]  }
 0x70b   : > { %4188 = vmatprep.subr.bf16.mxu1 %v7942_v19  ;;  %v4279_v57 = vpack.c.bf16 %v9411_v52, %v9406_v49  ;;  %v7526_v58 = vpop.f32.mrb[179].mxu0  ;;  %v7995_v19 = vld [vmem:[%s9973_s11 + $0x1c0] ss:$8 sps:$4 sm:$0xff]   ;;  %v8000_v49 = vld [vmem:[%s9973_s11 + $0x1d4] ss:$8 sps:$4 sm:$0xff]  }
 0x70c   : > { %v8001_v52 = vld [vmem:[%s9973_s11 + $0x1e0] ss:$8 sps:$4 sm:$0xff]  }
 0x70e   : > { %4189 = vmatpush1.bf16.msra.mxu1 %v7940_v21  ;;  %v8003_v21 = vld [vmem:[%s9973_s11 + $0x1e4] ss:$8 sps:$4 sm:$0xff]  }
 0x70f   : > { %4190 = vmatprep.subr.bf16.mxu1 %v7945_v53  ;;  %v8006_v53 = vld [vmem:[%s9973_s11 + $0x1f4] ss:$8 sps:$4 sm:$0xff]  }
 0x710   : > { %v9424_v61 = vpop.f32.mrb[180].mxu0 }
 0x711   : > { %v7531_v62 = vpop.f32.mrb[181].mxu0 }
 0x712   : > { %4191 = vmatpush1.bf16.msra.mxu1 %v7943_v60  ;;  %v9429_v0 = vpop.f32.mrb[182].mxu0  ;;  %v8009_v60 = vld [vmem:[%s9973_s11 + $0x204] ss:$8 sps:$4 sm:$0xff]  }
 0x713   : > { %4192 = vmatprep.subr.bf16.mxu1 %v7948_v55  ;;  %v4476_v2 = vpack.c.bf16 %v9429_v0, %v9424_v61  ;;  %v7532_v3 = vpop.f32.mrb[183].mxu0  ;;  %v8018_v61 = vld [vmem:[%s9973_s11 + $0x234] ss:$8 sps:$4 sm:$0xff]   ;;  %v8016_v0 = vld [vmem:[%s9973_s11 + $0x230] ss:$8 sps:$4 sm:$0xff]  }
 0x716   : > { %4193 = vmatpush1.bf16.msra.mxu1 %v7946_v63 }
 0x717   : > { %4194 = vmatprep.subr.bf16.mxu1 %v7951_v1  ;;  %v8007_v1 = vld [vmem:[%s9973_s11 + $0x200] ss:$8 sps:$4 sm:$0xff]  }
 0x718   : > { %v9442_v26 = vpop.f32.mrb[184].mxu0 }
 0x719   : > { %v7537_v5 = vpop.f32.mrb[185].mxu0 }
 0x71a   : > { %4195 = vmatpush1.bf16.msra.mxu1 %v7949_v4  ;;  %v9447_v9 = vpop.f32.mrb[186].mxu0  ;;  %v8012_v4 = vld [vmem:[%s9973_s11 + $0x214] ss:$8 sps:$4 sm:$0xff]   ;;  %v8015_v5 = vld [vmem:[%s9973_s11 + $0x224] ss:$8 sps:$4 sm:$0xff]  }
 0x71b   : > { %4196 = vmatprep.subr.bf16.mxu1 %v7954_v20  ;;  %v4673_v14 = vpack.c.bf16 %v9447_v9, %v9442_v26  ;;  %v7538_v15 = vpop.f32.mrb[187].mxu0  ;;  %v8010_v20 = vld [vmem:[%s9973_s11 + $0x210] ss:$8 sps:$4 sm:$0xff]   ;;  %v8039_v26 = vld [vmem:[%s9973_s11 + $0x2a4] ss:$8 sps:$4 sm:$0xff]  }
 0x71c   : > { %v8024_v15 = vld [vmem:[%s9973_s11 + $0x254] ss:$8 sps:$4 sm:$0xff]   ;;  %v8037_v9 = vld [vmem:[%s9973_s11 + $0x2a0] ss:$8 sps:$4 sm:$0xff]  }
 0x71e   : > { %4197 = vmatpush1.bf16.msra.mxu1 %v7952_v8  ;;  %v8013_v8 = vld [vmem:[%s9973_s11 + $0x220] ss:$8 sps:$4 sm:$0xff]  }
 0x71f   : > { %4198 = vmatprep.subr.bf16.mxu1 %v7957_v12  ;;  %v8019_v12 = vld [vmem:[%s9973_s11 + $0x240] ss:$8 sps:$4 sm:$0xff]  }
 0x720   : > { %v9460_v35 = vpop.f32.mrb[188].mxu0 }
 0x721   : > { %v7543_v42 = vpop.f32.mrb[189].mxu0 }
 0x722   : > { %4199 = vmatpush1.bf16.msra.mxu1 %v7955_v16  ;;  %v9465_v59 = vpop.f32.mrb[190].mxu0  ;;  %v8022_v16 = vld [vmem:[%s9973_s11 + $0x250] ss:$8 sps:$4 sm:$0xff]   ;;  %v8025_v42 = vld [vmem:[%s9973_s11 + $0x260] ss:$8 sps:$4 sm:$0xff]  }
 0x723   : > { %4377 = vmatprep.subr.bf16.mxu1 %v7960_v41  ;;  %v4870_v13 = vpack.c.bf16 %v9465_v59, %v9460_v35  ;;  %v7544_v10 = vpop.f32.mrb[191].mxu0  ;;  %v8027_v41 = vld [vmem:[%s9973_s11 + $0x264] ss:$8 sps:$4 sm:$0xff]   ;;  %v8066_v35 = vld [vmem:[%s9973_s11 + $0x334] ss:$8 sps:$4 sm:$0xff]  }
 0x724   : > { %v8028_v10 = vld [vmem:[%s9973_s11 + $0x270] ss:$8 sps:$4 sm:$0xff]  }
 0x725   : > { %4217 = vmatmul.mubr.bf16.vlgmr.msra.gmra.mrb[24].mxu1 %v3894_v46  ;;  %v7994_v46 = vld [vmem:[%s9973_s11 + $0x1b4] ss:$8 sps:$4 sm:$0xff]   ;;  %v8064_v59 = vld [vmem:[%s9973_s11 + $0x330] ss:$8 sps:$4 sm:$0xff]  }
 0x726   : > { %4378 = vmatpush1.bf16.msra.mxu1 %v7958_v38  ;;  %4409 = vmatprep.mubr.bf16.mxu1 %v8285_v28  ;;  %v8030_v38 = vld [vmem:[%s9973_s11 + $0x274] ss:$8 sps:$4 sm:$0xff]  }
 0x727   : > { %4379 = vmatprep.subr.bf16.mxu1 %v7963_v56 }
 0x728   : > { %v9512_v29 = vpop.f32.mrb[192].mxu0 }
 0x729   : > { %v7549_v32 = vpop.f32.mrb[193].mxu0 }
 0x72a   : > { %4380 = vmatpush1.bf16.msra.mxu1 %v7961_v51  ;;  %v9517_v33 = vpop.f32.mrb[194].mxu0  ;;  %v8046_v32 = vld [vmem:[%s9973_s11 + $0x2d0] ss:$8 sps:$4 sm:$0xff]  }
 0x72b   : > { %4381 = vmatprep.subr.bf16.mxu1 %v7966_v34  ;;  %v7550_v36 = vpop.f32.mrb[195].mxu0  ;;  %v5067_v39 = vpack.c.bf16 %v9517_v33, %v9512_v29  ;;  %v8033_v34 = vld [vmem:[%s9973_s11 + $0x284] ss:$8 sps:$4 sm:$0xff]   ;;  %v8090_v29 = vld [vmem:[%s9973_s11 + $0x3b4] ss:$8 sps:$4 sm:$0xff]  }
 0x72c   : > { %v8051_v36 = vld [vmem:[%s9973_s11 + $0x2e4] ss:$8 sps:$4 sm:$0xff]   ;;  %v8088_v33 = vld [vmem:[%s9973_s11 + $0x3b0] ss:$8 sps:$4 sm:$0xff]  }
 0x72e   : > { %4382 = vmatpush1.bf16.msra.mxu1 %v7964_v54 }
 0x72f   : > { %4383 = vmatprep.subr.bf16.mxu1 %v7970_v31 }
 0x730   : > { %v9570_v58 = vpop.f32.mrb[196].mxu0 }
 0x731   : > { %v7555_v55 = vpop.f32.mrb[197].mxu0 }
 0x732   : > { %4384 = vmatpush1.bf16.msra.mxu1 %v7968_v7  ;;  %v9575_v62 = vpop.f32.mrb[198].mxu0  ;;  %v8081_v55 = vld [vmem:[%s9973_s11 + $0x384] ss:$8 sps:$4 sm:$0xff]  }
 0x733   : > { %4385 = vmatprep.subr.bf16.mxu1 %v7973_v11  ;;  %v7556_v63 = vpop.f32.mrb[199].mxu0  ;;  %v5264_v3 = vpack.c.bf16 %v9575_v62, %v9570_v58  ;;  %v8031_v11 = vld [vmem:[%s9973_s11 + $0x280] ss:$8 sps:$4 sm:$0xff]   ;;  %v8114_v58 = vld [vmem:[%s9973_s11 + $0x434] ss:$8 sps:$4 sm:$0xff]  }
 0x734   : > { %v8079_v63 = vld [vmem:[%s9973_s11 + $0x380] ss:$8 sps:$4 sm:$0xff]   ;;  %v8117_v62 = vld [vmem:[%s9973_s11 + $0x444] ss:$8 sps:$4 sm:$0xff]  }
 0x736   : > { %4386 = vmatpush1.bf16.msra.mxu1 %v7971_v17  ;;  %v8036_v17 = vld [vmem:[%s9973_s11 + $0x294] ss:$8 sps:$4 sm:$0xff]  }
 0x737   : > { %4387 = vmatprep.subr.bf16.mxu1 %v7976_v18  ;;  %v8127_v18 = vld [vmem:[%s9976_s14 + $0x40] sm:$0xff]  }
 0x738   : > { %v9625_v56 = vpop.f32.mrb[200].mxu0  ;;  %7106 = vmatprep.subr.bf16.mxu0 %v8127_v18  ;;  %v8121_v18 = vld [vmem:[%s9973_s11 + $0x460] ss:$8 sps:$4 sm:$0xff]  }
 0x739   : > { %v7561_v51 = vpop.f32.mrb[201].mxu0 }
 0x73a   : > { %4388 = vmatpush1.bf16.msra.mxu1 %v7974_v22  ;;  %v9633_v54 = vpop.f32.mrb[202].mxu0  ;;  %v8128_v22 = vld [vmem:[%s9976_s14] sm:$0xff]  }
 0x73b   : > { %4389 = vmatprep.subr.bf16.mxu1 %v7979_v23  ;;  %v5461_v31 = vpack.c.bf16 %v9633_v54, %v9625_v56  ;;  %v7562_v7 = vpop.f32.mrb[203].mxu0  ;;  %v8034_v23 = vld [vmem:[%s9973_s11 + $0x290] ss:$8 sps:$4 sm:$0xff]   ;;  %7107 = vmatpush3.bf16.msra.mxu0 %v8128_v22  ;;  %v8111_v51 = vld [vmem:[%s9973_s11 + $0x424] ss:$8 sps:$4 sm:$0xff]  }
 0x73c   : > { %v8120_v7 = vld [vmem:[%s9973_s11 + $0x454] ss:$8 sps:$4 sm:$0xff]  }
 0x73d   : > { %v8126_v22 = vld [vmem:[%s9973_s11 + $0x474] ss:$8 sps:$4 sm:$0xff]  }
 0x73e   : > { %4390 = vmatpush1.bf16.msra.mxu1 %v7977_v24  ;;  %v8040_v24 = vld [vmem:[%s9973_s11 + $0x2b0] ss:$8 sps:$4 sm:$0xff]  }
 0x73f   : > { %4391 = vmatprep.subr.bf16.mxu1 %v7982_v25  ;;  %v8045_v25 = vld [vmem:[%s9973_s11 + $0x2c4] ss:$8 sps:$4 sm:$0xff]   ;;  %v8133_v56 = vld [vmem:[%s9976_s14 + $0x58] sm:$0xff]  }
 0x740   : > { %v8134_v54 = vld [vmem:[%s9976_s14 + $0x18] sm:$0xff]  }
 0x742   : > { %4392 = vmatpush1.bf16.msra.mxu1 %v7980_v27  ;;  %v8043_v27 = vld [vmem:[%s9973_s11 + $0x2c0] ss:$8 sps:$4 sm:$0xff]  }
 0x743   : > { %4574 = vmatprep.subr.bf16.mxu1 %v7985_v30  ;;  %v8048_v30 = vld [vmem:[%s9973_s11 + $0x2d4] ss:$8 sps:$4 sm:$0xff]  }
 0x745   : > { %4410 = vmatmul.mubr.bf16.vlgmr.msra.gmra.mrb[24].mxu1 %v4279_v57  ;;  %v8004_v57 = vld [vmem:[%s9973_s11 + $0x1f0] ss:$8 sps:$4 sm:$0xff]  }
 0x746   : > { %4575 = vmatpush1.bf16.msra.mxu1 %v7983_v37  ;;  %4606 = vmatprep.mubr.bf16.mxu1 %v8285_v28  ;;  %v8049_v37 = vld [vmem:[%s9973_s11 + $0x2e0] ss:$8 sps:$4 sm:$0xff]  }
 0x747   : > { %4576 = vmatprep.subr.bf16.mxu1 %v7988_v40  ;;  %v8054_v40 = vld [vmem:[%s9973_s11 + $0x2f4] ss:$8 sps:$4 sm:$0xff]  }
 0x74a   : > { %4577 = vmatpush1.bf16.msra.mxu1 %v7986_v43  ;;  %v8052_v43 = vld [vmem:[%s9973_s11 + $0x2f0] ss:$8 sps:$4 sm:$0xff]  }
 0x74b   : > { %4578 = vmatprep.subr.bf16.mxu1 %v7991_v44  ;;  %v8057_v44 = vld [vmem:[%s9973_s11 + $0x304] ss:$8 sps:$4 sm:$0xff]  }
 0x74e   : > { %4579 = vmatpush1.bf16.msra.mxu1 %v7989_v45  ;;  %v8055_v45 = vld [vmem:[%s9973_s11 + $0x300] ss:$8 sps:$4 sm:$0xff]  }
 0x74f   : > { %4580 = vmatprep.subr.bf16.mxu1 %v7994_v46  ;;  %v8060_v46 = vld [vmem:[%s9973_s11 + $0x314] ss:$8 sps:$4 sm:$0xff]  }
 0x752   : > { %4581 = vmatpush1.bf16.msra.mxu1 %v7992_v47  ;;  %v8058_v47 = vld [vmem:[%s9973_s11 + $0x310] ss:$8 sps:$4 sm:$0xff]  }
 0x753   : > { %4582 = vmatprep.subr.bf16.mxu1 %v7997_v48  ;;  %v8063_v48 = vld [vmem:[%s9973_s11 + $0x324] ss:$8 sps:$4 sm:$0xff]  }
 0x756   : > { %4583 = vmatpush1.bf16.msra.mxu1 %v7995_v19  ;;  %v8061_v19 = vld [vmem:[%s9973_s11 + $0x320] ss:$8 sps:$4 sm:$0xff]  }
 0x757   : > { %4584 = vmatprep.subr.bf16.mxu1 %v8000_v49  ;;  %v8067_v49 = vld [vmem:[%s9973_s11 + $0x340] ss:$8 sps:$4 sm:$0xff]  }
 0x75a   : > { %4585 = vmatpush1.bf16.msra.mxu1 %v7998_v50  ;;  %v8072_v50 = vld [vmem:[%s9973_s11 + $0x354] ss:$8 sps:$4 sm:$0xff]  }
 0x75b   : > { %4586 = vmatprep.subr.bf16.mxu1 %v8003_v21  ;;  %v8070_v21 = vld [vmem:[%s9973_s11 + $0x350] ss:$8 sps:$4 sm:$0xff]  }
 0x75e   : > { %4587 = vmatpush1.bf16.msra.mxu1 %v8001_v52  ;;  %v8075_v52 = vld [vmem:[%s9973_s11 + $0x364] ss:$8 sps:$4 sm:$0xff]  }
 0x75f   : > { %4588 = vmatprep.subr.bf16.mxu1 %v8006_v53  ;;  %v8073_v53 = vld [vmem:[%s9973_s11 + $0x360] ss:$8 sps:$4 sm:$0xff]  }
 0x762   : > { %4589 = vmatpush1.bf16.msra.mxu1 %v8004_v57  ;;  %v8078_v57 = vld [vmem:[%s9973_s11 + $0x374] ss:$8 sps:$4 sm:$0xff]  }
 0x763   : > { %4771 = vmatprep.subr.bf16.mxu1 %v8009_v60  ;;  %v8076_v60 = vld [vmem:[%s9973_s11 + $0x370] ss:$8 sps:$4 sm:$0xff]  }
 0x765   : > { %4607 = vmatmul.mubr.bf16.vlgmr.msra.gmra.mrb[24].mxu1 %v4476_v2  ;;  %v8021_v2 = vld [vmem:[%s9973_s11 + $0x244] ss:$8 sps:$4 sm:$0xff]  }
 0x766   : > { %4772 = vmatpush1.bf16.msra.mxu1 %v8007_v1  ;;  %4803 = vmatprep.mubr.bf16.mxu1 %v8285_v28  ;;  %v8084_v1 = vld [vmem:[%s9973_s11 + $0x394] ss:$8 sps:$4 sm:$0xff]  }
 0x767   : > { %4773 = vmatprep.subr.bf16.mxu1 %v8012_v4  ;;  %v8082_v4 = vld [vmem:[%s9973_s11 + $0x390] ss:$8 sps:$4 sm:$0xff]  }
 0x76a   : > { %4774 = vmatpush1.bf16.msra.mxu1 %v8010_v20  ;;  %v8087_v20 = vld [vmem:[%s9973_s11 + $0x3a4] ss:$8 sps:$4 sm:$0xff]  }
 0x76b   : > { %4775 = vmatprep.subr.bf16.mxu1 %v8015_v5  ;;  %v8085_v5 = vld [vmem:[%s9973_s11 + $0x3a0] ss:$8 sps:$4 sm:$0xff]  }
 0x76e   : > { %4776 = vmatpush1.bf16.msra.mxu1 %v8013_v8  ;;  %v8091_v8 = vld [vmem:[%s9973_s11 + $0x3c0] ss:$8 sps:$4 sm:$0xff]  }
 0x76f   : > { %4777 = vmatprep.subr.bf16.mxu1 %v8018_v61  ;;  %v8096_v61 = vld [vmem:[%s9973_s11 + $0x3d4] ss:$8 sps:$4 sm:$0xff]  }
 0x772   : > { %4778 = vmatpush1.bf16.msra.mxu1 %v8016_v0  ;;  %v8094_v0 = vld [vmem:[%s9973_s11 + $0x3d0] ss:$8 sps:$4 sm:$0xff]  }
 0x773   : > { %4779 = vmatprep.subr.bf16.mxu1 %v8021_v2  ;;  %v8099_v2 = vld [vmem:[%s9973_s11 + $0x3e4] ss:$8 sps:$4 sm:$0xff]  }
 0x776   : > { %4780 = vmatpush1.bf16.msra.mxu1 %v8019_v12  ;;  %v8097_v12 = vld [vmem:[%s9973_s11 + $0x3e0] ss:$8 sps:$4 sm:$0xff]  }
 0x777   : > { %4781 = vmatprep.subr.bf16.mxu1 %v8024_v15  ;;  %v8102_v15 = vld [vmem:[%s9973_s11 + $0x3f4] ss:$8 sps:$4 sm:$0xff]  }
 0x77a   : > { %4782 = vmatpush1.bf16.msra.mxu1 %v8022_v16  ;;  %v8100_v16 = vld [vmem:[%s9973_s11 + $0x3f0] ss:$8 sps:$4 sm:$0xff]  }
 0x77b   : > { %4783 = vmatprep.subr.bf16.mxu1 %v8027_v41  ;;  %v8105_v41 = vld [vmem:[%s9973_s11 + $0x404] ss:$8 sps:$4 sm:$0xff]  }
 0x77e   : > { %4784 = vmatpush1.bf16.msra.mxu1 %v8025_v42  ;;  %v8103_v42 = vld [vmem:[%s9973_s11 + $0x400] ss:$8 sps:$4 sm:$0xff]  }
 0x77f   : > { %4785 = vmatprep.subr.bf16.mxu1 %v8030_v38  ;;  %v8108_v38 = vld [vmem:[%s9973_s11 + $0x414] ss:$8 sps:$4 sm:$0xff]  }
 0x782   : > { %4786 = vmatpush1.bf16.msra.mxu1 %v8028_v10  ;;  %v8106_v10 = vld [vmem:[%s9973_s11 + $0x410] ss:$8 sps:$4 sm:$0xff]  }
 0x783   : > { %4968 = vmatprep.subr.bf16.mxu1 %v8033_v34  ;;  %v8109_v34 = vld [vmem:[%s9973_s11 + $0x420] ss:$8 sps:$4 sm:$0xff]  }
 0x785   : > { %4804 = vmatmul.mubr.bf16.vlgmr.msra.gmra.mrb[24].mxu1 %v4673_v14  ;;  %v8042_v14 = vld [vmem:[%s9973_s11 + $0x2b4] ss:$8 sps:$4 sm:$0xff]  }
 0x786   : > { %4969 = vmatpush1.bf16.msra.mxu1 %v8031_v11  ;;  %5000 = vmatprep.mubr.bf16.mxu1 %v8285_v28  ;;  %v8118_v11 = vld [vmem:[%s9973_s11 + $0x450] ss:$8 sps:$4 sm:$0xff]  }
 0x787   : > { %4970 = vmatprep.subr.bf16.mxu1 %v8036_v17  ;;  %v8123_v17 = vld [vmem:[%s9973_s11 + $0x464] ss:$8 sps:$4 sm:$0xff]  }
 0x78a   : > { %4971 = vmatpush1.bf16.msra.mxu1 %v8034_v23  ;;  %v8124_v23 = vld [vmem:[%s9973_s11 + $0x470] ss:$8 sps:$4 sm:$0xff]  }
 0x78b   : > { %4972 = vmatprep.subr.bf16.mxu1 %v8039_v26  ;;  %v8129_v26 = vld [vmem:[%s9976_s14 + $0x48] sm:$0xff]  }
 0x78c   : > { %7108 = vmatprep.subr.bf16.mxu0 %v8129_v26  ;;  %v8148_v26 = vld [vmem:[#allocation5 + $0x28] sm:$0xff]  }
 0x78e   : > { %4973 = vmatpush1.bf16.msra.mxu1 %v8037_v9  ;;  %v8130_v9 = vld [vmem:[%s9976_s14 + $0x8] sm:$0xff]  }
 0x78f   : > { %4974 = vmatprep.subr.bf16.mxu1 %v8042_v14  ;;  %7109 = vmatpush3.bf16.msra.mxu0 %v8130_v9  ;;  %v8131_v14 = vld [vmem:[%s9976_s14 + $0x50] sm:$0xff]  }
 0x790   : > { %7110 = vmatprep.subr.bf16.mxu0 %v8131_v14  ;;  %v8149_v9 = vld [vmem:[#allocation5 + $0x30] sm:$0xff]   ;;  %v8150_v14 = vld [vmem:[#allocation5 + $0x38] sm:$0xff]  }
 0x792   : > { %4975 = vmatpush1.bf16.msra.mxu1 %v8040_v24  ;;  %v8132_v24 = vld [vmem:[%s9976_s14 + $0x10] sm:$0xff]  }
 0x793   : > { %4976 = vmatprep.subr.bf16.mxu1 %v8045_v25  ;;  %7111 = vmatpush3.bf16.msra.mxu0 %v8132_v24  ;;  %v8136_v25 = vld [vmem:[%s9976_s14 + $0x20] sm:$0xff]  }
 0x794   : > { %7112 = vmatprep.subr.bf16.mxu0 %v8133_v56  ;;  %v5693_v56 = vld [vmem:[%s9977_s15] sm:$0x1] }
 0x796   : > { %4977 = vmatpush1.bf16.msra.mxu1 %v8043_v27  ;;  %v8137_v27 = vld [vmem:[%s9976_s14 + $0x68] sm:$0xff]  }
 0x797   : > { %4978 = vmatprep.subr.bf16.mxu1 %v8048_v30  ;;  %7113 = vmatpush3.bf16.msra.mxu0 %v8134_v54  ;;  %v8138_v30 = vld [vmem:[%s9976_s14 + $0x28] sm:$0xff]  }
 0x79a   : > { %4979 = vmatpush1.bf16.msra.mxu1 %v8046_v32  ;;  %v8139_v32 = vld [vmem:[%s9976_s14 + $0x70] sm:$0xff]  }
 0x79b   : > { %4980 = vmatprep.subr.bf16.mxu1 %v8051_v36  ;;  %v8140_v36 = vld [vmem:[%s9976_s14 + $0x30] sm:$0xff]  }
 0x79e   : > { %4981 = vmatpush1.bf16.msra.mxu1 %v8049_v37  ;;  %v8141_v37 = vld [vmem:[%s9976_s14 + $0x78] sm:$0xff]  }
 0x79f   : > { %4982 = vmatprep.subr.bf16.mxu1 %v8054_v40  ;;  %v8142_v40 = vld [vmem:[%s9976_s14 + $0x38] sm:$0xff]  }
 0x7a2   : > { %4983 = vmatpush1.bf16.msra.mxu1 %v8052_v43  ;;  %v5608_v43 = vlaneseq }
 0x7a3   : > { %5165 = vmatprep.subr.bf16.mxu1 %v8057_v44 }
 0x7a4   : > { %v5609_v44 = vshrl.u32 %v5608_v43, 7 }
 0x7a5   : > { %5001 = vmatmul.mubr.bf16.vlgmr.msra.gmra.mrb[24].mxu1 %v4870_v13  ;;  %v8069_v13 = vld [vmem:[%s9973_s11 + $0x344] ss:$8 sps:$4 sm:$0xff]  }
 0x7a6   : > { %5166 = vmatpush1.bf16.msra.mxu1 %v8055_v45  ;;  %5197 = vmatprep.mubr.bf16.mxu1 %v8285_v28  ;;  %v5610_v45 = vsub.s32 0, %v5609_v44 }
 0x7a7   : > { %5167 = vmatprep.subr.bf16.mxu1 %v8060_v46  ;;  %v5606_v46 = vld [vmem:[%s9974_s12] sm:$0x3] }
 0x7aa   : > { %5168 = vmatpush1.bf16.msra.mxu1 %v8058_v47  ;;  %v5614_v47 = vsub.s32 1, %v5609_v44 }
 0x7ab   : > { %5169 = vmatprep.subr.bf16.mxu1 %v8063_v48  ;;  %v5622_v48 = vld [vmem:[%s9975_s13] sm:$0x3] }
 0x7ae   : > { %5170 = vmatpush1.bf16.msra.mxu1 %v8061_v19  ;;  %v5611_v19 = vrot.slane %v5606_v46, %v5610_v45 }
 0x7af   : > { %5171 = vmatprep.subr.bf16.mxu1 %v8066_v35  ;;  %v5615_v35 = vrot.slane %v5606_v46, %v5614_v47 }
 0x7b2   : > { %5172 = vmatpush1.bf16.msra.mxu1 %v8064_v59  ;;  %v5627_v59 = vrot.slane %v5622_v48, %v5610_v45 }
 0x7b3   : > { %5173 = vmatprep.subr.bf16.mxu1 %v8069_v13 }
 0x7b6   : > { %5174 = vmatpush1.bf16.msra.mxu1 %v8067_v49  ;;  %v5631_v49 = vrot.slane %v5622_v48, %v5614_v47 }
 0x7b7   : > { %5175 = vmatprep.subr.bf16.mxu1 %v8072_v50 }
 0x7ba   : > { %5176 = vmatpush1.bf16.msra.mxu1 %v8070_v21 }
 0x7bb   : > { %5177 = vmatprep.subr.bf16.mxu1 %v8075_v52 }
 0x7be   : > { %5178 = vmatpush1.bf16.msra.mxu1 %v8073_v53 }
 0x7bf   : > { %5179 = vmatprep.subr.bf16.mxu1 %v8078_v57 }
 0x7c2   : > { %5180 = vmatpush1.bf16.msra.mxu1 %v8076_v60 }
 0x7c3   : > { %5362 = vmatprep.subr.bf16.mxu1 %v8081_v55 }
 0x7c5   : > { %5198 = vmatmul.mubr.bf16.vlgmr.msra.gmra.mrb[24].mxu1 %v5067_v39  ;;  %v8093_v39 = vld [vmem:[%s9973_s11 + $0x3c4] ss:$8 sps:$4 sm:$0xff]  }
 0x7c6   : > { %5363 = vmatpush1.bf16.msra.mxu1 %v8079_v63  ;;  %5394 = vmatprep.mubr.bf16.mxu1 %v8285_v28 }
 0x7c7   : > { %5364 = vmatprep.subr.bf16.mxu1 %v8084_v1 }
 0x7ca   : > { %5365 = vmatpush1.bf16.msra.mxu1 %v8082_v4 }
 0x7cb   : > { %5366 = vmatprep.subr.bf16.mxu1 %v8087_v20 }
 0x7ce   : > { %5367 = vmatpush1.bf16.msra.mxu1 %v8085_v5 }
 0x7cf   : > { %5368 = vmatprep.subr.bf16.mxu1 %v8090_v29 }
 0x7d2   : > { %5369 = vmatpush1.bf16.msra.mxu1 %v8088_v33 }
 0x7d3   : > { %5370 = vmatprep.subr.bf16.mxu1 %v8093_v39 }
 0x7d6   : > { %5371 = vmatpush1.bf16.msra.mxu1 %v8091_v8 }
 0x7d7   : > { %5372 = vmatprep.subr.bf16.mxu1 %v8096_v61 }
 0x7da   : > { %5373 = vmatpush1.bf16.msra.mxu1 %v8094_v0 }
 0x7db   : > { %5374 = vmatprep.subr.bf16.mxu1 %v8099_v2 }
 0x7de   : > { %5375 = vmatpush1.bf16.msra.mxu1 %v8097_v12 }
 0x7df   : > { %5376 = vmatprep.subr.bf16.mxu1 %v8102_v15 }
 0x7e2   : > { %5377 = vmatpush1.bf16.msra.mxu1 %v8100_v16 }
 0x7e3   : > { %5559 = vmatprep.subr.bf16.mxu1 %v8105_v41 }
 0x7e5   : > { %5395 = vmatmul.mubr.bf16.vlgmr.msra.gmra.mrb[24].mxu1 %v5264_v3  ;;  %v8115_v3 = vld [vmem:[%s9973_s11 + $0x440] ss:$8 sps:$4 sm:$0xff]  }
 0x7e6   : > { %5560 = vmatpush1.bf16.msra.mxu1 %v8103_v42  ;;  %5591 = vmatprep.mubr.bf16.mxu1 %v8285_v28  ;;  %v8112_v28 = vld [vmem:[%s9973_s11 + $0x430] ss:$8 sps:$4 sm:$0xff]  }
 0x7e7   : > { %5561 = vmatprep.subr.bf16.mxu1 %v8108_v38 }
 0x7ea   : > { %5562 = vmatpush1.bf16.msra.mxu1 %v8106_v10 }
 0x7eb   : > { %5563 = vmatprep.subr.bf16.mxu1 %v8111_v51 }
 0x7ee   : > { %5564 = vmatpush1.bf16.msra.mxu1 %v8109_v34 }
 0x7ef   : > { %5565 = vmatprep.subr.bf16.mxu1 %v8114_v58 }
 0x7f2   : > { %5566 = vmatpush1.bf16.msra.mxu1 %v8112_v28 }
 0x7f3   : > { %5567 = vmatprep.subr.bf16.mxu1 %v8117_v62 }
 0x7f6   : > { %5568 = vmatpush1.bf16.msra.mxu1 %v8115_v3 }
 0x7f7   : > { %5569 = vmatprep.subr.bf16.mxu1 %v8120_v7  ;;  %v8143_v7 = vld [vmem:[#allocation5] sm:$0xff]  }
 0x7fa   : > { %5570 = vmatpush1.bf16.msra.mxu1 %v8118_v11 }
 0x7fb   : > { %5571 = vmatprep.subr.bf16.mxu1 %v8123_v17  ;;  %v8144_v17 = vld [vmem:[#allocation5 + $0x8] sm:$0xff]  }
 0x7fe   : > { %5572 = vmatpush1.bf16.msra.mxu1 %v8121_v18  ;;  %v8145_v18 = vld [vmem:[#allocation5 + $0x10] sm:$0xff]  }
 0x7ff   : > { %5573 = vmatprep.subr.bf16.mxu1 %v8126_v22  ;;  %v8146_v22 = vld [vmem:[#allocation5 + $0x18] sm:$0xff]  }
 0x802   : > { %5574 = vmatpush1.bf16.msra.mxu1 %v8124_v23  ;;  %v8147_v23 = vld [vmem:[#allocation5 + $0x20] sm:$0xff]  }
 0x805   : > { %5592 = vmatmul.mubr.bf16.vlgmr.msra.gmra.mrb[24].mxu1 %v5461_v31  ;;  %v8135_v31 = vld [vmem:[%s9976_s14 + $0x60] sm:$0xff]  }
 0x806   : > { %7114 = vmatprep.subr.bf16.mxu0 %v8135_v31 }
 0x807   : > { %7115 = vmatpush3.bf16.msra.mxu0 %v8136_v25 }
 0x808   : > { %7116 = vmatprep.subr.bf16.mxu0 %v8137_v27 }
 0x80b   : > { %7117 = vmatpush3.bf16.msra.mxu0 %v8138_v30 }
 0x80c   : > { %7118 = vmatprep.subr.bf16.mxu0 %v8139_v32 }
 0x80f   : > { %7119 = vmatpush3.bf16.msra.mxu0 %v8140_v36 }
 0x810   : > { %7120 = vmatprep.subr.bf16.mxu0 %v8141_v37 }
 0x813   : > { %7121 = vmatpush3.bf16.msra.mxu0 %v8142_v40 }
 0x814   : > { %7563 = vmatprep.subr.bf16.mxu0 %v8283_v6 }
 0x8d8   : > { %v5593_v13 = vpop.f32.mrb[24].mxu1 }
 0x8d9   : > { %v5618_v50 = vmul.f32 %v5611_v19, %v5593_v13  ;;  %v5595_v21 = vpop.f32.mrb[25].mxu1 }
 0x8da   : > { %v5619_v52 = vmul.f32 %v5615_v35, %v5595_v21  ;;  %v5597_v53 = vpop.f32.mrb[26].mxu1 }
 0x8db   : > { %v5634_v57 = vadd.f32 %v5627_v59, %v5618_v50  ;;  %v5620_v60 = vmul.f32 %v5611_v19, %v5597_v53  ;;  %v5599_v55 = vpop.f32.mrb[27].mxu1 }
 0x8dc   : > { %v5635_v63 = vadd.f32 %v5631_v49, %v5619_v52  ;;  %v5621_v1 = vmul.f32 %v5615_v35, %v5599_v55 }
 0x8dd   : > { %v5636_v4 = vadd.f32 %v5627_v59, %v5620_v60  ;;  %v5638_v5 = vmax.f32 %v5634_v57, 0.0 }
 0x8de   : > { %v5637_v20 = vadd.f32 %v5631_v49, %v5621_v1  ;;  %v5639_v33 = vmax.f32 %v5635_v63, 0.0 }
 0x8df   : > { %v5640_v29 = vmax.f32 %v5636_v4, 0.0 }
 0x8e0   : > { %v5641_v39 = vmax.f32 %v5637_v20, 0.0 }
 0x8e1   : > { %v5642_v8 = vadd.f32 %v5640_v29, %v5638_v5 }
 0x8e2   : > { %v5649_v61 = vadd.f32 %v5641_v39, %v5639_v33 }
 0x8e3   : > { %v5643_v0 = vrot.slane %v5642_v8, 4 }
 0x8e4   : > { %v5650_v2 = vrot.slane %v5649_v61, 4 }
 0x8e5   : > { %v5644_v12 = vadd.f32 %v5643_v0, %v5642_v8 }
 0x8e6   : > { %v5651_v15 = vadd.f32 %v5650_v2, %v5649_v61 }
 0x8e7   : > { %v5645_v16 = vrot.slane %v5644_v12, 2 }
 0x8e8   : > { %v5652_v41 = vrot.slane %v5651_v15, 2 }
 0x8e9   : > { %v5646_v42 = vadd.f32 %v5645_v16, %v5644_v12 }
 0x8ea   : > { %v5653_v38 = vadd.f32 %v5652_v41, %v5651_v15 }
 0x8eb   : > { %v5647_v10 = vrot.slane %v5646_v42, 1 }
 0x8ec   : > { %v5654_v51 = vrot.slane %v5653_v38, 1 }
 0x8ed   : > { %v5648_v34 = vadd.f32 %v5647_v10, %v5646_v42 }
 0x8ee   : > { %v5655_v58 = vadd.f32 %v5654_v51, %v5653_v38 }
 0x8ef   : > { %v5657_v28 = vmul.f32 0.0625, %v5648_v34 }
 0x8f0   : > { %v5658_v62 = vmul.f32 0.0625, %v5655_v58 }
 0x8f1   : > { %v5659_v11 = vpack.c.bf16 %v5657_v28, %v5657_v28 }
 0x8f2   : > { %v5660_v3 = vpack.c.bf16 %v5658_v62, %v5658_v62 }
 0x8f4   : > { %5822 = vmatprep.mubr.bf16.mxu0 %v5660_v3 }
 0x8f5   : > { %5823 = vmatmul.mubr.bf16.vlgmr.msra.gmra.mrb[204].mxu0 %v5659_v11 }
 0x8f6   : > { %7564 = vmatpush3.bf16.msra.mxu0 %v8143_v7  ;;  %7579 = vmatprep.mubr.msk.bf16.mxu0 %vm8284_vm2, %v8283_v6 }
 0x8f7   : > { %7565 = vmatprep.subr.bf16.mxu0 %v8283_v6 }
 0x8fa   : > { %7566 = vmatpush3.bf16.msra.mxu0 %v8144_v17 }
 0x8fb   : > { %7567 = vmatprep.subr.bf16.mxu0 %v8283_v6 }
 0x8fe   : > { %7568 = vmatpush3.bf16.msra.mxu0 %v8145_v18 }
 0x8ff   : > { %7569 = vmatprep.subr.bf16.mxu0 %v8283_v6 }
 0x902   : > { %7570 = vmatpush3.bf16.msra.mxu0 %v8146_v22 }
 0x903   : > { %7571 = vmatprep.subr.bf16.mxu0 %v8283_v6 }
 0x906   : > { %7572 = vmatpush3.bf16.msra.mxu0 %v8147_v23 }
 0x907   : > { %7573 = vmatprep.subr.bf16.mxu0 %v8283_v6 }
 0x90a   : > { %7574 = vmatpush3.bf16.msra.mxu0 %v8148_v26 }
 0x90b   : > { %7575 = vmatprep.subr.bf16.mxu0 %v8283_v6 }
 0x90e   : > { %7576 = vmatpush3.bf16.msra.mxu0 %v8149_v9 }
 0x90f   : > { %7577 = vmatprep.subr.bf16.mxu0 %v8283_v6  ;;  %v5848_v6 = vld [vmem:[%s10018_s2] sm:$0x1]  ;;  %s8213_s2 = scalar_lea.vmem %s8212_s18, 32 }
 0x910   : > { %p8215_p7 = scmp.lt.s32.totalorder %s8213_s2, %s8207_s0 }
 0x912   : > { %7578 = vmatpush3.bf16.msra.mxu0 %v8150_v14  ;;  %p8216_p8 = por %p8215_p7, %p8214_p4 }
 0x914   : > { %p8217_p11 = pnand %p8216_p8, %p8210_p3 }
 0x9c8   : > { %v7122_v24 = vpop.f32.mrb[204].mxu0 }
 0x9c9   : > { %v7123_v54 = vpop.f32.mrb[205].mxu0 }
 0x9ca   : > { %v7124_v31 = vadd.f32 %v7123_v54, %v7122_v24  ;;  %v7125_v25 = vpop.f32.mrb[206].mxu0 }
 0x9cb   : > { %v7126_v27 = vpop.f32.mrb[207].mxu0 }
 0x9cc   : > { %v5825_v30 = vadd.f32 %v7124_v31, %v5693_v56 }
 0x9ce   : > { %v5830_v32 = vmax.f32 %v5825_v30, 0.0 }
 0x9d0   : > { %v5831_v36 = vpack.c.bf16 %v5830_v32, %v5830_v32 }
 0x9d2   : > { %7580 = vmatmul.mubr.bf16.vlgmr.msra.gmra.mrb[208].mxu0 %v5831_v36 }
 0xaa5   : > { %v5931_v37 = vpop.f32.mrb[208].mxu0 }
 0xaa6   : > { %v5932_v40 = vadd.f32 %v5931_v37, %v5848_v6  ;;  %v7581_v43 = vpop.f32.mrb[209].mxu0 }
 0xaa7   : > { %v5934_v44 = vpop.f32.mrb[210].mxu0 }
 0xaa8   : > { %5937 = vst [vmem:[%s597_s24] sm:$0x1] %v5932_v40  ;;  %v7582_v45 = vpop.f32.mrb[211].mxu0 }
 0xaa9   : > { %8220 = shalt.err (!%p8217_p11)
}
 0xaaa   : > { %s8221_s26 = scalar_lea.hbm %s9920_s25, 16  ;;  %s8225_s22 = scalar_lea.hbm %s10021_s23, 32 }
 0xaab   : > { %p8222_p13 = scmp.ne.s32.totalorder %s9920_s25, %s8221_s26  ;;  %p8226_p6 = scmp.lt.u32.totalorder %s9920_s25, %s10021_s23 }
 0xaac   : > { %p8227_p9 = scmp.lt.u32.totalorder %s8225_s22, %s8221_s26  ;;  %p8229_p12 = scmp.lt.u32.totalorder %s8221_s26, %s9920_s25 }
 0xaad   : > { %p8223_p5 = pnand %p8222_p13, %p10022_p1 }
 0xaae   : > { %p8228_p10 = por %p8227_p9, %p8226_p6 }
 0xaaf   : > { %p8224_p0 = pneg %p8223_p5 }
 0xab0   : > { %p8230_p2 = por %p8229_p12, %p8228_p10 }
 0xab2   : > { %p8231_p3 = pnand %p8230_p2, %p8224_p0 }
 0xab4   : > { %8234 = shalt.err (!%p8231_p3)
}
 0xab5   : > { %7703 = dma.vmem_to_hbm [thread:$0]  (%p10022_p1), %s9922_s29, 16, %s9920_s25, %s5939_s20  }
 0xab6 PF: > { %s10023_s0 = sld [smem:[#allocation13_spill]]  ;;  %s10024_s17 = sld [smem:[#allocation11_spill]] }
 0xab7   : > { %s10025_s18 = sld [smem:[#allocation17_spill]] }
 0xabc   : > { %p7720_p4 = scmp.ge.s32.totalorder %s10023_s0, 2  ;;  %s5963_s2 = sand.u32 1, %s10024_s17  }
 0xabd   : > { %p10026_p7 = scmp.ne.s32.totalorder %s10025_s18, 0  ;;  %s5964_s21 = scalar_lea.sflag [#allocation4], %s5963_s2 }
 0xabf   : > { %p7713_p8 = pnand %p7720_p4, %p10026_p7 }
 0xac1   : > { %8260 = dma.done.wait (!%p7713_p8), %s5964_s21, 16  }
 0xac2   : > { %8262 = vsyncadd (!%p7713_p8), %s5964_s21, 4294967280  ;;  %s10027_s30 = sld [smem:[#allocation14_spill]]  ;;  %s10028_s26 = sld [smem:[#allocation12_spill]] }
 0xac3   : > { %s10029_s29 = sld [smem:[#allocation15_spill]]  ;;  %s10030_s27 = smov %s8269_s28 }
 0xac8   : > { %p30_p11 = scmp.ge.s32.totalorder %s10027_s30, 4   ;;  %s10031_s28 = smov %s10028_s26 }
 0xaca   :  { %32 = sbr.rel (!%p30_p11) target bundleno = 11 (0xb), region = 174 }
 0xad1   :  { %5968 = vsyncpa [#allocation3], 1 }
 0xad2   :  { %5970 = vsyncpa [#allocation3 + $0x1], 1 }
 0xad3   :  { %5971 = vsyncpa [#allocation6], 1 }
 0xad4   :  { %5972 = vsyncpa [#allocation4], 1 }
 0xad5   :  { %5974 = vsyncpa [#allocation4 + $0x1], 1 }

</bundles_post_ra>
